<compile_context>
chip_gen: v5e
topology: v5e:2x2
jax: 0.10.0
libtpu: 0.0.40
codegen_flags: <defaults>
</compile_context>

<pallas_src>
import functools

import numpy as np
import jax
import jax.numpy as jnp
from jax import lax
from jax.experimental import pallas as pl
from jax.experimental.pallas import tpu as pltpu

EPS = 1e-5     # PyTorch GroupNorm default
LANE = 128     # TPU lane width


# ----------------------------------------------------------------------------
# generation-aware configuration helpers
# ----------------------------------------------------------------------------
def _device_kind():
    try:
        return jax.devices()[0].device_kind.lower()
    except Exception:
        return ""


def _is_narrow_mxu_part():
    # v2/v3/v4/v5 parts have 128-wide MXU passes (and v5e has no bf16 EUP/VPU).
    kind = _device_kind()
    return any(t in kind for t in ("v2", "v3", "v4", "v5"))


def _vmem_capacity_bytes():
    try:
        return int(pltpu.get_tpu_info().vmem_capacity_bytes)
    except Exception:
        return 128 * 1024 * 1024   # v5e/v6e default; conservative for v7x fallback


def _attention_vmem_footprint(dim, lp, heads, tq, mxu_bytes):
    f = 2 * dim * lp * 4                       # double-buffered full-seq input block (f32)
    f += 2 * dim * lp * mxu_bytes              # resident K/V scratch
    f += 3 * heads * tq * lp * 4               # scores / exp / attn live tensors (f32)
    f += 2 * dim * tq * 4                      # double-buffered output block
    f += 2 * (3 * dim * dim + dim * dim + 4 * dim) * mxu_bytes   # weights + biases (dbuf)
    return f


def _pick_query_tile(dim, lp, heads, mxu_bytes):
    if _is_narrow_mxu_part() or lp % 256 != 0:
        return min(128, lp)
    if _attention_vmem_footprint(dim, lp, heads, 256, mxu_bytes) < 0.5 * _vmem_capacity_bytes():
        return 256
    return min(128, lp)


# ----------------------------------------------------------------------------
# kernel
# ----------------------------------------------------------------------------
def _scripted_attention_kernel(xf_ref, gs_ref, gb_ref, wq_ref, wkv_ref,
                               bq_ref, bkv_ref, wo_ref, bo_ref, o_ref,
                               kv_ref, mean_ref, istd_ref,
                               *, dim, heads, seq, lp, tq,
                               mxu_dtype, exp_dtype, approx):
    f32 = jnp.float32
    qi = pl.program_id(1)

    # -------- per-batch hoist: GroupNorm stats + K/V projection (qi == 0) ----
    @pl.when(qi == 0)
    def _():
        x = xf_ref[0].astype(f32)                                    # (dim, Lp)
        # per-channel sums (padded cols are zero, so they do not pollute the sum)
        s = jnp.sum(x, axis=1, keepdims=True)                        # (dim, 1)
        mean_g = jnp.dot(gs_ref[...], s, preferred_element_type=f32)      # (groups, 1)
        mean = jnp.dot(gb_ref[...], mean_g, preferred_element_type=f32)   # (dim, 1)
        xc = x - mean
        if lp > seq:                                                 # ignore padded keys
            valid = lax.broadcasted_iota(jnp.int32, (1, lp), 1) < seq
            xc_v = jnp.where(valid, xc, 0.0)
        else:
            xc_v = xc
        ss = jnp.sum(xc_v * xc_v, axis=1, keepdims=True)             # (dim, 1)
        var_g = jnp.dot(gs_ref[...], ss, preferred_element_type=f32)
        var = jnp.dot(gb_ref[...], var_g, preferred_element_type=f32)
        inv_std = lax.rsqrt(var + EPS)
        mean_ref[...] = mean
        istd_ref[...] = inv_std
        y = (xc * inv_std).astype(mxu_dtype)                         # (dim, Lp)
        kv = jnp.dot(wkv_ref[...], y, preferred_element_type=f32) + bkv_ref[...]
        kv_ref[...] = kv.astype(kv_ref.dtype)                        # (2*dim, Lp) resident

    # -------- per-query-block attention ---------------------------------------
    q_start = pl.multiple_of(qi * tq, LANE)
    xq = xf_ref[0, :, pl.ds(q_start, tq)].astype(f32)                # (dim, TQ) raw block
    yq = ((xq - mean_ref[...]) * istd_ref[...]).astype(mxu_dtype)    # normalized Q source
    # 1/sqrt(head_dim) already folded into wq/bq in the wrapper
    q = jnp.dot(wq_ref[...], yq, preferred_element_type=f32) + bq_ref[...]   # (dim, TQ)

    hd = dim // heads
    kv = kv_ref[...]
    q3 = q.astype(mxu_dtype).reshape(heads, hd, tq)                  # free leading-dim split
    k3 = kv[:dim].reshape(heads, hd, lp)
    v3 = kv[dim:].reshape(heads, hd, lp)

    scores = jnp.einsum('hdq,hdk->hqk', q3, k3,
                        preferred_element_type=f32)                  # (h, TQ, Lp), f32
    if lp > seq:
        # mask padded keys in f32 BEFORE any bf16 cast (avoids -inf overflow)
        kmask = lax.broadcasted_iota(jnp.int32, (1, 1, lp), 2) < seq
        scores = jnp.where(kmask, scores, -1e30)
    m = jnp.max(scores, axis=-1, keepdims=True)
    sub = scores - m
    e = jnp.exp(sub.astype(exp_dtype))                               # EUP (bf16 on v6e/v7x)
    e_f32 = e if exp_dtype == f32 else e.astype(f32)
    denom = jnp.sum(e_f32, axis=-1, keepdims=True)                   # f32 accumulation
    attn = (e * pl.reciprocal(denom, approx=approx).astype(exp_dtype)).astype(mxu_dtype)

    out3 = jnp.einsum('hdk,hqk->hdq', v3, attn,
                      preferred_element_type=f32)                    # (h, hd, TQ)
    attn_out = out3.reshape(dim, tq)                                 # free merge

    z = jnp.dot(wo_ref[...], attn_out.astype(mxu_dtype),
                preferred_element_type=f32) + bo_ref[...]            # (dim, TQ)
    o_ref[0] = (z + xq).astype(o_ref.dtype)                          # residual add


# ----------------------------------------------------------------------------
# wrapper
# ----------------------------------------------------------------------------
def scripted_attention(x, params, heads=4, mxu_dtype=jnp.float32, tq=None):
    """ScriptedAttention forward (use_2d=False). x: (B, dim, L) float32."""
    w_in, b_in, w_o, b_o, gamma, beta = params
    bs, dim, seq = x.shape
    groups = min(dim // 4, 32)
    cg = dim // groups
    assert dim % heads == 0 and dim % groups == 0

    # pad L to a lane-dense multiple of 128 (padded keys are masked in-kernel)
    lp = ((seq + LANE - 1) // LANE) * LANE
    xp = jnp.pad(x, ((0, 0), (0, 0), (0, lp - seq))) if lp != seq else x

    mxu_bytes = jnp.dtype(mxu_dtype).itemsize
    if tq is None:
        tq = _pick_query_tile(dim, lp, heads, mxu_bytes)
    tq = min(tq, lp)
    assert tq % LANE == 0 and lp % tq == 0
    n_q = lp // tq

    f32 = jnp.float32
    w_in, b_in = w_in.astype(f32), b_in.astype(f32)
    w_o, b_o = w_o.astype(f32), b_o.astype(f32)
    gamma, beta = gamma.astype(f32), beta.astype(f32)

    # fold GroupNorm affine (gamma, beta) into the in-projection, and fold the
    # 1/sqrt(head_dim) attention scale into the Q projection.
    hd = dim // heads
    scale = 1.0 / float(np.sqrt(hd))
    w_in_f = w_in * gamma[None, :]
    b_in_f = b_in + w_in @ beta
    w_q = (w_in_f[:dim] * scale).astype(mxu_dtype)       # (dim, dim)
    w_kv = w_in_f[dim:].astype(mxu_dtype)                # (2*dim, dim)
    b_q = (b_in_f[:dim] * scale).reshape(dim, 1)
    b_kv = b_in_f[dim:].reshape(2 * dim, 1)
    w_oc = w_o.astype(mxu_dtype)                         # (dim, dim)
    b_oc = b_o.reshape(dim, 1)

    # small group-membership matrices (groups,dim)/(dim,groups)
    gid = np.arange(dim) // cg
    gs = (gid[None, :] == np.arange(groups)[:, None]).astype(np.float32)
    gs = jnp.asarray(gs / float(cg * seq))               # scaled reduce (valid length)
    gb = jnp.asarray((gid[:, None] == np.arange(groups)[None, :]).astype(np.float32))

    # bf16 exp only on wide-MXU parts (v6e/v7x have bf16 EUP; v5e does not)
    use_bf16 = (mxu_dtype != jnp.float32)
    exp_dtype = mxu_dtype if (use_bf16 and not _is_narrow_mxu_part()) else jnp.float32

    kernel = functools.partial(
        _scripted_attention_kernel, dim=dim, heads=heads, seq=seq, lp=lp, tq=tq,
        mxu_dtype=mxu_dtype, exp_dtype=exp_dtype, approx=use_bf16)

    def const_spec(a):
        n = a.ndim
        return pl.BlockSpec(a.shape, lambda b, qi, _n=n: (0,) * _n)

    vmem_cap = _vmem_capacity_bytes()
    vmem_limit = int(max(32 * 1024 * 1024, min(0.75 * vmem_cap, 100 * 1024 * 1024)))

    out = pl.pallas_call(
        kernel,
        out_shape=jax.ShapeDtypeStruct((bs, dim, lp), x.dtype),
        grid_spec=pltpu.PrefetchScalarGridSpec(
            num_scalar_prefetch=0,
            grid=(bs, n_q),
            in_specs=[
                # single activation stream: full sequence, resident per batch
                pl.BlockSpec((1, dim, lp), lambda b, qi: (b, 0, 0)),
                const_spec(gs), const_spec(gb),
                const_spec(w_q), const_spec(w_kv),
                const_spec(b_q), const_spec(b_kv),
                const_spec(w_oc), const_spec(b_oc),
            ],
            out_specs=pl.BlockSpec((1, dim, tq), lambda b, qi: (b, 0, qi)),
            scratch_shapes=[
                pltpu.VMEM((2 * dim, lp), mxu_dtype),     # hoisted K/V (per batch)
                pltpu.VMEM((dim, 1), jnp.float32),        # GroupNorm mean
                pltpu.VMEM((dim, 1), jnp.float32),        # GroupNorm inv_std
            ]),
        compiler_params=pltpu.CompilerParams(
            # batch parallel (megacore shards by batch), qi sequential so the
            # per-batch KV/stats scratch computed at qi==0 is legally reused.
            dimension_semantics=("parallel", "arbitrary"),
            vmem_limit_bytes=vmem_limit),
    )(xp, gs, gb, w_q, w_kv, b_q, b_kv, w_oc, b_oc)

    return out[:, :, :seq] if lp != seq else out


# ----------------------------------------------------------------------------
# pure-JAX reference & test harness
# ----------------------------------------------------------------------------
def reference_forward(x, params, heads=4):
    """Pure-JAX reference, mirrors the PyTorch ScriptedAttention line by line."""
    w_in, b_in, w_o, b_o, gamma, beta = params
    bs, dim, L = x.shape
    groups = min(dim // 4, 32)
    cg = dim // groups
    prec = lax.Precision.HIGHEST
    xr = x.reshape(bs, groups, cg, L)
    mean = xr.mean(axis=(2, 3), keepdims=True)
    var = ((xr - mean) ** 2).mean(axis=(2, 3), keepdims=True)
    y = ((xr - mean) / jnp.sqrt(var + EPS)).reshape(bs, dim, L)
    y = y * gamma[None, :, None] + beta[None, :, None]
    yt = jnp.transpose(y, (0, 2, 1))                               # (B, L, dim)
    qkv = jnp.matmul(yt, w_in.T, precision=prec) + b_in[None, None, :]
    q, k, v = jnp.split(qkv, 3, axis=-1)
    hd = dim // heads

    def split_heads(t):
        return t.reshape(bs, L, heads, hd).transpose(0, 2, 1, 3)

    qh, kh, vh = split_heads(q), split_heads(k), split_heads(v)
    scores = jnp.einsum('bhqd,bhkd->bhqk', qh, kh, precision=prec) / np.sqrt(hd)
    attn = jax.nn.softmax(scores, axis=-1)
    out = jnp.einsum('bhqk,bhkd->bhqd', attn, vh, precision=prec)
    out = out.transpose(0, 2, 1, 3).reshape(bs, L, dim)
    z = jnp.matmul(out, w_o.T, precision=prec) + b_o[None, None, :]
    return jnp.transpose(z, (0, 2, 1)) + x


def make_params(dim, key):
    k1, k2, k3, k4, k5, k6 = jax.random.split(key, 6)
    w_in = jax.random.normal(k1, (3 * dim, dim), jnp.float32) * 0.05
    b_in = jax.random.normal(k2, (3 * dim,), jnp.float32) * 0.02
    # NOTE: PyTorch zero-inits out_proj (module == identity at init); nonzero
    # weights here so the attention path is actually exercised by the checks.
    w_o = jax.random.normal(k3, (dim, dim), jnp.float32) * 0.05
    b_o = jax.random.normal(k4, (dim,), jnp.float32) * 0.02
    gamma = 1.0 + 0.1 * jax.random.normal(k5, (dim,), jnp.float32)
    beta = 0.1 * jax.random.normal(k6, (dim,), jnp.float32)
    return (w_in, b_in, w_o, b_o, gamma, beta)


if __name__ == "__main__":
    key = jax.random.PRNGKey(0)
    kp, kx1, kx2, kx3 = jax.random.split(key, 4)

    heads = 4
    bs, dim = 2, 32                     # 8 groups of 4 channels
    params = make_params(dim, kp)

    # 1) f32 path, TQ forced to 128 so the per-batch KV hoist is reused across
    #    two query blocks (exercises the scratch-resident K/V path).
    seq1 = 256
    x1 = jax.random.normal(kx1, (bs, dim, seq1), jnp.float32)
    ref1 = reference_forward(x1, params, heads=heads)
    out1 = jax.block_until_ready(
        scripted_attention(x1, params, heads=heads, mxu_dtype=jnp.float32, tq=128))
    np.testing.assert_allclose(np.asarray(out1), np.asarray(ref1),
                               rtol=5e-4, atol=5e-4)

    # 2) bf16-at-MXU-boundaries fast path with auto tile / VMEM configuration
    #    (stats / softmax denominator / residual stay f32).
    seq2 = 512
    x2 = jax.random.normal(kx2, (bs, dim, seq2), jnp.float32)
    ref2 = reference_forward(x2, params, heads=heads)
    out2 = jax.block_until_ready(
        scripted_attention(x2, params, heads=heads, mxu_dtype=jnp.bfloat16))
    np.testing.assert_allclose(np.asarray(out2), np.asarray(ref2),
                               rtol=2e-2, atol=2e-2)

    # 3) L not a multiple of 128: exercises wrapper padding + in-kernel key mask.
    seq3 = 100
    x3 = jax.random.normal(kx3, (bs, dim, seq3), jnp.float32)
    ref3 = reference_forward(x3, params, heads=heads)
    out3 = jax.block_until_ready(
        scripted_attention(x3, params, heads=heads, mxu_dtype=jnp.float32))
    np.testing.assert_allclose(np.asarray(out3), np.asarray(ref3),
                               rtol=5e-4, atol=5e-4)

    print("KERNEL_OK")
</pallas_src>

<mosaic_0001>
module attributes {stable_mosaic.version = 11 : i64} {
  func.func @_scripted_attention_kernel(%arg0: i32, %arg1: i32, %arg2: memref<1x32x256xf32, #tpu.memory_space<vmem>>, %arg3: memref<8x32xf32, #tpu.memory_space<vmem>>, %arg4: memref<32x8xf32, #tpu.memory_space<vmem>>, %arg5: memref<32x32xf32, #tpu.memory_space<vmem>>, %arg6: memref<64x32xf32, #tpu.memory_space<vmem>>, %arg7: memref<32x1xf32, #tpu.memory_space<vmem>>, %arg8: memref<64x1xf32, #tpu.memory_space<vmem>>, %arg9: memref<32x32xf32, #tpu.memory_space<vmem>>, %arg10: memref<32x1xf32, #tpu.memory_space<vmem>>, %arg11: memref<1x32x128xf32, #tpu.memory_space<vmem>>, %arg12: memref<64x256xf32, #tpu.memory_space<vmem>>, %arg13: memref<32x1xf32, #tpu.memory_space<vmem>>, %arg14: memref<32x1xf32, #tpu.memory_space<vmem>>) attributes {dimension_semantics = [#tpu.dimension_semantics<parallel>, #tpu.dimension_semantics<arbitrary>], iteration_bounds = array<i64: 2, 2>, scalar_prefetch = 0 : i64, scratch_operands = 3 : i64, tpu.core_type = #tpu.core_type<tc>, window_params = [{transform_indices = @transform_0, window_bounds = array<i64: 1, 32, 256>}, {pipeline_mode = #tpu.pipeline_mode<synchronous>, transform_indices = @transform_1, window_bounds = array<i64: 8, 32>}, {pipeline_mode = #tpu.pipeline_mode<synchronous>, transform_indices = @transform_2, window_bounds = array<i64: 32, 8>}, {pipeline_mode = #tpu.pipeline_mode<synchronous>, transform_indices = @transform_3, window_bounds = array<i64: 32, 32>}, {pipeline_mode = #tpu.pipeline_mode<synchronous>, transform_indices = @transform_4, window_bounds = array<i64: 64, 32>}, {pipeline_mode = #tpu.pipeline_mode<synchronous>, transform_indices = @transform_5, window_bounds = array<i64: 32, 1>}, {pipeline_mode = #tpu.pipeline_mode<synchronous>, transform_indices = @transform_6, window_bounds = array<i64: 64, 1>}, {pipeline_mode = #tpu.pipeline_mode<synchronous>, transform_indices = @transform_7, window_bounds = array<i64: 32, 32>}, {pipeline_mode = #tpu.pipeline_mode<synchronous>, transform_indices = @transform_8, window_bounds = array<i64: 32, 1>}, {transform_indices = @transform_9, window_bounds = array<i64: 1, 32, 128>}]} {
    %c0_i32 = arith.constant 0 : i32
    %0 = arith.cmpi eq, %arg1, %c0_i32 : i32
    %1 = arith.extui %0 : i1 to i32
    %c0_i32_0 = arith.constant 0 : i32
    %2 = arith.cmpi ne, %1, %c0_i32_0 : i32
    scf.if %2 {
      %c0_24 = arith.constant 0 : index
      %c0_25 = arith.constant 0 : index
      %c0_26 = arith.constant 0 : index
      %47 = vector.load %arg2[%c0_24, %c0_25, %c0_26] : memref<1x32x256xf32, #tpu.memory_space<vmem>>, vector<1x32x256xf32>
      %48 = vector.shape_cast %47 : vector<1x32x256xf32> to vector<32x256xf32>
      %cst_27 = arith.constant dense<0.000000e+00> : vector<32xf32>
      %49 = vector.multi_reduction <add>, %48, %cst_27 [1] : vector<32x256xf32> to vector<32xf32>
      %50 = vector.shape_cast %49 : vector<32xf32> to vector<32x1xf32>
      %c0_28 = arith.constant 0 : index
      %c0_29 = arith.constant 0 : index
      %51 = vector.load %arg3[%c0_28, %c0_29] : memref<8x32xf32, #tpu.memory_space<vmem>>, vector<8x32xf32>
      %cst_30 = arith.constant dense<0.000000e+00> : vector<8x1xf32>
      %52 = tpu.matmul %51, %50, %cst_30 {dimension_numbers = #tpu.dot_dimension_numbers<[1], [0], [0], [1], [0, 0, 1, 1], [], []>} : vector<8x32xf32>, vector<32x1xf32>, vector<8x1xf32> -> vector<8x1xf32>
      %c0_31 = arith.constant 0 : index
      %c0_32 = arith.constant 0 : index
      %53 = vector.load %arg4[%c0_31, %c0_32] : memref<32x8xf32, #tpu.memory_space<vmem>>, vector<32x8xf32>
      %cst_33 = arith.constant dense<0.000000e+00> : vector<32x1xf32>
      %54 = tpu.matmul %53, %52, %cst_33 {dimension_numbers = #tpu.dot_dimension_numbers<[1], [0], [0], [1], [0, 0, 1, 1], [], []>} : vector<32x8xf32>, vector<8x1xf32>, vector<32x1xf32> -> vector<32x1xf32>
      %55 = vector.broadcast %54 : vector<32x1xf32> to vector<32x256xf32>
      %56 = arith.subf %48, %55 : vector<32x256xf32>
      %57 = arith.mulf %56, %56 : vector<32x256xf32>
      %cst_34 = arith.constant dense<0.000000e+00> : vector<32xf32>
      %58 = vector.multi_reduction <add>, %57, %cst_34 [1] : vector<32x256xf32> to vector<32xf32>
      %59 = vector.shape_cast %58 : vector<32xf32> to vector<32x1xf32>
      %c0_35 = arith.constant 0 : index
      %c0_36 = arith.constant 0 : index
      %60 = vector.load %arg3[%c0_35, %c0_36] : memref<8x32xf32, #tpu.memory_space<vmem>>, vector<8x32xf32>
      %cst_37 = arith.constant dense<0.000000e+00> : vector<8x1xf32>
      %61 = tpu.matmul %60, %59, %cst_37 {dimension_numbers = #tpu.dot_dimension_numbers<[1], [0], [0], [1], [0, 0, 1, 1], [], []>} : vector<8x32xf32>, vector<32x1xf32>, vector<8x1xf32> -> vector<8x1xf32>
      %c0_38 = arith.constant 0 : index
      %c0_39 = arith.constant 0 : index
      %62 = vector.load %arg4[%c0_38, %c0_39] : memref<32x8xf32, #tpu.memory_space<vmem>>, vector<32x8xf32>
      %cst_40 = arith.constant dense<0.000000e+00> : vector<32x1xf32>
      %63 = tpu.matmul %62, %61, %cst_40 {dimension_numbers = #tpu.dot_dimension_numbers<[1], [0], [0], [1], [0, 0, 1, 1], [], []>} : vector<32x8xf32>, vector<8x1xf32>, vector<32x1xf32> -> vector<32x1xf32>
      %cst_41 = arith.constant 9.99999974E-6 : f32
      %64 = vector.broadcast %cst_41 : f32 to vector<32x1xf32>
      %65 = arith.addf %63, %64 : vector<32x1xf32>
      %66 = math.rsqrt %65 : vector<32x1xf32>
      %c0_42 = arith.constant 0 : index
      %c0_43 = arith.constant 0 : index
      %67 = vector.load %arg13[%c0_42, %c0_43] : memref<32x1xf32, #tpu.memory_space<vmem>>, vector<32x1xf32>
      tpu.vector_store %arg13[%c0_42, %c0_43], %54 {strides = array<i32>} : memref<32x1xf32, #tpu.memory_space<vmem>>, vector<32x1xf32>,
      %c0_44 = arith.constant 0 : index
      %c0_45 = arith.constant 0 : index
      %68 = vector.load %arg14[%c0_44, %c0_45] : memref<32x1xf32, #tpu.memory_space<vmem>>, vector<32x1xf32>
      tpu.vector_store %arg14[%c0_44, %c0_45], %66 {strides = array<i32>} : memref<32x1xf32, #tpu.memory_space<vmem>>, vector<32x1xf32>,
      %69 = vector.broadcast %66 : vector<32x1xf32> to vector<32x256xf32>
      %70 = arith.mulf %56, %69 : vector<32x256xf32>
      %c0_46 = arith.constant 0 : index
      %c0_47 = arith.constant 0 : index
      %71 = vector.load %arg6[%c0_46, %c0_47] : memref<64x32xf32, #tpu.memory_space<vmem>>, vector<64x32xf32>
      %cst_48 = arith.constant dense<0.000000e+00> : vector<64x256xf32>
      %72 = tpu.matmul %71, %70, %cst_48 {dimension_numbers = #tpu.dot_dimension_numbers<[1], [0], [0], [1], [0, 0, 1, 1], [], []>} : vector<64x32xf32>, vector<32x256xf32>, vector<64x256xf32> -> vector<64x256xf32>
      %c0_49 = arith.constant 0 : index
      %c0_50 = arith.constant 0 : index
      %73 = vector.load %arg8[%c0_49, %c0_50] : memref<64x1xf32, #tpu.memory_space<vmem>>, vector<64x1xf32>
      %74 = vector.broadcast %73 : vector<64x1xf32> to vector<64x256xf32>
      %75 = arith.addf %72, %74 : vector<64x256xf32>
      %c0_51 = arith.constant 0 : index
      %c0_52 = arith.constant 0 : index
      %76 = vector.load %arg12[%c0_51, %c0_52] : memref<64x256xf32, #tpu.memory_space<vmem>>, vector<64x256xf32>
      tpu.vector_store %arg12[%c0_51, %c0_52], %75 {strides = array<i32>} : memref<64x256xf32, #tpu.memory_space<vmem>>, vector<64x256xf32>,
    } else {
    }
    %c128_i32 = arith.constant 128 : i32
    %3 = arith.muli %arg1, %c128_i32 : i32
    %4 = tpu.assume_multiple %3, 128 : i32
    %c0 = arith.constant 0 : index
    %c0_1 = arith.constant 0 : index
    %5 = arith.index_cast %4 : i32 to index
    %6 = vector.load %arg2[%c0, %c0_1, %5] : memref<1x32x256xf32, #tpu.memory_space<vmem>>, vector<1x32x128xf32>
    %7 = vector.shape_cast %6 : vector<1x32x128xf32> to vector<32x128xf32>
    %c0_2 = arith.constant 0 : index
    %c0_3 = arith.constant 0 : index
    %8 = vector.load %arg13[%c0_2, %c0_3] : memref<32x1xf32, #tpu.memory_space<vmem>>, vector<32x1xf32>
    %9 = vector.broadcast %8 : vector<32x1xf32> to vector<32x128xf32>
    %10 = arith.subf %7, %9 : vector<32x128xf32>
    %c0_4 = arith.constant 0 : index
    %c0_5 = arith.constant 0 : index
    %11 = vector.load %arg14[%c0_4, %c0_5] : memref<32x1xf32, #tpu.memory_space<vmem>>, vector<32x1xf32>
    %12 = vector.broadcast %11 : vector<32x1xf32> to vector<32x128xf32>
    %13 = arith.mulf %10, %12 : vector<32x128xf32>
    %c0_6 = arith.constant 0 : index
    %c0_7 = arith.constant 0 : index
    %14 = vector.load %arg5[%c0_6, %c0_7] : memref<32x32xf32, #tpu.memory_space<vmem>>, vector<32x32xf32>
    %cst = arith.constant dense<0.000000e+00> : vector<32x128xf32>
    %15 = tpu.matmul %14, %13, %cst {dimension_numbers = #tpu.dot_dimension_numbers<[1], [0], [0], [1], [0, 0, 1, 1], [], []>} : vector<32x32xf32>, vector<32x128xf32>, vector<32x128xf32> -> vector<32x128xf32>
    %c0_8 = arith.constant 0 : index
    %c0_9 = arith.constant 0 : index
    %16 = vector.load %arg7[%c0_8, %c0_9] : memref<32x1xf32, #tpu.memory_space<vmem>>, vector<32x1xf32>
    %17 = vector.broadcast %16 : vector<32x1xf32> to vector<32x128xf32>
    %18 = arith.addf %15, %17 : vector<32x128xf32>
    %c0_10 = arith.constant 0 : index
    %c0_11 = arith.constant 0 : index
    %19 = vector.load %arg12[%c0_10, %c0_11] : memref<64x256xf32, #tpu.memory_space<vmem>>, vector<64x256xf32>
    %20 = vector.shape_cast %18 : vector<32x128xf32> to vector<4x8x128xf32>
    %21 = vector.extract_strided_slice %19 {offsets = [0, 0], sizes = [32, 256], strides = [1, 1]} : vector<64x256xf32> to vector<32x256xf32>
    %22 = vector.shape_cast %21 : vector<32x256xf32> to vector<4x8x256xf32>
    %23 = vector.extract_strided_slice %19 {offsets = [32, 0], sizes = [32, 256], strides = [1, 1]} : vector<64x256xf32> to vector<32x256xf32>
    %24 = vector.shape_cast %23 : vector<32x256xf32> to vector<4x8x256xf32>
    "tpu.trace_start"() <{level = 10 : i32, message = "hdq,hdk->hqk"}> : () -> ()
    %cst_12 = arith.constant dense<0.000000e+00> : vector<4x128x256xf32>
    %25 = tpu.matmul %20, %22, %cst_12 {dimension_numbers = #tpu.dot_dimension_numbers<[1], [1], [2], [2], [0, 0, 0, 2, 1, 2], [0], [0]>} : vector<4x8x128xf32>, vector<4x8x256xf32>, vector<4x128x256xf32> -> vector<4x128x256xf32>
    "tpu.trace_stop"() : () -> ()
    %cst_13 = arith.constant dense<0xFF800000> : vector<4x128xf32>
    %26 = vector.multi_reduction <maximumf>, %25, %cst_13 [2] : vector<4x128x256xf32> to vector<4x128xf32>
    %27 = vector.shape_cast %26 : vector<4x128xf32> to vector<4x128x1xf32>
    %28 = vector.broadcast %27 : vector<4x128x1xf32> to vector<4x128x256xf32>
    %29 = arith.subf %25, %28 : vector<4x128x256xf32>
    %30 = math.exp %29 : vector<4x128x256xf32>
    %cst_14 = arith.constant dense<0.000000e+00> : vector<4x128xf32>
    %31 = vector.multi_reduction <add>, %30, %cst_14 [2] : vector<4x128x256xf32> to vector<4x128xf32>
    %32 = vector.shape_cast %31 : vector<4x128xf32> to vector<4x128x1xf32>
    %33 = tpu.reciprocal %32 : vector<4x128x1xf32> -> vector<4x128x1xf32>
    %34 = vector.broadcast %33 : vector<4x128x1xf32> to vector<4x128x256xf32>
    %35 = arith.mulf %30, %34 : vector<4x128x256xf32>
    "tpu.trace_start"() <{level = 10 : i32, message = "hdk,hqk->hdq"}> : () -> ()
    %cst_15 = arith.constant dense<0.000000e+00> : vector<4x8x128xf32>
    %36 = tpu.matmul %24, %35, %cst_15 {dimension_numbers = #tpu.dot_dimension_numbers<[2], [2], [1], [1], [0, 0, 0, 1, 1, 1], [0], [0]>} : vector<4x8x256xf32>, vector<4x128x256xf32>, vector<4x8x128xf32> -> vector<4x8x128xf32>
    "tpu.trace_stop"() : () -> ()
    %37 = vector.shape_cast %36 : vector<4x8x128xf32> to vector<32x128xf32>
    %c0_16 = arith.constant 0 : index
    %c0_17 = arith.constant 0 : index
    %38 = vector.load %arg9[%c0_16, %c0_17] : memref<32x32xf32, #tpu.memory_space<vmem>>, vector<32x32xf32>
    %cst_18 = arith.constant dense<0.000000e+00> : vector<32x128xf32>
    %39 = tpu.matmul %38, %37, %cst_18 {dimension_numbers = #tpu.dot_dimension_numbers<[1], [0], [0], [1], [0, 0, 1, 1], [], []>} : vector<32x32xf32>, vector<32x128xf32>, vector<32x128xf32> -> vector<32x128xf32>
    %c0_19 = arith.constant 0 : index
    %c0_20 = arith.constant 0 : index
    %40 = vector.load %arg10[%c0_19, %c0_20] : memref<32x1xf32, #tpu.memory_space<vmem>>, vector<32x1xf32>
    %41 = vector.broadcast %40 : vector<32x1xf32> to vector<32x128xf32>
    %42 = arith.addf %39, %41 : vector<32x128xf32>
    %43 = arith.addf %42, %7 : vector<32x128xf32>
    %c0_21 = arith.constant 0 : index
    %c0_22 = arith.constant 0 : index
    %c0_23 = arith.constant 0 : index
    %44 = vector.load %arg11[%c0_21, %c0_22, %c0_23] : memref<1x32x128xf32, #tpu.memory_space<vmem>>, vector<1x32x128xf32>
    %45 = vector.shape_cast %44 : vector<1x32x128xf32> to vector<32x128xf32>
    %46 = vector.shape_cast %43 : vector<32x128xf32> to vector<1x32x128xf32>
    tpu.vector_store %arg11[%c0_21, %c0_22, %c0_23], %46 {strides = array<i32>} : memref<1x32x128xf32, #tpu.memory_space<vmem>>, vector<1x32x128xf32>,
    return
  }
  func.func @transform_0(%arg0: i32, %arg1: i32) -> (i32, i32, i32) {
    %c0_i32 = arith.constant 0 : i32
    %c0_i32_0 = arith.constant 0 : i32
    %c0_i32_1 = arith.constant 0 : i32
    return %arg0, %c0_i32, %c0_i32_0 : i32, i32, i32
  }
  func.func @transform_1(%arg0: i32, %arg1: i32) -> (i32, i32) {
    %c0_i32 = arith.constant 0 : i32
    %c0_i32_0 = arith.constant 0 : i32
    %c0_i32_1 = arith.constant 0 : i32
    return %c0_i32, %c0_i32_0 : i32, i32
  }
  func.func @transform_2(%arg0: i32, %arg1: i32) -> (i32, i32) {
    %c0_i32 = arith.constant 0 : i32
    %c0_i32_0 = arith.constant 0 : i32
    %c0_i32_1 = arith.constant 0 : i32
    return %c0_i32, %c0_i32_0 : i32, i32
  }
  func.func @transform_3(%arg0: i32, %arg1: i32) -> (i32, i32) {
    %c0_i32 = arith.constant 0 : i32
    %c0_i32_0 = arith.constant 0 : i32
    %c0_i32_1 = arith.constant 0 : i32
    return %c0_i32, %c0_i32_0 : i32, i32
  }
  func.func @transform_4(%arg0: i32, %arg1: i32) -> (i32, i32) {
    %c0_i32 = arith.constant 0 : i32
    %c0_i32_0 = arith.constant 0 : i32
    %c0_i32_1 = arith.constant 0 : i32
    return %c0_i32, %c0_i32_0 : i32, i32
  }
  func.func @transform_5(%arg0: i32, %arg1: i32) -> (i32, i32) {
    %c0_i32 = arith.constant 0 : i32
    %c0_i32_0 = arith.constant 0 : i32
    %c0_i32_1 = arith.constant 0 : i32
    return %c0_i32, %c0_i32_0 : i32, i32
  }
  func.func @transform_6(%arg0: i32, %arg1: i32) -> (i32, i32) {
    %c0_i32 = arith.constant 0 : i32
    %c0_i32_0 = arith.constant 0 : i32
    %c0_i32_1 = arith.constant 0 : i32
    return %c0_i32, %c0_i32_0 : i32, i32
  }
  func.func @transform_7(%arg0: i32, %arg1: i32) -> (i32, i32) {
    %c0_i32 = arith.constant 0 : i32
    %c0_i32_0 = arith.constant 0 : i32
    %c0_i32_1 = arith.constant 0 : i32
    return %c0_i32, %c0_i32_0 : i32, i32
  }
  func.func @transform_8(%arg0: i32, %arg1: i32) -> (i32, i32) {
    %c0_i32 = arith.constant 0 : i32
    %c0_i32_0 = arith.constant 0 : i32
    %c0_i32_1 = arith.constant 0 : i32
    return %c0_i32, %c0_i32_0 : i32, i32
  }
  func.func @transform_9(%arg0: i32, %arg1: i32) -> (i32, i32, i32) {
    %c0_i32 = arith.constant 0 : i32
    %c0_i32_0 = arith.constant 0 : i32
    return %arg0, %c0_i32, %arg1 : i32, i32, i32
  }
}

</mosaic_0001>

<bundles_post_ra>
// kernel: tpu_custom_call.1
= control target key start
LH: loop header
LB: loop body
LE: loop exit
PB: predicated region body
PF: predicated region fallthrough
CT: control target
= control target key end

     0   :  { %s8174_s0 = inlined_call_operand.vmem [shape: f32[2,32,256], index: 0, kind: input, shape index: {}]   ;;  %s8175_s1 = inlined_call_operand.vmem [shape: f32[8,32], index: 1, kind: input, shape index: {}]   ;;  %s8176_s2 = inlined_call_operand.vmem [shape: f32[32,8], index: 2, kind: input, shape index: {}]   ;;  %s8177_s3 = inlined_call_operand.vmem [shape: f32[32,32], index: 3, kind: input, shape index: {}]   ;;  %s8178_s4 = inlined_call_operand.vmem [shape: f32[64,32], index: 4, kind: input, shape index: {}]   ;;  %s8179_s5 = inlined_call_operand.vmem [shape: f32[32,1], index: 5, kind: input, shape index: {}]   ;;  %s8180_s6 = inlined_call_operand.vmem [shape: f32[64,1], index: 6, kind: input, shape index: {}]   ;;  %s8181_s7 = inlined_call_operand.vmem [shape: f32[32,32], index: 7, kind: input, shape index: {}]   ;;  %s8182_s8 = inlined_call_operand.vmem [shape: f32[32,1], index: 8, kind: input, shape index: {}]   ;;  %s8183_s9 = inlined_call_operand.hbm [shape: f32[2,32,256], index: 9, kind: output, shape index: {}]  }
   0x1   :  { %8396 = sst [smem:[#allocation133_spill]] %s8174_s0 }
   0x2   :  { %14 = vsyncpa [#allocation6], 0 }
   0x3   :  { %16 = vsyncpa [#allocation6 + $0x1], 0  ;;  %s4729_s30 = smov 0   ;;  %s4731_s10 = smov 0  }
   0x4   :  { %s4733_s11 = smov 0   ;;  %s4735_s12 = smov 0  }
   0x5   :  { %s4737_s13 = smov 0   ;;  %s4739_s14 = smov 0  }
   0x6   :  { %s4741_s15 = smov 0   ;;  %s4743_s16 = smov 0  }
   0x7 LB: > { %8397 = sst [smem:[#allocation8_spill]] %s4664_s14  ;;  %s3907_s17 = sadd.s32 4294967295, %s4672_s16   ;;  %s4672_s16 = sphi %s4743_s16, %s22_s16   ;;  %s4668_s15 = sphi %s4741_s15, %s9000_s15   ;;  %s4664_s14 = sphi %s4739_s14, %s8994_s14   ;;  %s4660_s13 = sphi %s4737_s13, %s8999_s13   ;;  %s4656_s12 = sphi %s4735_s12, %s8993_s12   ;;  %s4652_s11 = sphi %s4733_s11, %s8998_s11   ;;  %s4648_s10 = sphi %s4731_s10, %s8997_s10   ;;  %s4644_s30 = sphi %s4729_s30, %s8996_s30  }
   0x8   : > { %s3908_s18 = sadd.s32 4294967294, %s4672_s16   ;;  %s31_s19 = sadd.s32 1, %s4664_s14 }
   0x9   : > { %p32_p0 = scmp.ge.s32.totalorder %s31_s19, 2  ;;  %s34_s20 = sadd.s32 1, %s4668_s15 }
   0xa   : > { %p247_p1 = scmp.ne.s32.totalorder %s4652_s11, %s4648_s10  ;;  %p248_p2 = scmp.eq.s32.totalorder %s3907_s17, 3 }
   0xb   : > { %s9002_s19 = smov (%p32_p0, %s31_s19), 0  ;;  %s9004_s20 = smov (!%p32_p0, %s34_s20), %s4668_s15 }
   0xc   : > { %8398 = sst [smem:[#allocation9_spill]] %s9002_s19  ;;  %s233_s21 = ssub.s32 %s4664_s14, %s9002_s19 }
   0xd   : > { %p4780_p3 = por %p248_p2, %p247_p1  ;;  %p36_p4 = scmp.ge.s32.totalorder %s9004_s20, 2 }
   0xe   : > { %p253_p5 = scmp.ne.s32.totalorder %s4648_s10, %s4644_s30  ;;  %p254_p6 = scmp.eq.s32.totalorder %s3908_s18, 3 }
   0xf   : > { %p3911_p7 = scmp.ge.s32.totalorder %s4672_s16, 1  ;;  %s9006_s20 = smov (%p36_p4, %s9004_s20), 0 }
  0x10   : > { %8400 = sst [smem:[#allocation10_spill]] %s9006_s20  ;;  %p4789_p8 = por %p254_p6, %p253_p5 }
  0x11   : > { %p304_p9 = scmp.lt.s32.totalorder %s4672_s16, 5  ;;  %s232_s24 = ssub.s32 %s4668_s15, %s9006_s20 }
  0x12   : > { %s237_s25 = sadd.s32 1, %s4652_s11  ;;  %s234_s26 = sor.u32 %s233_s21, %s232_s24 }
  0x13   : > { %p305_p10 = pnand %p3911_p7, %p304_p9  ;;  %p235_p11 = scmp.eq.s32.totalorder %s234_s26, 0 }
  0x15   : > { %s4798_s27 = scalar_select %p235_p11, %s4652_s11, %s237_s25  }
  0x16   : > { %308 = sbr.rel (%p305_p10) target bundleno = 2929 (0xb71), region = 56 }
  0x1b   : > { %s8187_s28 = sand.u32 1, %s4648_s10   ;;  %p340_p12 = scmp.lt.s32.totalorder %s4660_s13, 1 }
  0x1c   : > { %s3912_s29 = sshll.u32 %s8187_s28, 5  ;;  %s8402_s0 = sld [smem:[#allocation133_spill]] }
  0x1d   : > { %s341_s17 = scalar_select %p340_p12, %s4660_s13, 1 }
  0x1e   : > { %s4810_s21 = scalar_lea.vmem [#allocation5], %s3912_s29  ;;  %p3915_p13 = scmp.ne.s32.totalorder %s4656_s12, 0 }
  0x1f   : > { %s4085_s18 = sshll.u32 %s341_s17, 6 }
  0x20   : > { %348 = sbr.rel (%p3915_p13) target bundleno = 1273 (0x4f9), region = 60 }
  0x22   : > { %s4808_s20 = scalar_lea.vmem %s8402_s0, %s4085_s18 }
  0x25   : > { %v355_v0 = vld [vmem:[%s4808_s20 + $0x30] sm:$0xff]  ;;  %v356_v1 = vld [vmem:[%s4808_s20 + $0x38] sm:$0xff]  ;;  %v4824_v6 = vld [vmem:[%s4808_s20 + $0x20] sm:$0xff]  ;;  %vm370_vm0 = vcmask 261120   ;;  %v4674_v17 = vmov 0   ;;  %vm398_vm1 = vcmask 64512  }
  0x26   : > { %v4816_v2 = vld [vmem:[%s4808_s20 + $0x10] sm:$0xff]  ;;  %v366_v3 = vadd.f32 %v356_v1, %v355_v0  ;;  %v4819_v4 = vld [vmem:[%s4808_s20 + $0x18] sm:$0xff]  ;;  %v4827_v7 = vld [vmem:[%s4808_s20 + $0x28] sm:$0xff]  ;;  %4178 = vset.pattern.permute.xlu1 %v4674_v17  ;;  %4177 = vset.pattern.permute.xlu0 %v4674_v17  ;;  %vm577_vm2 = vcmask 7168  }
  0x27   : > { %v360_v5 = vadd.f32 %v4819_v4, %v4816_v2  ;;  %v349_v8 = vld [vmem:[%s4808_s20] sm:$0xff]  ;;  %v350_v9 = vld [vmem:[%s4808_s20 + $0x8] sm:$0xff]  ;;  %v363_v10 = vadd.f32 %v4827_v7, %v4824_v6  ;;  %4176 = vset.pattern.permute.xlu2 %v4674_v17  ;;  %v396_v21 = vld [vmem:[%s8176_s2 + $0x10] sm:$0xff] }
  0x28   : > { %367 = vadd.xlane.f32.xlu0 %v366_v3  ;;  %v357_v11 = vadd.f32 %v350_v9, %v349_v8  ;;  %v4836_v16 = vld [vmem:[%s8175_s1] sm:$0xff]  ;;  %v4850_v20 = vld [vmem:[%s8176_s2 + $0x8] sm:$0xff]  ;;  %v397_v22 = vld [vmem:[%s8176_s2 + $0x18] sm:$0xff] }
  0x29   : > { %361 = vadd.xlane.f32.xlu1 %v360_v5  ;;  %v4843_v18 = vld [vmem:[%s8176_s2] sm:$0xff]  ;;  %v627_v52 = vld [vmem:[%s8180_s6 + $0x28] sm:$0xff] }
  0x2a   : > { %v622_v51 = vld [vmem:[%s8180_s6] sm:$0xff] }
  0x30   : > { %364 = vadd.xlane.f32.xlu0 %v363_v10 }
  0x31   : > { %358 = vadd.xlane.f32.xlu1 %v357_v11 }
  0x9b   : > { %v368_v12 = vpop.xlane.xlu0 %367 }
  0x9c   : > { %386 = vmatpush.msra.mxu0 %v368_v12  ;;  %v362_v13 = vpop.xlane.xlu1 %361 }
  0xa3   : > { %v365_v14 = vpop.xlane.xlu0 %364 }
  0xa4   : > { %387 = vmatpush.msra.mxu0 %v365_v14  ;;  %v359_v15 = vpop.xlane.xlu1 %358 }
  0xa6   : > { %388 = vmatpush.msra.mxu0 %v362_v13 }
  0xa8   : > { %389 = vmatpush.msra.mxu0 %v359_v15 }
  0xa9   : > { %3916 = vmatmul.msk.f32.vlgmr.msra.gmra.mxu0 %vm370_vm0, %v4836_v16 }
 0x126   : > { %v391_v19 = vpop.f32.mrf.mxu0 }
 0x127   : > { %426 = vmatpush.msra.mxu1 %v391_v19 }
 0x128   : > { %3917 = vmatmul.msk.f32.vlgmr.msra.gmra.mxu1 %vm398_vm1, %v4843_v18 }
 0x130   : > { %3918 = vmatmul.msk.f32.gmra.mxu1 %vm398_vm1, %v4850_v20 }
 0x138   : > { %3919 = vmatmul.msk.f32.gmra.mxu1 %vm398_vm1, %v396_v21 }
 0x140   : > { %3920 = vmatmul.msk.f32.gmra.mxu1 %vm398_vm1, %v397_v22 }
 0x1a5   : > { %v428_v23 = vpop.f32.mrf.mxu1 }
 0x1a6   : > { %578 = vst.msk [vmem:[#allocation3] sm:$0xff] %vm577_vm2, %v428_v23  ;;  %442 = vperm.xlu1 %4178, %v428_v23  }
 0x1ad   : > { %v431_v24 = vpop.f32.mrf.mxu1 }
 0x1ae   : > { %579 = vst.msk [vmem:[#allocation3 + $0x8] sm:$0xff] %vm577_vm2, %v431_v24  ;;  %447 = vperm.xlu0 %4177, %v431_v24  }
 0x1b5   : > { %v434_v25 = vpop.f32.mrf.mxu1 }
 0x1b6   : > { %580 = vst.msk [vmem:[#allocation3 + $0x10] sm:$0xff] %vm577_vm2, %v434_v25 }
 0x1bd   : > { %v437_v26 = vpop.f32.mrf.mxu1 }
 0x1be   : > { %581 = vst.msk [vmem:[#allocation3 + $0x18] sm:$0xff] %vm577_vm2, %v437_v26  ;;  %457 = vperm.xlu2 %4176, %v437_v26  }
 0x1c6   : > { %452 = vperm.xlu2 %4176, %v434_v25  }
 0x218   : > { %v458_v27 = vpop.permute.xlu2 %457  ;;  %v443_v28 = vpop.permute.xlu1 %442 }
 0x219   : > { %v4866_v29 = vsub.f32 %v355_v0, %v458_v27  ;;  %v4868_v30 = vsub.f32 %v356_v1, %v458_v27  ;;  %v4874_v33 = vsub.f32 %v349_v8, %v443_v28  ;;  %v4876_v34 = vsub.f32 %v350_v9, %v443_v28  ;;  %v624_v28 = vld [vmem:[%s8180_s6 + $0x10] sm:$0xff] }
 0x21b   : > { %v474_v31 = vmul.f32 %v4866_v29, %v4866_v29  ;;  %v475_v32 = vmul.f32 %v4868_v30, %v4868_v30  ;;  %v468_v38 = vmul.f32 %v4874_v33, %v4874_v33  ;;  %v469_v39 = vmul.f32 %v4876_v34, %v4876_v34 }
 0x21d   : > { %v485_v35 = vadd.f32 %v475_v32, %v474_v31  ;;  %v476_v49 = vadd.f32 %v469_v39, %v468_v38  ;;  %v625_v38 = vld [vmem:[%s8180_s6 + $0x18] sm:$0xff]  ;;  %v628_v39 = vld [vmem:[%s8180_s6 + $0x30] sm:$0xff] }
 0x21f   : > { %486 = vadd.xlane.f32.xlu2 %v485_v35  ;;  %v626_v35 = vld [vmem:[%s8180_s6 + $0x20] sm:$0xff] }
 0x220   : > { %v448_v36 = vpop.permute.xlu0 %447  ;;  %v453_v37 = vpop.permute.xlu2 %452 }
 0x221   : > { %v4883_v40 = vsub.f32 %v4816_v2, %v448_v36  ;;  %v4886_v41 = vsub.f32 %v4819_v4, %v448_v36  ;;  %v4889_v42 = vsub.f32 %v4824_v6, %v453_v37  ;;  %v4892_v43 = vsub.f32 %v4827_v7, %v453_v37  ;;  %v629_v36 = vld [vmem:[%s8180_s6 + $0x38] sm:$0xff]  ;;  %v623_v37 = vld [vmem:[%s8180_s6 + $0x8] sm:$0xff] }
 0x223   : > { %v470_v44 = vmul.f32 %v4883_v40, %v4883_v40  ;;  %v471_v45 = vmul.f32 %v4886_v41, %v4886_v41  ;;  %v472_v46 = vmul.f32 %v4889_v42, %v4889_v42  ;;  %v473_v47 = vmul.f32 %v4892_v43, %v4892_v43 }
 0x225   : > { %v479_v48 = vadd.f32 %v471_v45, %v470_v44  ;;  %v482_v50 = vadd.f32 %v473_v47, %v472_v46 }
 0x227   : > { %480 = vadd.xlane.f32.xlu0 %v479_v48  ;;  %477 = vadd.xlane.f32.xlu2 %v476_v49 }
 0x228   : > { %483 = vadd.xlane.f32.xlu1 %v482_v50 }
 0x23b   : > { %632 = vperm.xlu0 %4177, %v622_v51  }
 0x243   : > { %657 = vperm.xlu0 %4177, %v627_v52  }
 0x292   : > { %v487_v53 = vpop.xlane.xlu2 %486 }
 0x293   : > { %500 = vmatpush.msra.mxu2 %v487_v53 }
 0x29a   : > { %v481_v55 = vpop.xlane.xlu0 %480  ;;  %v478_v56 = vpop.xlane.xlu2 %477 }
 0x29b   : > { %v484_v54 = vpop.xlane.xlu1 %483 }
 0x29c   : > { %501 = vmatpush.msra.mxu2 %v484_v54  ;;  %v618_v54 = vld [vmem:[%s8178_s4 + $0x20] sm:$0xff] }
 0x29e   : > { %502 = vmatpush.msra.mxu2 %v481_v55  ;;  %v619_v55 = vld [vmem:[%s8178_s4 + $0x28] sm:$0xff] }
 0x2a0   : > { %503 = vmatpush.msra.mxu2 %v478_v56 }
 0x2a1   : > { %3921 = vmatmul.msk.f32.vlgmr.msra.gmra.mxu2 %vm370_vm0, %v4836_v16 }
 0x324   : > { %v505_v57 = vpop.f32.mrf.mxu2 }
 0x325   : > { %523 = vmatpush.msra.mxu3 %v505_v57 }
 0x326   : > { %3922 = vmatmul.msk.f32.vlgmr.msra.gmra.mxu3 %vm398_vm1, %v4843_v18 }
 0x32e   : > { %3923 = vmatmul.msk.f32.gmra.mxu3 %vm398_vm1, %v4850_v20 }
 0x336   : > { %3924 = vmatmul.msk.f32.gmra.mxu3 %vm398_vm1, %v396_v21 }
 0x33e   : > { %3925 = vmatmul.msk.f32.gmra.mxu3 %vm398_vm1, %v397_v22 }
 0x3a9   : > { %v525_v58 = vpop.f32.mrf.mxu3 }
 0x3aa   : > { %v526_v59 = vadd.f32 1e-05, %v525_v58 }
 0x3ac   : > { %4179 = vrsqrt.f32 %v526_v59  ;;  %vm543_vm4 = vweird.f32 %v526_v59 }
 0x3b1   : > { %v528_v60 = vpop.f32.mrf.mxu3 }
 0x3b2   : > { %v4180_v61 = vpop.eup %4179  ;;  %v529_v62 = vadd.f32 1e-05, %v528_v60  ;;  %v633_v60 = vpop.permute.xlu0 %632 }
 0x3b3   : > { %v538_v63 = vmul.f32 %v4180_v61, %v526_v59  ;;  %vm544_vm3 = vweird.f32 %v4180_v61 }
 0x3b4   : > { %4181 = vrsqrt.f32 %v529_v62  ;;  %vm545_vm5 = vmor %vm543_vm4, %vm544_vm3  ;;  %vm553_vm7 = vweird.f32 %v529_v62 }
 0x3b5   : > { %v539_v0 = vmul.f32 %v4180_v61, %v538_v63 }
 0x3b7   : > { %v540_v1 = vmul.f32 0.5, %v539_v0 }
 0x3b9   : > { %v541_v2 = vsub.f32 1.5, %v540_v1  ;;  %v531_v3 = vpop.f32.mrf.mxu3 }
 0x3ba   : > { %v4182_v4 = vpop.eup %4181  ;;  %v532_v5 = vadd.f32 1e-05, %v531_v3 }
 0x3bb   : > { %v548_v6 = vmul.f32 %v4182_v4, %v529_v62  ;;  %v542_v7 = vmul.f32 %v4180_v61, %v541_v2  ;;  %vm554_vm6 = vweird.f32 %v4182_v4 }
 0x3bc   : > { %4183 = vrsqrt.f32 %v532_v5  ;;  %vm555_vm8 = vmor %vm553_vm7, %vm554_vm6  ;;  %vm563_vm10 = vweird.f32 %v532_v5 }
 0x3bd   : > { %v549_v8 = vmul.f32 %v4182_v4, %v548_v6  ;;  %v546_v9 = vsel %vm545_vm5, %v4180_v61, %v542_v7 }
 0x3be   : > { %582 = vst.msk [vmem:[#allocation4] sm:$0xff] %vm577_vm2, %v546_v9 }
 0x3bf   : > { %v550_v10 = vmul.f32 0.5, %v549_v8 }
 0x3c1   : > { %v551_v11 = vsub.f32 1.5, %v550_v10  ;;  %v534_v12 = vpop.f32.mrf.mxu3 }
 0x3c2   : > { %v4184_v13 = vpop.eup %4183  ;;  %v535_v14 = vadd.f32 1e-05, %v534_v12 }
 0x3c3   : > { %v558_v15 = vmul.f32 %v4184_v13, %v532_v5  ;;  %v552_v16 = vmul.f32 %v4182_v4, %v551_v11  ;;  %vm564_vm9 = vweird.f32 %v4184_v13 }
 0x3c4   : > { %4185 = vrsqrt.f32 %v535_v14  ;;  %vm565_vm11 = vmor %vm563_vm10, %vm564_vm9  ;;  %vm573_vm12 = vweird.f32 %v535_v14 }
 0x3c5   : > { %v559_v17 = vmul.f32 %v4184_v13, %v558_v15  ;;  %v556_v18 = vsel %vm555_vm8, %v4182_v4, %v552_v16 }
 0x3c6   : > { %593 = vperm.xlu2 %4176, %v556_v18   ;;  %583 = vst.msk [vmem:[#allocation4 + $0x8] sm:$0xff] %vm577_vm2, %v556_v18 }
 0x3c7   : > { %v560_v19 = vmul.f32 0.5, %v559_v17 }
 0x3c9   : > { %v561_v20 = vsub.f32 1.5, %v560_v19 }
 0x3ca   : > { %v4186_v21 = vpop.eup %4185 }
 0x3cb   : > { %v568_v22 = vmul.f32 %v4186_v21, %v535_v14  ;;  %v562_v23 = vmul.f32 %v4184_v13, %v561_v20  ;;  %vm574_vm13 = vweird.f32 %v4186_v21 }
 0x3cc   : > { %vm575_vm14 = vmor %vm573_vm12, %vm574_vm13 }
 0x3cd   : > { %v569_v24 = vmul.f32 %v4186_v21, %v568_v22  ;;  %v566_v25 = vsel %vm565_vm11, %v4184_v13, %v562_v23 }
 0x3ce   : > { %598 = vperm.xlu1 %4178, %v566_v25   ;;  %584 = vst.msk [vmem:[#allocation4 + $0x10] sm:$0xff] %vm577_vm2, %v566_v25 }
 0x3cf   : > { %v570_v26 = vmul.f32 0.5, %v569_v24 }
 0x3d1   : > { %v571_v27 = vsub.f32 1.5, %v570_v26  ;;  %v658_v26 = vpop.permute.xlu0 %657 }
 0x3d3   : > { %v572_v31 = vmul.f32 %v4186_v21, %v571_v27 }
 0x3d5   : > { %v576_v32 = vsel %vm575_vm14, %v4186_v21, %v572_v31 }
 0x3d6   : > { %642 = vperm.xlu1 %4178, %v624_v28   ;;  %585 = vst.msk [vmem:[#allocation4 + $0x18] sm:$0xff] %vm577_vm2, %v576_v32  ;;  %603 = vperm.xlu2 %4176, %v576_v32  }
 0x3de   : > { %652 = vperm.xlu1 %4178, %v626_v35   ;;  %588 = vperm.xlu2 %4176, %v546_v9  }
 0x3e6   : > { %667 = vperm.xlu1 %4178, %v629_v36   ;;  %637 = vperm.xlu2 %4176, %v623_v37  }
 0x3ee   : > { %647 = vperm.xlu2 %4176, %v625_v38  }
 0x3f6   : > { %662 = vperm.xlu2 %4176, %v628_v39  }
 0x420   : > { %v594_v44 = vpop.permute.xlu2 %593 }
 0x421   : > { %v608_v52 = vmul.f32 %v594_v44, %v4883_v40  ;;  %v620_v40 = vld [vmem:[%s8178_s4 + $0x30] sm:$0xff] }
 0x430   : > { %v604_v45 = vpop.permute.xlu2 %603 }
 0x431   : > { %v612_v46 = vmul.f32 %v604_v45, %v4866_v29  ;;  %v613_v47 = vmul.f32 %v604_v45, %v4868_v30  ;;  %v609_v29 = vmul.f32 %v594_v44, %v4886_v41  ;;  %v616_v41 = vld [vmem:[%s8178_s4 + $0x10] sm:$0xff] }
 0x433   : > { %706 = vmatpush.msrb.mxu0 %v612_v46  ;;  %4086 = vmatpush.msrb.mxu1 %v612_v46 }
 0x434   : > { %747 = vmatpush.msrb.mxu2 %v613_v47  ;;  %4090 = vmatpush.msrb.mxu3 %v613_v47 }
 0x438   : > { %v589_v51 = vpop.permute.xlu2 %588 }
 0x439   : > { %v606_v30 = vmul.f32 %v589_v51, %v4874_v33  ;;  %v607_v53 = vmul.f32 %v589_v51, %v4876_v34  ;;  %v615_v33 = vld [vmem:[%s8178_s4 + $0x8] sm:$0xff]  ;;  %v621_v34 = vld [vmem:[%s8178_s4 + $0x38] sm:$0xff] }
 0x440   : > { %v599_v48 = vpop.permute.xlu1 %598  ;;  %v638_v56 = vpop.permute.xlu2 %637 }
 0x441   : > { %v610_v49 = vmul.f32 %v599_v48, %v4889_v42  ;;  %v611_v50 = vmul.f32 %v599_v48, %v4892_v43  ;;  %v614_v42 = vld [vmem:[%s8178_s4] sm:$0xff]  ;;  %v617_v43 = vld [vmem:[%s8178_s4 + $0x18] sm:$0xff] }
 0x443   : > { %707 = vmatpush.msrb.mxu0 %v610_v49  ;;  %4087 = vmatpush.msrb.mxu1 %v610_v49 }
 0x444   : > { %748 = vmatpush.msrb.mxu2 %v611_v50  ;;  %4091 = vmatpush.msrb.mxu3 %v611_v50 }
 0x445   : > { %708 = vmatpush.msrb.mxu0 %v608_v52  ;;  %4088 = vmatpush.msrb.mxu1 %v608_v52 }
 0x446   : > { %749 = vmatpush.msrb.mxu2 %v609_v29  ;;  %4092 = vmatpush.msrb.mxu3 %v609_v29 }
 0x447   : > { %709 = vmatpush.msrb.mxu0 %v606_v30  ;;  %4089 = vmatpush.msrb.mxu1 %v606_v30 }
 0x448   : > { %750 = vmatpush.msrb.mxu2 %v607_v53  ;;  %4093 = vmatpush.msrb.mxu3 %v607_v53  ;;  %v643_v57 = vpop.permute.xlu1 %642  ;;  %v648_v58 = vpop.permute.xlu2 %647 }
 0x449   : > { %3926 = vmatmul.msk.f32.vlgmr.msrb.gmra.mxu0 %vm370_vm0, %v614_v42  ;;  %3932 = vmatmul.msk.f32.vlgmr.msrb.gmra.mxu1 %vm370_vm0, %v620_v40 }
 0x44a   : > { %3934 = vmatmul.msk.f32.vlgmr.msrb.gmra.mxu2 %vm370_vm0, %v614_v42  ;;  %3940 = vmatmul.msk.f32.vlgmr.msrb.gmra.mxu3 %vm370_vm0, %v620_v40 }
 0x450   : > { %v653_v59 = vpop.permute.xlu1 %652  ;;  %v663_v61 = vpop.permute.xlu2 %662 }
 0x451   : > { %3927 = vmatmul.msk.f32.gmra.mxu0 %vm370_vm0, %v615_v33  ;;  %3933 = vmatmul.msk.f32.gmra.mxu1 %vm370_vm0, %v621_v34 }
 0x452   : > { %3935 = vmatmul.msk.f32.gmra.mxu2 %vm370_vm0, %v615_v33  ;;  %3941 = vmatmul.msk.f32.gmra.mxu3 %vm370_vm0, %v621_v34 }
 0x458   : > { %v668_v2 = vpop.permute.xlu1 %667 }
 0x459   : > { %3928 = vmatmul.msk.f32.gmra.mxu0 %vm370_vm0, %v616_v41 }
 0x45a   : > { %3936 = vmatmul.msk.f32.gmra.mxu2 %vm370_vm0, %v616_v41 }
 0x461   : > { %3929 = vmatmul.msk.f32.gmra.mxu0 %vm370_vm0, %v617_v43 }
 0x462   : > { %3937 = vmatmul.msk.f32.gmra.mxu2 %vm370_vm0, %v617_v43 }
 0x469   : > { %3930 = vmatmul.msk.f32.gmra.mxu0 %vm370_vm0, %v618_v54 }
 0x46a   : > { %3938 = vmatmul.msk.f32.gmra.mxu2 %vm370_vm0, %v618_v54 }
 0x471   : > { %3931 = vmatmul.msk.f32.gmra.mxu0 %vm370_vm0, %v619_v55 }
 0x472   : > { %3939 = vmatmul.msk.f32.gmra.mxu2 %vm370_vm0, %v619_v55 }
 0x4c6   : > { %v711_v62 = vpop.f32.mrf.mxu0  ;;  %v729_v63 = vpop.f32.mrf.mxu1 }
 0x4c7   : > { %v712_v0 = vadd.f32 %v711_v62, %v633_v60  ;;  %v730_v1 = vadd.f32 %v729_v63, %v663_v61 }
 0x4c9   : > { %776 = vst [vmem:[#allocation2 + $0x30] sm:$0xff] %v712_v0 }
 0x4ca   : > { %788 = vst [vmem:[#allocation2 + $0x60] sm:$0xff] %v730_v1 }
 0x4cd   : > { %v752_v3 = vpop.f32.mrf.mxu2  ;;  %v770_v4 = vpop.f32.mrf.mxu3 }
 0x4ce   : > { %v753_v5 = vadd.f32 %v752_v3, %v633_v60  ;;  %v771_v6 = vadd.f32 %v770_v4, %v663_v61  ;;  %v714_v7 = vpop.f32.mrf.mxu0  ;;  %v732_v8 = vpop.f32.mrf.mxu1 }
 0x4cf   : > { %v715_v9 = vadd.f32 %v714_v7, %v638_v56  ;;  %v733_v10 = vadd.f32 %v732_v8, %v668_v2 }
 0x4d0   : > { %777 = vst [vmem:[#allocation2] sm:$0xff] %v753_v5 }
 0x4d1   : > { %789 = vst [vmem:[#allocation2 + $0x70] sm:$0xff] %v771_v6 }
 0x4d2   : > { %778 = vst [vmem:[#allocation2 + $0x58] sm:$0xff] %v715_v9 }
 0x4d3   : > { %790 = vst [vmem:[#allocation2 + $0x78] sm:$0xff] %v733_v10 }
 0x4d5   : > { %v755_v11 = vpop.f32.mrf.mxu2  ;;  %v773_v12 = vpop.f32.mrf.mxu3 }
 0x4d6   : > { %v756_v13 = vadd.f32 %v755_v11, %v638_v56  ;;  %v774_v14 = vadd.f32 %v773_v12, %v668_v2  ;;  %v717_v15 = vpop.f32.mrf.mxu0 }
 0x4d7   : > { %v718_v16 = vadd.f32 %v717_v15, %v643_v57 }
 0x4d8   : > { %779 = vst [vmem:[#allocation2 + $0x18] sm:$0xff] %v756_v13 }
 0x4d9   : > { %791 = vst [vmem:[#allocation2 + $0x28] sm:$0xff] %v774_v14 }
 0x4da   : > { %780 = vst [vmem:[#allocation2 + $0x50] sm:$0xff] %v718_v16 }
 0x4dd   : > { %v758_v17 = vpop.f32.mrf.mxu2 }
 0x4de   : > { %v759_v18 = vadd.f32 %v758_v17, %v643_v57  ;;  %v720_v19 = vpop.f32.mrf.mxu0 }
 0x4df   : > { %v721_v20 = vadd.f32 %v720_v19, %v648_v58 }
 0x4e0   : > { %781 = vst [vmem:[#allocation2 + $0x68] sm:$0xff] %v759_v18 }
 0x4e1   : > { %782 = vst [vmem:[#allocation2 + $0x8] sm:$0xff] %v721_v20 }
 0x4e5   : > { %v761_v21 = vpop.f32.mrf.mxu2 }
 0x4e6   : > { %v762_v22 = vadd.f32 %v761_v21, %v648_v58  ;;  %v723_v23 = vpop.f32.mrf.mxu0 }
 0x4e7   : > { %v724_v24 = vadd.f32 %v723_v23, %v653_v59 }
 0x4e8   : > { %783 = vst [vmem:[#allocation2 + $0x48] sm:$0xff] %v762_v22 }
 0x4e9   : > { %784 = vst [vmem:[#allocation2 + $0x40] sm:$0xff] %v724_v24 }
 0x4ed   : > { %v764_v25 = vpop.f32.mrf.mxu2 }
 0x4ee   : > { %v765_v27 = vadd.f32 %v764_v25, %v653_v59  ;;  %v726_v28 = vpop.f32.mrf.mxu0 }
 0x4ef   : > { %v727_v31 = vadd.f32 %v726_v28, %v658_v26 }
 0x4f0   : > { %785 = vst [vmem:[#allocation2 + $0x20] sm:$0xff] %v765_v27 }
 0x4f1   : > { %786 = vst [vmem:[#allocation2 + $0x10] sm:$0xff] %v727_v31 }
 0x4f5   : > { %v767_v32 = vpop.f32.mrf.mxu2 }
 0x4f6   : > { %v768_v35 = vadd.f32 %v767_v32, %v658_v26 }
 0x4f8   : > { %787 = vst [vmem:[#allocation2 + $0x38] sm:$0xff] %v768_v35 }
 0x4f9 PF: > { %v832_v36 = vld [vmem:[#allocation4 + $0x18] sm:$0xff]  ;;  %v4675_v38 = vmov 0   ;;  %v831_v39 = vld [vmem:[#allocation4 + $0x10] sm:$0xff]  ;;  %v802_v45 = vld [vmem:[#allocation3 + $0x8] sm:$0xff]  ;;  %s3942_s17 = sshll.u32 %s4656_s12, 7  ;;  %vm885_vm15 = vcmask 261120  }
 0x4fa   : > { %v804_v37 = vld [vmem:[#allocation3 + $0x18] sm:$0xff]  ;;  %4188 = vset.pattern.permute.xlu1 %v4675_v38  ;;  %4187 = vset.pattern.permute.xlu0 %v4675_v38  ;;  %v803_v44 = vld [vmem:[#allocation3 + $0x10] sm:$0xff]  ;;  %v801_v46 = vld [vmem:[#allocation3] sm:$0xff]  ;;  %s793_s18 = sshra.s32 %s3942_s17, 7  ;;  %vm975_vm0 = vcmask 64512   ;;  %s4081_s25 = sshll.u32 %s4660_s13, 3 }
 0x4fb   : > { %850 = vperm.xlu1 %4188, %v832_v36   ;;  %822 = vperm.xlu0 %4187, %v804_v37   ;;  %v830_v47 = vld [vmem:[#allocation4 + $0x8] sm:$0xff]  ;;  %v829_v48 = vld [vmem:[#allocation4] sm:$0xff]  ;;  %v864_v51 = vld [vmem:[%s8179_s5 + $0x18] sm:$0xff]  ;;  %s3943_s14 = sshll.u32 %s793_s18, 3  ;;  %s3824_s26 = sadd.s32 %s4656_s12, %s4081_s25 }
 0x4fc   : > { %4189 = vset.pattern.permute.xlu2 %v4675_v38  ;;  %v861_v49 = vld [vmem:[%s8179_s5] sm:$0xff]  ;;  %v862_v50 = vld [vmem:[%s8179_s5 + $0x8] sm:$0xff]  ;;  %v863_v52 = vld [vmem:[%s8179_s5 + $0x10] sm:$0xff]  ;;  %s5000_s0 = scalar_lea.vmem %s4808_s20, %s3943_s14  ;;  %s4082_s29 = sshll.u32 %s3824_s26, 3 }
 0x4fd   : > { %845 = vperm.xlu2 %4189, %v831_v39   ;;  %v800_v29 = vld [vmem:[%s5000_s0 + $0x30] sm:$0xff]  ;;  %v799_v34 = vld [vmem:[%s5000_s0 + $0x20] sm:$0xff]  ;;  %v858_v3 = vld [vmem:[%s8177_s3 + $0x8] sm:$0xff]  ;;  %s3826_s14 = scalar_lea.hbm %s8183_s9, %s4082_s29  ;;  %s3827_s20 = sshll.u32 %s4810_s21, 4  ;;  %s3828_s20 = int_to_ptr.vmem [resolvable:$true] %s3827_s20 }
 0x4fe   : > { %v798_v56 = vld [vmem:[%s5000_s0 + $0x10] sm:$0xff]  ;;  %v797_v57 = vld [vmem:[%s5000_s0] sm:$0xff]  ;;  %v860_v4 = vld [vmem:[%s8177_s3 + $0x18] sm:$0xff]  ;;  %s3829_s13 = sshll.u32 %s3826_s14, 4  ;;  %s8992_s12 = sand.u32 1, %s4648_s10   ;;  %s3830_s13 = int_to_ptr.hbm [resolvable:$true] %s3829_s13 }
 0x4ff   : > { %v857_v1 = vld [vmem:[%s8177_s3] sm:$0xff]  ;;  %v859_v2 = vld [vmem:[%s8177_s3 + $0x10] sm:$0xff]  ;;  %v930_v21 = vld [vmem:[#allocation2 + $0x18] sm:$0xff]  ;;  %s3814_s28 = scalar_lea.sflag [#allocation6], %s8992_s12  ;;  %s4592_s19 = sshra.s32 %s3830_s13, 4  ;;  %s4593_s19 = int_to_ptr.hbm [resolvable:$true] %s4592_s19 }
 0x500   : > { %v927_v15 = vld [vmem:[#allocation2 + $0x30] sm:$0xff]  ;;  %v928_v16 = vld [vmem:[#allocation2] sm:$0xff]  ;;  %v932_v25 = vld [vmem:[#allocation2 + $0x68] sm:$0xff]  ;;  %s4594_s24 = scalar_lea.hbm %s4593_s19, 32  ;;  %s4598_s29 = scalar_lea.hbm %s8183_s9, 128 }
 0x501   : > { %1039 = vmatpush.msra.mxu1 %v927_v15  ;;  %4098 = vmatpush.msra.mxu3 %v927_v15  ;;  %v931_v32 = vld [vmem:[#allocation2 + $0x50] sm:$0xff]  ;;  %p4595_p0 = scmp.ne.s32.totalorder %s4593_s19, %s4594_s24  ;;  %p4599_p4 = scmp.lt.s32.totalorder %s4593_s19, %s8183_s9 }
 0x502   : > { %p4600_p5 = scmp.lt.s32.totalorder %s4598_s29, %s4594_s24 }
 0x503   : > { %817 = vperm.xlu0 %4187, %v803_v44   ;;  %812 = vperm.xlu1 %4188, %v802_v45   ;;  %p4596_p1 = pnand %p4595_p0, %p4780_p3 }
 0x504   : > { %1459 = vmatpush.msrb.mxu1 %v931_v32  ;;  %p4601_p6 = por %p4600_p5, %p4599_p4 }
 0x505   : > { %807 = vperm.xlu2 %4189, %v801_v46   ;;  %p4597_p2 = pneg %p4596_p1 }
 0x507   : > { %p4602_p7 = pnand %p4601_p6, %p4597_p2 }
 0x50b   : > { %840 = vperm.xlu0 %4187, %v830_v47   ;;  %835 = vperm.xlu1 %4188, %v829_v48  }
 0x50d   : > { %867 = vperm.xlu2 %4189, %v861_v49  }
 0x513   : > { %872 = vperm.xlu1 %4188, %v862_v50  }
 0x51b   : > { %882 = vperm.xlu1 %4188, %v864_v51  }
 0x523   : > { %877 = vperm.xlu1 %4188, %v863_v52  }
 0x557   : > { %v846_v33 = vpop.permute.xlu2 %845 }
 0x55f   : > { %v808_v58 = vpop.permute.xlu2 %807 }
 0x560   : > { %v825_v62 = vsub.f32 %v797_v57, %v808_v58 }
 0x567   : > { %v868_v5 = vpop.permute.xlu2 %867 }
 0x56d   : > { %v851_v30 = vpop.permute.xlu1 %850  ;;  %v823_v53 = vpop.permute.xlu0 %822 }
 0x56e   : > { %v828_v42 = vsub.f32 %v800_v29, %v823_v53  ;;  %v929_v29 = vld [vmem:[#allocation2 + $0x58] sm:$0xff] }
 0x56f   : > { %1249 = vmatpush.msrb.mxu3 %v929_v29 }
 0x570   : > { %v856_v40 = vmul.f32 %v851_v30, %v828_v42 }
 0x572   : > { %910 = vmatpush.msra.mxu0 %v856_v40  ;;  %4094 = vmatpush.msra.mxu2 %v856_v40 }
 0x575   : > { %v818_v41 = vpop.permute.xlu0 %817  ;;  %v813_v43 = vpop.permute.xlu1 %812 }
 0x576   : > { %v827_v54 = vsub.f32 %v799_v34, %v818_v41  ;;  %v826_v59 = vsub.f32 %v798_v56, %v813_v43 }
 0x578   : > { %v855_v55 = vmul.f32 %v846_v33, %v827_v54 }
 0x57a   : > { %911 = vmatpush.msra.mxu0 %v855_v55  ;;  %4095 = vmatpush.msra.mxu2 %v855_v55 }
 0x57d   : > { %v841_v60 = vpop.permute.xlu0 %840  ;;  %v836_v61 = vpop.permute.xlu1 %835 }
 0x57e   : > { %v854_v63 = vmul.f32 %v841_v60, %v826_v59  ;;  %v853_v0 = vmul.f32 %v836_v61, %v825_v62 }
 0x580   : > { %912 = vmatpush.msra.mxu0 %v854_v63  ;;  %4096 = vmatpush.msra.mxu2 %v854_v63 }
 0x582   : > { %913 = vmatpush.msra.mxu0 %v853_v0  ;;  %4097 = vmatpush.msra.mxu2 %v853_v0  ;;  %v934_v0 = vld [vmem:[#allocation2 + $0x48] sm:$0xff] }
 0x583   : > { %3944 = vmatmul.msk.f32.vlgmr.msra.gmra.mxu0 %vm885_vm15, %v857_v1  ;;  %3946 = vmatmul.msk.f32.vlgmr.msra.gmra.mxu2 %vm885_vm15, %v859_v2 }
 0x584   : > { %1104 = vmatpush.msrb.mxu2 %v928_v16  ;;  %1314 = vmatpush.msrb.mxu0 %v930_v21 }
 0x585   : > { %v873_v8 = vpop.permute.xlu1 %872 }
 0x586   : > { %1524 = vmatpush.msra.mxu2 %v932_v25  ;;  %1734 = vmatpush.msra.mxu0 %v934_v0 }
 0x58b   : > { %3945 = vmatmul.msk.f32.gmra.mxu0 %vm885_vm15, %v858_v3  ;;  %3947 = vmatmul.msk.f32.gmra.mxu2 %vm885_vm15, %v860_v4 }
 0x58d   : > { %v883_v12 = vpop.permute.xlu1 %882 }
 0x595   : > { %v878_v17 = vpop.permute.xlu1 %877 }
 0x600   : > { %v915_v6 = vpop.f32.mrf.mxu0 }
 0x601   : > { %v916_v7 = vadd.f32 %v915_v6, %v868_v5 }
 0x603   : > { %943 = vxpose.xlu0.b32.start.end [1/1] (short) %v916_v7, 128 }
 0x606   : > { %v921_v9 = vpop.f32.mrf.mxu2 }
 0x607   : > { %v922_v18 = vadd.f32 %v921_v9, %v878_v17 }
 0x608   : > { %v918_v10 = vpop.f32.mrf.mxu0 }
 0x609   : > { %v919_v11 = vadd.f32 %v918_v10, %v873_v8  ;;  %v933_v10 = vld [vmem:[#allocation2 + $0x8] sm:$0xff] }
 0x60b   : > { %1154 = vxpose.xlu2.b32.start.end [1/1] (short) %v919_v11, 128 }
 0x60e   : > { %v924_v13 = vpop.f32.mrf.mxu2 }
 0x60f   : > { %v925_v14 = vadd.f32 %v924_v13, %v883_v12 }
 0x611   : > { %1574 = vxpose.xlu1.b32.start.end [1/1] (short) %v925_v14, 128 }
 0x683   : > { %1364 = vxpose.xlu0.b32.start.end [1/1] (short) %v922_v18, 128 }
 0x6a4   : > { %v5024_v22 = vpop.trf.xlu2 }
 0x6a5   : > { %3996 = vmatmul.msk.f32.vlgmr.msrb.gmra.mxu0 %vm975_vm0, %v5024_v22 }
 0x6a7   : > { %v959_v19 = vpop.trf.xlu0 }
 0x6a8   : > { %3948 = vmatmul.msk.f32.vlgmr.msra.gmra.mxu1 %vm975_vm0, %v959_v19  ;;  %3964 = vmatmul.msk.f32.vlgmr.msrb.gmra.mxu2 %vm975_vm0, %v959_v19 }
 0x6ac   : > { %v5030_v24 = vpop.trf.xlu2 }
 0x6ad   : > { %3997 = vmatmul.msk.f32.gmra.mxu0 %vm975_vm0, %v5030_v24 }
 0x6af   : > { %v960_v20 = vpop.trf.xlu0 }
 0x6b0   : > { %3949 = vmatmul.msk.f32.gmra.mxu1 %vm975_vm0, %v960_v20  ;;  %3965 = vmatmul.msk.f32.gmra.mxu2 %vm975_vm0, %v960_v20 }
 0x6b4   : > { %v5036_v27 = vpop.trf.xlu2 }
 0x6b5   : > { %3998 = vmatmul.msk.f32.gmra.mxu0 %vm975_vm0, %v5036_v27  ;;  %v5100_v33 = vpop.trf.xlu1 }
 0x6b7   : > { %v961_v23 = vpop.trf.xlu0 }
 0x6b8   : > { %3950 = vmatmul.msk.f32.gmra.mxu1 %vm975_vm0, %v961_v23  ;;  %3966 = vmatmul.msk.f32.gmra.mxu2 %vm975_vm0, %v961_v23 }
 0x6bc   : > { %v5042_v31 = vpop.trf.xlu2 }
 0x6bd   : > { %3999 = vmatmul.msk.f32.gmra.mxu0 %vm975_vm0, %v5042_v31  ;;  %v5110_v43 = vpop.trf.xlu1 }
 0x6bf   : > { %v962_v26 = vpop.trf.xlu0 }
 0x6c0   : > { %3951 = vmatmul.msk.f32.gmra.mxu1 %vm975_vm0, %v962_v26  ;;  %3967 = vmatmul.msk.f32.gmra.mxu2 %vm975_vm0, %v962_v26 }
 0x6c4   : > { %v5048_v36 = vpop.trf.xlu2 }
 0x6c5   : > { %4000 = vmatmul.msk.f32.gmra.mxu0 %vm975_vm0, %v5048_v36  ;;  %v5120_v57 = vpop.trf.xlu1 }
 0x6c7   : > { %v963_v28 = vpop.trf.xlu0 }
 0x6c8   : > { %3952 = vmatmul.msk.f32.gmra.mxu1 %vm975_vm0, %v963_v28  ;;  %3968 = vmatmul.msk.f32.gmra.mxu2 %vm975_vm0, %v963_v28 }
 0x6cc   : > { %v5054_v38 = vpop.trf.xlu2 }
 0x6cd   : > { %4001 = vmatmul.msk.f32.gmra.mxu0 %vm975_vm0, %v5054_v38  ;;  %v5140_v1 = vpop.trf.xlu1 }
 0x6cf   : > { %v964_v35 = vpop.trf.xlu0 }
 0x6d0   : > { %3953 = vmatmul.msk.f32.gmra.mxu1 %vm975_vm0, %v964_v35  ;;  %3969 = vmatmul.msk.f32.gmra.mxu2 %vm975_vm0, %v964_v35 }
 0x6d4   : > { %v5060_v44 = vpop.trf.xlu2 }
 0x6d5   : > { %4002 = vmatmul.msk.f32.gmra.mxu0 %vm975_vm0, %v5060_v44  ;;  %v5158_v7 = vpop.trf.xlu1 }
 0x6d7   : > { %v965_v37 = vpop.trf.xlu0 }
 0x6d8   : > { %3954 = vmatmul.msk.f32.gmra.mxu1 %vm975_vm0, %v965_v37  ;;  %3970 = vmatmul.msk.f32.gmra.mxu2 %vm975_vm0, %v965_v37 }
 0x6dc   : > { %v5066_v46 = vpop.trf.xlu2 }
 0x6dd   : > { %4003 = vmatmul.msk.f32.gmra.mxu0 %vm975_vm0, %v5066_v46  ;;  %v5176_v15 = vpop.trf.xlu1 }
 0x6df   : > { %v966_v39 = vpop.trf.xlu0 }
 0x6e0   : > { %3955 = vmatmul.msk.f32.gmra.mxu1 %vm975_vm0, %v966_v39  ;;  %3971 = vmatmul.msk.f32.gmra.mxu2 %vm975_vm0, %v966_v39 }
 0x6e4   : > { %v5072_v48 = vpop.trf.xlu2 }
 0x6e5   : > { %4004 = vmatmul.msk.f32.gmra.mxu0 %vm975_vm0, %v5072_v48  ;;  %v5190_v21 = vpop.trf.xlu1 }
 0x6e7   : > { %v967_v45 = vpop.trf.xlu0 }
 0x6e8   : > { %3956 = vmatmul.msk.f32.gmra.mxu1 %vm975_vm0, %v967_v45  ;;  %3972 = vmatmul.msk.f32.gmra.mxu2 %vm975_vm0, %v967_v45 }
 0x6ec   : > { %v5078_v50 = vpop.trf.xlu2 }
 0x6ed   : > { %4005 = vmatmul.msk.f32.gmra.mxu0 %vm975_vm0, %v5078_v50  ;;  %v5206_v25 = vpop.trf.xlu1 }
 0x6ef   : > { %v968_v47 = vpop.trf.xlu0 }
 0x6f0   : > { %3957 = vmatmul.msk.f32.gmra.mxu1 %vm975_vm0, %v968_v47  ;;  %3973 = vmatmul.msk.f32.gmra.mxu2 %vm975_vm0, %v968_v47 }
 0x6f4   : > { %v5084_v52 = vpop.trf.xlu2 }
 0x6f5   : > { %4006 = vmatmul.msk.f32.gmra.mxu0 %vm975_vm0, %v5084_v52  ;;  %v5224_v35 = vpop.trf.xlu1 }
 0x6f7   : > { %v969_v49 = vpop.trf.xlu0 }
 0x6f8   : > { %3958 = vmatmul.msk.f32.gmra.mxu1 %vm975_vm0, %v969_v49  ;;  %3974 = vmatmul.msk.f32.gmra.mxu2 %vm975_vm0, %v969_v49 }
 0x6fc   : > { %v5090_v53 = vpop.trf.xlu2 }
 0x6fd   : > { %4007 = vmatmul.msk.f32.gmra.mxu0 %vm975_vm0, %v5090_v53  ;;  %v5246_v49 = vpop.trf.xlu1 }
 0x6ff   : > { %v970_v51 = vpop.trf.xlu0 }
 0x700   : > { %3959 = vmatmul.msk.f32.gmra.mxu1 %vm975_vm0, %v970_v51  ;;  %3975 = vmatmul.msk.f32.gmra.mxu2 %vm975_vm0, %v970_v51 }
 0x704   : > { %v5096_v40 = vpop.trf.xlu2 }
 0x705   : > { %4008 = vmatmul.msk.f32.gmra.mxu0 %vm975_vm0, %v5096_v40 }
 0x707   : > { %v971_v30 = vpop.trf.xlu0 }
 0x708   : > { %3960 = vmatmul.msk.f32.gmra.mxu1 %vm975_vm0, %v971_v30  ;;  %3976 = vmatmul.msk.f32.gmra.mxu2 %vm975_vm0, %v971_v30 }
 0x70c   : > { %v5104_v41 = vpop.trf.xlu2 }
 0x70d   : > { %4009 = vmatmul.msk.f32.gmra.mxu0 %vm975_vm0, %v5104_v41 }
 0x70f   : > { %v972_v42 = vpop.trf.xlu0 }
 0x710   : > { %3961 = vmatmul.msk.f32.gmra.mxu1 %vm975_vm0, %v972_v42  ;;  %3977 = vmatmul.msk.f32.gmra.mxu2 %vm975_vm0, %v972_v42 }
 0x714   : > { %v5112_v55 = vpop.trf.xlu2 }
 0x715   : > { %4010 = vmatmul.msk.f32.gmra.mxu0 %vm975_vm0, %v5112_v55 }
 0x717   : > { %v973_v34 = vpop.trf.xlu0 }
 0x718   : > { %3962 = vmatmul.msk.f32.gmra.mxu1 %vm975_vm0, %v973_v34  ;;  %3978 = vmatmul.msk.f32.gmra.mxu2 %vm975_vm0, %v973_v34 }
 0x71c   : > { %v5122_v59 = vpop.trf.xlu2 }
 0x71d   : > { %4011 = vmatmul.msk.f32.gmra.mxu0 %vm975_vm0, %v5122_v59 }
 0x71f   : > { %v974_v54 = vpop.trf.xlu0 }
 0x720   : > { %3963 = vmatmul.msk.f32.vlgmr.msra.gmra.mxu3 %vm975_vm0, %v974_v54  ;;  %3979 = vmatmul.msk.f32.gmra.mxu2 %vm975_vm0, %v974_v54  ;;  %v5262_v54 = vpop.trf.xlu1 }
 0x721   : > { %1669 = vmatpush.msra.mxu3 %v933_v10 }
 0x725   : > { %v5118_v56 = vpop.f32.mrf.mxu1  ;;  %4060 = vmatmul.msk.f32.vlgmr.msra.gmra.mxu0 %vm975_vm0, %v5100_v33 }
 0x726   : > { %8403 = vst [vmem:[#allocation11_spill] sm:$0xff] %v5118_v56 }
 0x727   : > { %v1380_v58 = vpop.trf.xlu0 }
 0x728   : > { %3980 = vmatmul.msk.f32.vlgmr.msrb.gmra.mxu3 %vm975_vm0, %v5024_v22  ;;  %4028 = vmatmul.msk.f32.vlgmr.msra.gmra.mxu2 %vm975_vm0, %v1380_v58 }
 0x729   : > { %4012 = vmatmul.msk.f32.vlgmr.msrb.gmra.mxu1 %vm975_vm0, %v1380_v58 }
 0x72b   : > { %v5130_v60 = vpop.f32.mrf.mxu2 }
 0x72c   : > { %8404 = vst [vmem:[#allocation12_spill] sm:$0xff] %v5130_v60  ;;  %v1784_v61 = vmax.f32 %v5118_v56, %v5130_v60 }
 0x72d   : > { %v5134_v62 = vpop.f32.mrf.mxu1  ;;  %4061 = vmatmul.msk.f32.gmra.mxu0 %vm975_vm0, %v5110_v43 }
 0x72e   : > { %8405 = vst [vmem:[#allocation13_spill] sm:$0xff] %v5134_v62  ;;  %1785 = vmax.xlane.f32.xlu2 %v1784_v61 }
 0x72f   : > { %v1381_v63 = vpop.trf.xlu0 }
 0x730   : > { %3981 = vmatmul.msk.f32.gmra.mxu3 %vm975_vm0, %v5030_v24  ;;  %4029 = vmatmul.msk.f32.gmra.mxu2 %vm975_vm0, %v1381_v63 }
 0x731   : > { %4013 = vmatmul.msk.f32.gmra.mxu1 %vm975_vm0, %v1381_v63 }
 0x733   : > { %v5144_v2 = vpop.f32.mrf.mxu2 }
 0x734   : > { %8406 = vst [vmem:[#allocation14_spill] sm:$0xff] %v5144_v2  ;;  %v1787_v3 = vmax.f32 %v5134_v62, %v5144_v2 }
 0x735   : > { %v5148_v4 = vpop.f32.mrf.mxu1  ;;  %4062 = vmatmul.msk.f32.gmra.mxu0 %vm975_vm0, %v5120_v57 }
 0x736   : > { %8407 = vst [vmem:[#allocation15_spill] sm:$0xff] %v5148_v4  ;;  %1788 = vmax.xlane.f32.xlu1 %v1787_v3 }
 0x737   : > { %v1382_v5 = vpop.trf.xlu0 }
 0x738   : > { %3982 = vmatmul.msk.f32.gmra.mxu3 %vm975_vm0, %v5036_v27  ;;  %4030 = vmatmul.msk.f32.gmra.mxu2 %vm975_vm0, %v1382_v5 }
 0x739   : > { %4014 = vmatmul.msk.f32.gmra.mxu1 %vm975_vm0, %v1382_v5 }
 0x73b   : > { %v5156_v6 = vpop.f32.mrf.mxu2 }
 0x73c   : > { %8408 = vst [vmem:[#allocation16_spill] sm:$0xff] %v5156_v6  ;;  %v1790_v8 = vmax.f32 %v5148_v4, %v5156_v6 }
 0x73d   : > { %v5162_v9 = vpop.f32.mrf.mxu1  ;;  %4063 = vmatmul.msk.f32.gmra.mxu0 %vm975_vm0, %v5140_v1 }
 0x73e   : > { %8409 = vst [vmem:[#allocation17_spill] sm:$0xff] %v5162_v9  ;;  %1791 = vmax.xlane.f32.xlu1 %v1790_v8 }
 0x73f   : > { %v1383_v11 = vpop.trf.xlu0 }
 0x740   : > { %3983 = vmatmul.msk.f32.gmra.mxu3 %vm975_vm0, %v5042_v31  ;;  %4031 = vmatmul.msk.f32.gmra.mxu2 %vm975_vm0, %v1383_v11 }
 0x741   : > { %4015 = vmatmul.msk.f32.gmra.mxu1 %vm975_vm0, %v1383_v11 }
 0x743   : > { %v5170_v12 = vpop.f32.mrf.mxu2 }
 0x744   : > { %8410 = vst [vmem:[#allocation18_spill] sm:$0xff] %v5170_v12  ;;  %v1793_v13 = vmax.f32 %v5162_v9, %v5170_v12 }
 0x745   : > { %v5174_v14 = vpop.f32.mrf.mxu1  ;;  %4064 = vmatmul.msk.f32.gmra.mxu0 %vm975_vm0, %v5158_v7 }
 0x746   : > { %8411 = vst [vmem:[#allocation19_spill] sm:$0xff] %v5174_v14  ;;  %1794 = vmax.xlane.f32.xlu2 %v1793_v13 }
 0x747   : > { %v1384_v16 = vpop.trf.xlu0 }
 0x748   : > { %3984 = vmatmul.msk.f32.gmra.mxu3 %vm975_vm0, %v5048_v36  ;;  %4032 = vmatmul.msk.f32.gmra.mxu2 %vm975_vm0, %v1384_v16  ;;  %v5226_v36 = vpop.f32.mrf.mxu0 }
 0x749   : > { %4016 = vmatmul.msk.f32.gmra.mxu1 %vm975_vm0, %v1384_v16  ;;  %8413 = vst [vmem:[#allocation21_spill] sm:$0xff] %v5226_v36 }
 0x74b   : > { %v5184_v17 = vpop.f32.mrf.mxu2 }
 0x74c   : > { %8412 = vst [vmem:[#allocation20_spill] sm:$0xff] %v5184_v17  ;;  %v1796_v18 = vmax.f32 %v5174_v14, %v5184_v17 }
 0x74d   : > { %v5188_v19 = vpop.f32.mrf.mxu1  ;;  %4065 = vmatmul.msk.f32.gmra.mxu0 %vm975_vm0, %v5176_v15 }
 0x74e   : > { %1797 = vmax.xlane.f32.xlu1 %v1796_v18 }
 0x74f   : > { %v1385_v20 = vpop.trf.xlu0 }
 0x750   : > { %3985 = vmatmul.msk.f32.gmra.mxu3 %vm975_vm0, %v5054_v38  ;;  %4033 = vmatmul.msk.f32.gmra.mxu2 %vm975_vm0, %v1385_v20 }
 0x751   : > { %4017 = vmatmul.msk.f32.gmra.mxu1 %vm975_vm0, %v1385_v20 }
 0x753   : > { %v5198_v22 = vpop.f32.mrf.mxu2 }
 0x755   : > { %v5200_v23 = vpop.f32.mrf.mxu1  ;;  %4066 = vmatmul.msk.f32.gmra.mxu0 %vm975_vm0, %v5190_v21 }
 0x757   : > { %v1386_v24 = vpop.trf.xlu0 }
 0x758   : > { %3986 = vmatmul.msk.f32.gmra.mxu3 %vm975_vm0, %v5060_v44  ;;  %4034 = vmatmul.msk.f32.gmra.mxu2 %vm975_vm0, %v1386_v24  ;;  %v1799_v44 = vmax.f32 %v5188_v19, %v5198_v22 }
 0x759   : > { %4018 = vmatmul.msk.f32.gmra.mxu1 %vm975_vm0, %v1386_v24 }
 0x75b   : > { %v5210_v26 = vpop.f32.mrf.mxu2 }
 0x75c   : > { %v1802_v27 = vmax.f32 %v5200_v23, %v5210_v26 }
 0x75d   : > { %v5214_v28 = vpop.f32.mrf.mxu1  ;;  %4067 = vmatmul.msk.f32.gmra.mxu0 %vm975_vm0, %v5206_v25 }
 0x75e   : > { %1803 = vmax.xlane.f32.xlu2 %v1802_v27 }
 0x75f   : > { %v1387_v31 = vpop.trf.xlu0 }
 0x760   : > { %3987 = vmatmul.msk.f32.gmra.mxu3 %vm975_vm0, %v5066_v46  ;;  %4035 = vmatmul.msk.f32.gmra.mxu2 %vm975_vm0, %v1387_v31 }
 0x761   : > { %4019 = vmatmul.msk.f32.gmra.mxu1 %vm975_vm0, %v1387_v31 }
 0x763   : > { %v5222_v32 = vpop.f32.mrf.mxu2 }
 0x764   : > { %v1805_v37 = vmax.f32 %v5214_v28, %v5222_v32 }
 0x765   : > { %v5230_v38 = vpop.f32.mrf.mxu1  ;;  %4068 = vmatmul.msk.f32.gmra.mxu0 %vm975_vm0, %v5224_v35 }
 0x766   : > { %1806 = vmax.xlane.f32.xlu1 %v1805_v37 }
 0x767   : > { %v1388_v39 = vpop.trf.xlu0 }
 0x768   : > { %3988 = vmatmul.msk.f32.gmra.mxu3 %vm975_vm0, %v5072_v48  ;;  %4036 = vmatmul.msk.f32.gmra.mxu2 %vm975_vm0, %v1388_v39  ;;  %v5248_v48 = vpop.f32.mrf.mxu0 }
 0x769   : > { %4020 = vmatmul.msk.f32.gmra.mxu1 %vm975_vm0, %v1388_v39  ;;  %8414 = vst [vmem:[#allocation22_spill] sm:$0xff] %v5248_v48 }
 0x76b   : > { %v5240_v45 = vpop.f32.mrf.mxu2 }
 0x76c   : > { %1800 = vmax.xlane.f32.xlu0 %v1799_v44  ;;  %v1808_v46 = vmax.f32 %v5230_v38, %v5240_v45 }
 0x76d   : > { %v5244_v47 = vpop.f32.mrf.mxu1  ;;  %4069 = vmatmul.msk.f32.gmra.mxu0 %vm975_vm0, %v5246_v49 }
 0x76e   : > { %1809 = vmax.xlane.f32.xlu1 %v1808_v46 }
 0x76f   : > { %v1389_v51 = vpop.trf.xlu0 }
 0x770   : > { %3989 = vmatmul.msk.f32.gmra.mxu3 %vm975_vm0, %v5078_v50  ;;  %4037 = vmatmul.msk.f32.gmra.mxu2 %vm975_vm0, %v1389_v51  ;;  %v5264_v58 = vpop.f32.mrf.mxu0 }
 0x771   : > { %4021 = vmatmul.msk.f32.gmra.mxu1 %vm975_vm0, %v1389_v51  ;;  %8415 = vst [vmem:[#allocation23_spill] sm:$0xff] %v5264_v58 }
 0x773   : > { %v5256_v29 = vpop.f32.mrf.mxu2 }
 0x774   : > { %v1811_v30 = vmax.f32 %v5244_v47, %v5256_v29 }
 0x775   : > { %v5260_v42 = vpop.f32.mrf.mxu1  ;;  %4070 = vmatmul.msk.f32.gmra.mxu0 %vm975_vm0, %v5262_v54 }
 0x776   : > { %1812 = vmax.xlane.f32.xlu1 %v1811_v30 }
 0x777   : > { %v1390_v34 = vpop.trf.xlu0 }
 0x778   : > { %3990 = vmatmul.msk.f32.gmra.mxu3 %vm975_vm0, %v5084_v52  ;;  %4038 = vmatmul.msk.f32.gmra.mxu2 %vm975_vm0, %v1390_v34  ;;  %v5281_v52 = vpop.trf.xlu1  ;;  %v5284_v3 = vpop.f32.mrf.mxu0 }
 0x779   : > { %4022 = vmatmul.msk.f32.gmra.mxu1 %vm975_vm0, %v1390_v34  ;;  %8416 = vst [vmem:[#allocation24_spill] sm:$0xff] %v5284_v3 }
 0x77b   : > { %v5272_v50 = vpop.f32.mrf.mxu2 }
 0x77c   : > { %v1814_v61 = vmax.f32 %v5260_v42, %v5272_v50 }
 0x77d   : > { %v5276_v63 = vpop.f32.mrf.mxu1  ;;  %4071 = vmatmul.msk.f32.gmra.mxu0 %vm975_vm0, %v5281_v52 }
 0x77e   : > { %1815 = vmax.xlane.f32.xlu1 %v1814_v61 }
 0x77f   : > { %v1391_v0 = vpop.trf.xlu0 }
 0x780   : > { %3991 = vmatmul.msk.f32.gmra.mxu3 %vm975_vm0, %v5090_v53  ;;  %4039 = vmatmul.msk.f32.gmra.mxu2 %vm975_vm0, %v1391_v0  ;;  %v5300_v11 = vpop.trf.xlu1  ;;  %v5304_v16 = vpop.f32.mrf.mxu0 }
 0x781   : > { %4023 = vmatmul.msk.f32.gmra.mxu1 %vm975_vm0, %v1391_v0 }
 0x783   : > { %v5288_v5 = vpop.f32.mrf.mxu2 }
 0x784   : > { %v1817_v8 = vmax.f32 %v5276_v63, %v5288_v5 }
 0x785   : > { %v5292_v10 = vpop.f32.mrf.mxu1  ;;  %4072 = vmatmul.msk.f32.gmra.mxu0 %vm975_vm0, %v5300_v11 }
 0x786   : > { %1818 = vmax.xlane.f32.xlu1 %v1817_v8 }
 0x787   : > { %v1392_v53 = vpop.trf.xlu0 }
 0x788   : > { %3992 = vmatmul.msk.f32.gmra.mxu3 %vm975_vm0, %v5096_v40  ;;  %4040 = vmatmul.msk.f32.gmra.mxu2 %vm975_vm0, %v1392_v53  ;;  %v5320_v31 = vpop.trf.xlu1  ;;  %v5322_v37 = vpop.f32.mrf.mxu0 }
 0x789   : > { %4024 = vmatmul.msk.f32.gmra.mxu1 %vm975_vm0, %v1392_v53 }
 0x78b   : > { %v5302_v13 = vpop.f32.mrf.mxu2 }
 0x78c   : > { %v1820_v18 = vmax.f32 %v5292_v10, %v5302_v13 }
 0x78d   : > { %v5311_v40 = vpop.f32.mrf.mxu1  ;;  %4073 = vmatmul.msk.f32.gmra.mxu0 %vm975_vm0, %v5320_v31 }
 0x78e   : > { %1821 = vmax.xlane.f32.xlu1 %v1820_v18 }
 0x78f   : > { %v1393_v20 = vpop.trf.xlu0 }
 0x790   : > { %3993 = vmatmul.msk.f32.gmra.mxu3 %vm975_vm0, %v5104_v41  ;;  %4041 = vmatmul.msk.f32.gmra.mxu2 %vm975_vm0, %v1393_v20  ;;  %v5336_v51 = vpop.trf.xlu1  ;;  %v5338_v34 = vpop.f32.mrf.mxu0 }
 0x791   : > { %4025 = vmatmul.msk.f32.gmra.mxu1 %vm975_vm0, %v1393_v20 }
 0x793   : > { %v5316_v24 = vpop.f32.mrf.mxu2 }
 0x794   : > { %v1823_v27 = vmax.f32 %v5311_v40, %v5316_v24 }
 0x795   : > { %v5330_v39 = vpop.f32.mrf.mxu1  ;;  %4074 = vmatmul.msk.f32.gmra.mxu0 %vm975_vm0, %v5336_v51 }
 0x796   : > { %1824 = vmax.xlane.f32.xlu1 %v1823_v27 }
 0x797   : > { %v1394_v41 = vpop.trf.xlu0 }
 0x798   : > { %3994 = vmatmul.msk.f32.gmra.mxu3 %vm975_vm0, %v5112_v55  ;;  %4042 = vmatmul.msk.f32.gmra.mxu2 %vm975_vm0, %v1394_v41  ;;  %v5358_v53 = vpop.f32.mrf.mxu0 }
 0x799   : > { %4026 = vmatmul.msk.f32.gmra.mxu1 %vm975_vm0, %v1394_v41 }
 0x79b   : > { %v5332_v44 = vpop.f32.mrf.mxu2 }
 0x79c   : > { %v1826_v46 = vmax.f32 %v5330_v39, %v5332_v44 }
 0x79e   : > { %1827 = vmax.xlane.f32.xlu2 %v1826_v46 }
 0x79f   : > { %v1395_v30 = vpop.trf.xlu0 }
 0x7a0   : > { %3995 = vmatmul.msk.f32.gmra.mxu3 %vm975_vm0, %v5122_v59  ;;  %4043 = vmatmul.msk.f32.gmra.mxu2 %vm975_vm0, %v1395_v30  ;;  %v5356_v59 = vpop.trf.xlu1 }
 0x7a1   : > { %4027 = vmatmul.msk.f32.gmra.mxu1 %vm975_vm0, %v1395_v30  ;;  %4075 = vmatmul.msk.f32.gmra.mxu0 %vm975_vm0, %v5356_v59 }
 0x7a3   : > { %v5346_v55 = vpop.f32.mrf.mxu3  ;;  %v5348_v61 = vpop.f32.mrf.mxu2 }
 0x7a4   : > { %v1829_v0 = vmax.f32 %v5346_v55, %v5348_v61 }
 0x7a6   : > { %1830 = vmax.xlane.f32.xlu1 %v1829_v0  ;;  %v5352_v8 = vpop.f32.mrf.mxu1 }
 0x7a7   : > { %8417 = vst [vmem:[#allocation25_spill] sm:$0xff] %v5352_v8 }
 0x7a8   : > { %4044 = vmatmul.msk.f32.vlgmr.msra.gmra.mxu3 %vm975_vm0, %v5100_v33 }
 0x7ab   : > { %v5362_v18 = vpop.f32.mrf.mxu3  ;;  %v5364_v20 = vpop.f32.mrf.mxu2 }
 0x7ac   : > { %8418 = vst [vmem:[#allocation26_spill] sm:$0xff] %v5362_v18  ;;  %v1832_v27 = vmax.f32 %v5362_v18, %v5226_v36  ;;  %v1880_v41 = vmax.f32 %v5352_v8, %v5364_v20 }
 0x7ad   : > { %8419 = vst [vmem:[#allocation27_spill] sm:$0xff] %v5364_v20 }
 0x7ae   : > { %1833 = vmax.xlane.f32.xlu1 %v1832_v27  ;;  %1881 = vmax.xlane.f32.xlu0 %v1880_v41  ;;  %v5370_v33 = vpop.f32.mrf.mxu1 }
 0x7af   : > { %8420 = vst [vmem:[#allocation28_spill] sm:$0xff] %v5370_v33 }
 0x7b0   : > { %4045 = vmatmul.msk.f32.gmra.mxu3 %vm975_vm0, %v5110_v43 }
 0x7b3   : > { %v5374_v46 = vpop.f32.mrf.mxu3  ;;  %v5376_v30 = vpop.f32.mrf.mxu2 }
 0x7b4   : > { %8421 = vst [vmem:[#allocation29_spill] sm:$0xff] %v5374_v46  ;;  %v1835_v0 = vmax.f32 %v5374_v46, %v5248_v48  ;;  %v1883_v36 = vmax.f32 %v5370_v33, %v5376_v30  ;;  %v5422_v33 = vpop.f32.mrf.mxu0 }
 0x7b5   : > { %8422 = vst [vmem:[#allocation30_spill] sm:$0xff] %v5376_v30 }
 0x7b6   : > { %1836 = vmax.xlane.f32.xlu1 %v1835_v0  ;;  %1884 = vmax.xlane.f32.xlu0 %v1883_v36  ;;  %v5382_v20 = vpop.f32.mrf.mxu1  ;;  %v5396_v36 = vpop.xlane.xlu1 %1788 }
 0x7b7   : > { %8423 = vst [vmem:[#allocation31_spill] sm:$0xff] %v5382_v20 }
 0x7b8   : > { %4046 = vmatmul.msk.f32.gmra.mxu3 %vm975_vm0, %v5120_v57  ;;  %8427 = vst [vmem:[#allocation35_spill] sm:$0xff] %v5396_v36  ;;  %v5400_v57 = vpop.xlane.xlu2 %1785 }
 0x7b9   : > { %8428 = vst [vmem:[#allocation36_spill] sm:$0xff] %v5400_v57 }
 0x7bb   : > { %v5386_v27 = vpop.f32.mrf.mxu3  ;;  %v5388_v43 = vpop.f32.mrf.mxu2 }
 0x7bc   : > { %8424 = vst [vmem:[#allocation32_spill] sm:$0xff] %v5386_v27  ;;  %v1838_v41 = vmax.f32 %v5386_v27, %v5264_v58  ;;  %v1886_v8 = vmax.f32 %v5382_v20, %v5388_v43  ;;  %v5444_v17 = vpop.f32.mrf.mxu0 }
 0x7bd   : > { %8425 = vst [vmem:[#allocation33_spill] sm:$0xff] %v5388_v43 }
 0x7be   : > { %1839 = vmax.xlane.f32.xlu1 %v1838_v41  ;;  %1887 = vmax.xlane.f32.xlu0 %v1886_v8  ;;  %v5394_v18 = vpop.f32.mrf.mxu1 }
 0x7bf   : > { %8426 = vst [vmem:[#allocation34_spill] sm:$0xff] %v5394_v18 }
 0x7c0   : > { %4047 = vmatmul.msk.f32.gmra.mxu3 %vm975_vm0, %v5140_v1  ;;  %v5414_v1 = vpop.xlane.xlu1 %1791  ;;  %v5416_v43 = vpop.xlane.xlu2 %1794 }
 0x7c1   : > { %8432 = vst [vmem:[#allocation40_spill] sm:$0xff] %v5414_v1 }
 0x7c2   : > { %8433 = vst [vmem:[#allocation41_spill] sm:$0xff] %v5416_v43 }
 0x7c3   : > { %v5402_v0 = vpop.f32.mrf.mxu3  ;;  %v5404_v30 = vpop.f32.mrf.mxu2 }
 0x7c4   : > { %8429 = vst [vmem:[#allocation37_spill] sm:$0xff] %v5402_v0  ;;  %v1841_v58 = vmax.f32 %v5402_v0, %v5284_v3  ;;  %v1889_v41 = vmax.f32 %v5394_v18, %v5404_v30 }
 0x7c5   : > { %8430 = vst [vmem:[#allocation38_spill] sm:$0xff] %v5404_v30 }
 0x7c6   : > { %1842 = vmax.xlane.f32.xlu0 %v1841_v58  ;;  %1890 = vmax.xlane.f32.xlu2 %v1889_v41  ;;  %v5410_v8 = vpop.f32.mrf.mxu1 }
 0x7c7   : > { %8431 = vst [vmem:[#allocation39_spill] sm:$0xff] %v5410_v8 }
 0x7c8   : > { %4048 = vmatmul.msk.f32.gmra.mxu3 %vm975_vm0, %v5158_v7  ;;  %v5430_v7 = vpop.xlane.xlu1 %1797 }
 0x7c9   : > { %8436 = vst [vmem:[#allocation44_spill] sm:$0xff] %v5430_v7 }
 0x7cb   : > { %v5418_v20 = vpop.f32.mrf.mxu3  ;;  %v5420_v27 = vpop.f32.mrf.mxu2 }
 0x7cc   : > { %8434 = vst [vmem:[#allocation42_spill] sm:$0xff] %v5420_v27  ;;  %v1844_v3 = vmax.f32 %v5418_v20, %v5304_v16 }
 0x7ce   : > { %1845 = vmax.xlane.f32.xlu2 %v1844_v3  ;;  %v5426_v58 = vpop.f32.mrf.mxu1  ;;  %v1892_v3 = vmax.f32 %v5410_v8, %v5420_v27 }
 0x7cf   : > { %8435 = vst [vmem:[#allocation43_spill] sm:$0xff] %v5426_v58 }
 0x7d0   : > { %4049 = vmatmul.msk.f32.gmra.mxu3 %vm975_vm0, %v5176_v15 }
 0x7d1   : > { %v1804_v41 = vpop.xlane.xlu2 %1803 }
 0x7d2   : > { %v1988_v0 = vsub.f32 %v5200_v23, %v1804_v41  ;;  %v1989_v30 = vsub.f32 %v5210_v26, %v1804_v41 }
 0x7d3   : > { %v5434_v18 = vpop.f32.mrf.mxu3  ;;  %v5436_v48 = vpop.f32.mrf.mxu2 }
 0x7d4   : > { %8437 = vst [vmem:[#allocation45_spill] sm:$0xff] %v5436_v48  ;;  %v1847_v46 = vmax.f32 %v5434_v18, %v5322_v37  ;;  %v1895_v15 = vmax.f32 %v5426_v58, %v5436_v48  ;;  %v2128_v14 = vmul.f32 1.442695, %v1988_v0  ;;  %v2130_v26 = vmul.f32 1.442695, %v1989_v30 }
 0x7d6   : > { %1848 = vmax.xlane.f32.xlu1 %v1847_v46  ;;  %1893 = vmax.xlane.f32.xlu2 %v1892_v3  ;;  %v5446_v23 = vpop.f32.mrf.mxu1  ;;  %4190 = vpow2.f32 %v2128_v14 }
 0x7d7   : > { %8438 = vst [vmem:[#allocation46_spill] sm:$0xff] %v5446_v23  ;;  %1896 = vmax.xlane.f32.xlu0 %v1895_v15  ;;  %4192 = vpow2.f32 %v2130_v26 }
 0x7d8   : > { %4050 = vmatmul.msk.f32.gmra.mxu3 %vm975_vm0, %v5190_v21 }
 0x7d9   : > { %v1807_v41 = vpop.xlane.xlu1 %1806 }
 0x7da   : > { %v1990_v7 = vsub.f32 %v5214_v28, %v1807_v41  ;;  %v1991_v27 = vsub.f32 %v5222_v32, %v1807_v41  ;;  %v5464_v28 = vpop.f32.mrf.mxu0 }
 0x7db   : > { %v5452_v48 = vpop.f32.mrf.mxu3  ;;  %v5454_v58 = vpop.f32.mrf.mxu2 }
 0x7dc   : > { %8439 = vst [vmem:[#allocation47_spill] sm:$0xff] %v5454_v58  ;;  %v2132_v46 = vmul.f32 1.442695, %v1990_v7  ;;  %v2134_v0 = vmul.f32 1.442695, %v1991_v27  ;;  %v1850_v30 = vmax.f32 %v5452_v48, %v5338_v34  ;;  %v1898_v3 = vmax.f32 %v5446_v23, %v5454_v58  ;;  %v5462_v21 = vpop.eup %4190 }
 0x7dd   : > { %8441 = vst [vmem:[#allocation49_spill] sm:$0xff] %v5462_v21  ;;  %v5468_v32 = vpop.eup %4192 }
 0x7de   : > { %4194 = vpow2.f32 %v2132_v46  ;;  %1899 = vmax.xlane.f32.xlu2 %v1898_v3  ;;  %v5460_v14 = vpop.f32.mrf.mxu1  ;;  %8442 = vst [vmem:[#allocation50_spill] sm:$0xff] %v5468_v32 }
 0x7df   : > { %8440 = vst [vmem:[#allocation48_spill] sm:$0xff] %v5460_v14  ;;  %4196 = vpow2.f32 %v2134_v0  ;;  %1851 = vmax.xlane.f32.xlu0 %v1850_v30  ;;  %v2378_v0 = vadd.f32 %v5468_v32, %v5462_v21 }
 0x7e0   : > { %4051 = vmatmul.msk.f32.gmra.mxu3 %vm975_vm0, %v5206_v25 }
 0x7e1   : > { %v1810_v27 = vpop.xlane.xlu1 %1809 }
 0x7e2   : > { %v5488_v8 = vpop.f32.mrf.mxu0  ;;  %v1992_v12 = vsub.f32 %v5230_v38, %v1810_v27 }
 0x7e3   : > { %v5470_v7 = vpop.f32.mrf.mxu3  ;;  %v5472_v15 = vpop.f32.mrf.mxu2 }
 0x7e4   : > { %8443 = vst [vmem:[#allocation51_spill] sm:$0xff] %v5472_v15  ;;  %v5474_v26 = vpop.eup %4194  ;;  %v1853_v41 = vmax.f32 %v5470_v7, %v5358_v53  ;;  %v2136_v2 = vmul.f32 1.442695, %v1992_v12 }
 0x7e5   : > { %8444 = vst [vmem:[#allocation52_spill] sm:$0xff] %v5474_v26  ;;  %v5478_v46 = vpop.eup %4196 }
 0x7e6   : > { %8445 = vst [vmem:[#allocation53_spill] sm:$0xff] %v5478_v46  ;;  %1854 = vmax.xlane.f32.xlu1 %v1853_v41  ;;  %v2381_v25 = vadd.f32 %v5478_v46, %v5474_v26  ;;  %v5484_v30 = vpop.f32.mrf.mxu1  ;;  %v1993_v41 = vsub.f32 %v5240_v45, %v1810_v27 }
 0x7e7   : > { %2379 = vadd.xlane.f32.xlu0 %v2378_v0 }
 0x7e8   : > { %2382 = vadd.xlane.f32.xlu2 %v2381_v25  ;;  %4052 = vmatmul.msk.f32.gmra.mxu3 %vm975_vm0, %v5224_v35  ;;  %v1901_v35 = vmax.f32 %v5460_v14, %v5472_v15  ;;  %v2138_v38 = vmul.f32 1.442695, %v1993_v41 }
 0x7e9   : > { %v1813_v3 = vpop.xlane.xlu1 %1812 }
 0x7ea   : > { %v1994_v9 = vsub.f32 %v5244_v47, %v1813_v3  ;;  %v1995_v43 = vsub.f32 %v5256_v29, %v1813_v3  ;;  %v5514_v3 = vpop.f32.mrf.mxu0 }
 0x7eb   : > { %v5494_v6 = vpop.f32.mrf.mxu3  ;;  %v5496_v4 = vpop.f32.mrf.mxu2 }
 0x7ec   : > { %v2140_v0 = vmul.f32 1.442695, %v1994_v9  ;;  %v2142_v25 = vmul.f32 1.442695, %v1995_v43  ;;  %v1904_v1 = vmax.f32 %v5484_v30, %v5496_v4 }
 0x7ee   : > { %4198 = vpow2.f32 %v2140_v0  ;;  %1902 = vmax.xlane.f32.xlu1 %v1901_v35  ;;  %v5502_v47 = vpop.f32.mrf.mxu1 }
 0x7ef   : > { %4200 = vpow2.f32 %v2142_v25  ;;  %1905 = vmax.xlane.f32.xlu0 %v1904_v1  ;;  %v1856_v1 = vmax.f32 %v5494_v6, %v5422_v33 }
 0x7f0   : > { %4053 = vmatmul.msk.f32.gmra.mxu3 %vm975_vm0, %v5246_v49  ;;  %4202 = vpow2.f32 %v2136_v2 }
 0x7f1   : > { %v1816_v45 = vpop.xlane.xlu1 %1815  ;;  %4204 = vpow2.f32 %v2138_v38 }
 0x7f2   : > { %v1996_v9 = vsub.f32 %v5260_v42, %v1816_v45  ;;  %v1997_v29 = vsub.f32 %v5272_v50, %v1816_v45 }
 0x7f3   : > { %v5508_v43 = vpop.f32.mrf.mxu3  ;;  %v5510_v12 = vpop.f32.mrf.mxu2 }
 0x7f4   : > { %v5512_v27 = vpop.eup %4198  ;;  %v1907_v49 = vmax.f32 %v5502_v47, %v5510_v12  ;;  %v2144_v42 = vmul.f32 1.442695, %v1996_v9  ;;  %v2146_v41 = vmul.f32 1.442695, %v1997_v29 }
 0x7f5   : > { %8446 = vst [vmem:[#allocation54_spill] sm:$0xff] %v5512_v27  ;;  %v5520_v2 = vpop.eup %4200 }
 0x7f6   : > { %8447 = vst [vmem:[#allocation55_spill] sm:$0xff] %v5520_v2  ;;  %1857 = vmax.xlane.f32.xlu1 %v1856_v1  ;;  %1908 = vmax.xlane.f32.xlu2 %v1907_v49  ;;  %v2387_v50 = vadd.f32 %v5520_v2, %v5512_v27  ;;  %v5524_v0 = vpop.eup %4202  ;;  %v5530_v35 = vpop.f32.mrf.mxu1  ;;  %4206 = vpow2.f32 %v2144_v42 }
 0x7f7   : > { %8448 = vst [vmem:[#allocation56_spill] sm:$0xff] %v5524_v0  ;;  %v5528_v25 = vpop.eup %4204  ;;  %4208 = vpow2.f32 %v2146_v41  ;;  %v5540_v49 = vpop.f32.mrf.mxu0  ;;  %v1859_v41 = vmax.f32 %v5508_v43, %v5444_v17 }
 0x7f8   : > { %2388 = vadd.xlane.f32.xlu0 %v2387_v50  ;;  %4054 = vmatmul.msk.f32.gmra.mxu3 %vm975_vm0, %v5262_v54  ;;  %8449 = vst [vmem:[#allocation57_spill] sm:$0xff] %v5528_v25  ;;  %v2384_v9 = vadd.f32 %v5528_v25, %v5524_v0 }
 0x7f9   : > { %v1819_v1 = vpop.xlane.xlu1 %1818 }
 0x7fa   : > { %v1999_v60 = vsub.f32 %v5288_v5, %v1819_v1 }
 0x7fb   : > { %v5532_v38 = vpop.f32.mrf.mxu3  ;;  %v5534_v45 = vpop.f32.mrf.mxu2 }
 0x7fc   : > { %v1910_v29 = vmax.f32 %v5530_v35, %v5534_v45  ;;  %v5542_v54 = vpop.eup %4206  ;;  %v1862_v57 = vmax.f32 %v5532_v38, %v5464_v28 }
 0x7fd   : > { %8450 = vst [vmem:[#allocation58_spill] sm:$0xff] %v5542_v54  ;;  %v5546_v42 = vpop.eup %4208 }
 0x7fe   : > { %2385 = vadd.xlane.f32.xlu1 %v2384_v9  ;;  %1911 = vmax.xlane.f32.xlu2 %v1910_v29  ;;  %8451 = vst [vmem:[#allocation59_spill] sm:$0xff] %v5546_v42  ;;  %v2390_v58 = vadd.f32 %v5546_v42, %v5542_v54  ;;  %v5554_v23 = vpop.f32.mrf.mxu1 }
 0x7ff   : > { %v5558_v29 = vpop.f32.mrf.mxu0 }
 0x800   : > { %4055 = vmatmul.msk.f32.gmra.mxu3 %vm975_vm0, %v5281_v52  ;;  %v1998_v52 = vsub.f32 %v5276_v63, %v1819_v1 }
 0x801   : > { %v1822_v9 = vpop.xlane.xlu1 %1821 }
 0x803   : > { %v5548_v50 = vpop.f32.mrf.mxu3  ;;  %v5556_v62 = vpop.f32.mrf.mxu2 }
 0x804   : > { %v1913_v36 = vmax.f32 %v5554_v23, %v5556_v62 }
 0x806   : > { %1860 = vmax.xlane.f32.xlu1 %v1859_v41  ;;  %2391 = vadd.xlane.f32.xlu2 %v2390_v58  ;;  %v2148_v41 = vmul.f32 1.442695, %v1998_v52  ;;  %v2150_v58 = vmul.f32 1.442695, %v1999_v60  ;;  %v5570_v32 = vpop.f32.mrf.mxu1 }
 0x807   : > { %v5576_v46 = vpop.f32.mrf.mxu0 }
 0x808   : > { %4056 = vmatmul.msk.f32.gmra.mxu3 %vm975_vm0, %v5300_v11  ;;  %4210 = vpow2.f32 %v2148_v41  ;;  %v2000_v41 = vsub.f32 %v5292_v10, %v1822_v9 }
 0x809   : > { %v1825_v63 = vpop.xlane.xlu1 %1824  ;;  %4212 = vpow2.f32 %v2150_v58 }
 0x80a   : > { %v2152_v10 = vmul.f32 1.442695, %v2000_v41 }
 0x80b   : > { %v5566_v56 = vpop.f32.mrf.mxu3  ;;  %v5572_v21 = vpop.f32.mrf.mxu2 }
 0x80c   : > { %v1916_v1 = vmax.f32 %v5570_v32, %v5572_v21 }
 0x80e   : > { %1863 = vmax.xlane.f32.xlu1 %v1862_v57  ;;  %1914 = vmax.xlane.f32.xlu2 %v1913_v36  ;;  %v1865_v57 = vmax.f32 %v5548_v50, %v5488_v8  ;;  %v5586_v26 = vpop.eup %4210 }
 0x80f   : > { %8452 = vst [vmem:[#allocation60_spill] sm:$0xff] %v5586_v26 }
 0x810   : > { %4057 = vmatmul.msk.f32.gmra.mxu3 %vm975_vm0, %v5320_v31 }
 0x811   : > { %v1828_v11 = vpop.xlane.xlu2 %1827 }
 0x812   : > { %v2004_v5 = vsub.f32 %v5330_v39, %v1828_v11  ;;  %v2005_v60 = vsub.f32 %v5332_v44, %v1828_v11  ;;  %v5591_v39 = vpop.eup %4212  ;;  %v2001_v44 = vsub.f32 %v5302_v13, %v1822_v9 }
 0x813   : > { %v5582_v36 = vpop.f32.mrf.mxu3  ;;  %8453 = vst [vmem:[#allocation61_spill] sm:$0xff] %v5591_v39 }
 0x814   : > { %v2160_v52 = vmul.f32 1.442695, %v2004_v5  ;;  %v2162_v31 = vmul.f32 1.442695, %v2005_v60  ;;  %v5598_v60 = vpop.f32.mrf.mxu0  ;;  %v2154_v9 = vmul.f32 1.442695, %v2001_v44  ;;  %v2002_v44 = vsub.f32 %v5311_v40, %v1825_v63 }
 0x815   : > { %8454 = vst [vmem:[#allocation62_spill] sm:$0xff] %v5598_v60 }
 0x816   : > { %1866 = vmax.xlane.f32.xlu1 %v1865_v57  ;;  %1917 = vmax.xlane.f32.xlu2 %v1916_v1  ;;  %4214 = vpow2.f32 %v2160_v52  ;;  %v5600_v57 = vpop.xlane.xlu0 %1800 }
 0x817   : > { %4216 = vpow2.f32 %v2162_v31  ;;  %v5610_v31 = vpop.f32.mrf.mxu2 }
 0x818   : > { %4058 = vmatmul.msk.f32.gmra.mxu3 %vm975_vm0, %v5336_v51  ;;  %v2393_v51 = vadd.f32 %v5591_v39, %v5586_v26  ;;  %4218 = vpow2.f32 %v2152_v10  ;;  %v1868_v10 = vmax.f32 %v5566_v56, %v5514_v3 }
 0x819   : > { %v1831_v58 = vpop.xlane.xlu1 %1830  ;;  %4220 = vpow2.f32 %v2154_v9 }
 0x81a   : > { %v2006_v11 = vsub.f32 %v5346_v55, %v1831_v58  ;;  %v2007_v5 = vsub.f32 %v5348_v61, %v1831_v58  ;;  %v1871_v55 = vmax.f32 %v5582_v36, %v5540_v49  ;;  %v5608_v61 = vpop.f32.mrf.mxu1 }
 0x81b   : > { %v5596_v1 = vpop.f32.mrf.mxu3 }
 0x81c   : > { %v1874_v13 = vmax.f32 %v5596_v1, %v5558_v29  ;;  %v2164_v52 = vmul.f32 1.442695, %v2006_v11  ;;  %v2166_v58 = vmul.f32 1.442695, %v2007_v5  ;;  %v5612_v41 = vpop.eup %4214  ;;  %v2003_v11 = vsub.f32 %v5316_v24, %v1825_v63  ;;  %v5632_v40 = vpop.f32.mrf.mxu0 }
 0x81d   : > { %v5616_v25 = vpop.eup %4216  ;;  %v1919_v5 = vmax.f32 %v5608_v61, %v5610_v31  ;;  %8456 = vst [vmem:[#allocation64_spill] sm:$0xff] %v5632_v40 }
 0x81e   : > { %2394 = vadd.xlane.f32.xlu1 %v2393_v51  ;;  %1875 = vmax.xlane.f32.xlu0 %v1874_v13  ;;  %4222 = vpow2.f32 %v2164_v52  ;;  %v5630_v9 = vpop.eup %4218  ;;  %v2158_v63 = vmul.f32 1.442695, %v2003_v11 }
 0x81f   : > { %1872 = vmax.xlane.f32.xlu2 %v1871_v55  ;;  %4224 = vpow2.f32 %v2166_v58  ;;  %v2156_v55 = vmul.f32 1.442695, %v2002_v44  ;;  %v5634_v24 = vpop.eup %4220 }
 0x820   : > { %4059 = vmatmul.msk.f32.gmra.mxu3 %vm975_vm0, %v5356_v59  ;;  %v2402_v59 = vadd.f32 %v5616_v25, %v5612_v41  ;;  %8457 = vst [vmem:[#allocation65_spill] sm:$0xff] %v5634_v24 }
 0x821   : > { %v5624_v13 = vpop.xlane.xlu0 %1881  ;;  %4226 = vpow2.f32 %v2156_v55  ;;  %v5666_v39 = vpop.xlane.xlu1 %1833 }
 0x822   : > { %8455 = vst [vmem:[#allocation63_spill] sm:$0xff] %v5624_v13  ;;  %v5638_v58 = vpop.f32.mrf.mxu1  ;;  %v5640_v13 = vpop.f32.mrf.mxu2  ;;  %4228 = vpow2.f32 %v2158_v63 }
 0x823   : > { %v5620_v51 = vpop.f32.mrf.mxu3  ;;  %v1922_v44 = vmax.f32 %v5638_v58, %v5640_v13  ;;  %8462 = vst [vmem:[#allocation70_spill] sm:$0xff] %v5666_v39 }
 0x824   : > { %v5636_v52 = vpop.eup %4222  ;;  %v5656_v55 = vpop.f32.mrf.mxu0 }
 0x825   : > { %v5642_v0 = vpop.eup %4224  ;;  %8460 = vst [vmem:[#allocation68_spill] sm:$0xff] %v5656_v55 }
 0x826   : > { %1869 = vmax.xlane.f32.xlu1 %v1868_v10  ;;  %2403 = vadd.xlane.f32.xlu0 %v2402_v59  ;;  %v2396_v10 = vadd.f32 %v5634_v24, %v5630_v9  ;;  %v2405_v11 = vadd.f32 %v5642_v0, %v5636_v52 }
 0x827   : > { %1920 = vmax.xlane.f32.xlu2 %v1919_v5  ;;  %v5654_v59 = vpop.eup %4226 }
 0x828   : > { %v5658_v63 = vpop.eup %4228 }
 0x829   : > { %v5652_v5 = vpop.xlane.xlu0 %1884  ;;  %v2399_v42 = vadd.f32 %v5658_v63, %v5654_v59 }
 0x82a   : > { %8459 = vst [vmem:[#allocation67_spill] sm:$0xff] %v5652_v5  ;;  %v5674_v5 = vpop.f32.mrf.mxu2 }
 0x82b   : > { %v5644_v2 = vpop.f32.mrf.mxu3  ;;  %8465 = vst [vmem:[#allocation73_spill] sm:$0xff] %v5674_v5 }
 0x82c   : > { %8458 = vst [vmem:[#allocation66_spill] sm:$0xff] %v5644_v2  ;;  %v1928_v54 = vmax.f32 %v5644_v2, %v5598_v60  ;;  %v5678_v15 = vpop.f32.mrf.mxu0 }
 0x82d   : > { %8467 = vst [vmem:[#allocation75_spill] sm:$0xff] %v5678_v15 }
 0x82e   : > { %2397 = vadd.xlane.f32.xlu1 %v2396_v10  ;;  %2406 = vadd.xlane.f32.xlu0 %v2405_v11  ;;  %v1877_v10 = vmax.f32 %v5620_v51, %v5576_v46 }
 0x82f   : > { %1923 = vmax.xlane.f32.xlu2 %v1922_v44  ;;  %v5670_v44 = vpop.f32.mrf.mxu1 }
 0x830   : > { %8463 = vst [vmem:[#allocation71_spill] sm:$0xff] %v5670_v44  ;;  %v1925_v60 = vmax.f32 %v5670_v44, %v5674_v5 }
 0x831   : > { %v5672_v11 = vpop.xlane.xlu0 %1887 }
 0x832   : > { %8464 = vst [vmem:[#allocation72_spill] sm:$0xff] %v5672_v11 }
 0x833   : > { %v5660_v27 = vpop.f32.mrf.mxu3 }
 0x834   : > { %8461 = vst [vmem:[#allocation69_spill] sm:$0xff] %v5660_v27  ;;  %v5694_v39 = vpop.f32.mrf.mxu0 }
 0x835   : > { %8472 = vst [vmem:[#allocation80_spill] sm:$0xff] %v5694_v39 }
 0x836   : > { %2400 = vadd.xlane.f32.xlu1 %v2399_v42  ;;  %1929 = vmax.xlane.f32.xlu0 %v1928_v54  ;;  %v1931_v42 = vmax.f32 %v5660_v27, %v5632_v40  ;;  %v5686_v54 = vpop.xlane.xlu1 %1836 }
 0x837   : > { %1878 = vmax.xlane.f32.xlu2 %v1877_v10  ;;  %8469 = vst [vmem:[#allocation77_spill] sm:$0xff] %v5686_v54 }
 0x839   : > { %v5676_v26 = vpop.xlane.xlu2 %1890  ;;  %v5688_v10 = vpop.xlane.xlu0 %1842 }
 0x83a   : > { %8466 = vst [vmem:[#allocation74_spill] sm:$0xff] %v5676_v26 }
 0x83b   : > { %v5680_v14 = vpop.f32.mrf.mxu3  ;;  %8470 = vst [vmem:[#allocation78_spill] sm:$0xff] %v5688_v10 }
 0x83c   : > { %8468 = vst [vmem:[#allocation76_spill] sm:$0xff] %v5680_v14  ;;  %v1934_v26 = vmax.f32 %v5680_v14, %v5656_v55  ;;  %v5708_v27 = vpop.f32.mrf.mxu0 }
 0x83d   : > { %8477 = vst [vmem:[#allocation85_spill] sm:$0xff] %v5708_v27 }
 0x83e   : > { %1932 = vmax.xlane.f32.xlu0 %v1931_v42  ;;  %v5698_v5 = vpop.xlane.xlu1 %1839 }
 0x83f   : > { %1926 = vmax.xlane.f32.xlu2 %v1925_v60  ;;  %8473 = vst [vmem:[#allocation81_spill] sm:$0xff] %v5698_v5 }
 0x841   : > { %v5690_v2 = vpop.xlane.xlu2 %1845 }
 0x843   : > { %v5692_v11 = vpop.f32.mrf.mxu3 }
 0x844   : > { %8471 = vst [vmem:[#allocation79_spill] sm:$0xff] %v5692_v11  ;;  %v1937_v60 = vmax.f32 %v5692_v11, %v5678_v15 }
 0x847   : > { %1935 = vmax.xlane.f32.xlu2 %v1934_v26 }
 0x849   : > { %v5704_v40 = vpop.xlane.xlu2 %1893  ;;  %v5710_v10 = vpop.xlane.xlu1 %1848 }
 0x84a   : > { %v5700_v44 = vpop.xlane.xlu0 %1896  ;;  %8476 = vst [vmem:[#allocation84_spill] sm:$0xff] %v5704_v40 }
 0x84b   : > { %8474 = vst [vmem:[#allocation82_spill] sm:$0xff] %v5700_v44  ;;  %v5702_v42 = vpop.f32.mrf.mxu3 }
 0x84c   : > { %8475 = vst [vmem:[#allocation83_spill] sm:$0xff] %v5702_v42  ;;  %v1940_v15 = vmax.f32 %v5702_v42, %v5694_v39 }
 0x84f   : > { %1938 = vmax.xlane.f32.xlu2 %v1937_v60  ;;  %v5722_v60 = vpop.f32.mrf.mxu0 }
 0x850   : > { %8480 = vst [vmem:[#allocation88_spill] sm:$0xff] %v5722_v60 }
 0x851   : > { %v5720_v11 = vpop.xlane.xlu2 %1899 }
 0x852   : > { %v1852_v54 = vpop.xlane.xlu0 %1851  ;;  %8479 = vst [vmem:[#allocation87_spill] sm:$0xff] %v5720_v11 }
 0x853   : > { %v2020_v55 = vsub.f32 %v5452_v48, %v1852_v54  ;;  %v2021_v26 = vsub.f32 %v5338_v34, %v1852_v54  ;;  %v5714_v14 = vpop.f32.mrf.mxu3 }
 0x854   : > { %8478 = vst [vmem:[#allocation86_spill] sm:$0xff] %v5714_v14  ;;  %v1943_v44 = vmax.f32 %v5714_v14, %v5708_v27 }
 0x855   : > { %v2192_v5 = vmul.f32 1.442695, %v2020_v55  ;;  %v2194_v40 = vmul.f32 1.442695, %v2021_v26 }
 0x856   : > { %1944 = vmax.xlane.f32.xlu1 %v1943_v44 }
 0x857   : > { %1941 = vmax.xlane.f32.xlu2 %v1940_v15  ;;  %4230 = vpow2.f32 %v2192_v5  ;;  %v5742_v5 = vpop.f32.mrf.mxu0 }
 0x858   : > { %4232 = vpow2.f32 %v2194_v40 }
 0x859   : > { %v1855_v48 = vpop.xlane.xlu1 %1854 }
 0x85a   : > { %v2022_v34 = vsub.f32 %v5470_v7, %v1855_v48  ;;  %v2023_v54 = vsub.f32 %v5358_v53, %v1855_v48  ;;  %v5726_v24 = vpop.xlane.xlu0 %2379 }
 0x85b   : > { %v5728_v55 = vpop.f32.mrf.mxu3  ;;  %v5738_v53 = vpop.xlane.xlu2 %2382 }
 0x85c   : > { %8481 = vst [vmem:[#allocation89_spill] sm:$0xff] %v5728_v55  ;;  %v2196_v26 = vmul.f32 1.442695, %v2022_v34  ;;  %v2198_v27 = vmul.f32 1.442695, %v2023_v54  ;;  %v1946_v44 = vmax.f32 %v5728_v55, %v5722_v60 }
 0x85d   : > { %v5732_v14 = vpop.eup %4230 }
 0x85e   : > { %8482 = vst [vmem:[#allocation90_spill] sm:$0xff] %v5732_v14  ;;  %4234 = vpow2.f32 %v2196_v26  ;;  %v5734_v15 = vpop.eup %4232  ;;  %1947 = vmax.xlane.f32.xlu0 %v1946_v44 }
 0x85f   : > { %8483 = vst [vmem:[#allocation91_spill] sm:$0xff] %v5734_v15  ;;  %4236 = vpow2.f32 %v2198_v27  ;;  %v2426_v7 = vadd.f32 %v5734_v15, %v5732_v14 }
 0x861   : > { %v5740_v40 = vpop.xlane.xlu1 %1902  ;;  %2427 = vadd.xlane.f32.xlu1 %v2426_v7 }
 0x862   : > { %v1906_v48 = vpop.xlane.xlu0 %1905 }
 0x863   : > { %v2056_v34 = vsub.f32 %v5484_v30, %v1906_v48  ;;  %v5745_v54 = vpop.f32.mrf.mxu3  ;;  %v2057_v27 = vsub.f32 %v5496_v4, %v1906_v48 }
 0x864   : > { %v5747_v26 = vpop.eup %4234  ;;  %v1949_v44 = vmax.f32 %v5745_v54, %v5742_v5 }
 0x865   : > { %8484 = vst [vmem:[#allocation92_spill] sm:$0xff] %v5747_v26  ;;  %v5752_v15 = vpop.eup %4236  ;;  %v2264_v60 = vmul.f32 1.442695, %v2056_v34  ;;  %v2266_v7 = vmul.f32 1.442695, %v2057_v27 }
 0x866   : > { %8485 = vst [vmem:[#allocation93_spill] sm:$0xff] %v5752_v15  ;;  %1950 = vmax.xlane.f32.xlu2 %v1949_v44  ;;  %v2429_v14 = vadd.f32 %v5752_v15, %v5747_v26  ;;  %v5762_v44 = vpop.f32.mrf.mxu0 }
 0x867   : > { %4238 = vpow2.f32 %v2264_v60 }
 0x868   : > { %2430 = vadd.xlane.f32.xlu0 %v2429_v14  ;;  %4240 = vpow2.f32 %v2266_v7 }
 0x869   : > { %v1858_v55 = vpop.xlane.xlu1 %1857  ;;  %v1909_v30 = vpop.xlane.xlu2 %1908 }
 0x86a   : > { %v2024_v39 = vsub.f32 %v5494_v6, %v1858_v55  ;;  %v2025_v42 = vsub.f32 %v5422_v33, %v1858_v55  ;;  %v2058_v4 = vsub.f32 %v5502_v47, %v1909_v30  ;;  %v2059_v48 = vsub.f32 %v5510_v12, %v1909_v30 }
 0x86b   : > { %v5760_v11 = vpop.f32.mrf.mxu3 }
 0x86c   : > { %v2200_v15 = vmul.f32 1.442695, %v2024_v39  ;;  %v2202_v34 = vmul.f32 1.442695, %v2025_v42  ;;  %v2268_v27 = vmul.f32 1.442695, %v2058_v4  ;;  %v1952_v26 = vmax.f32 %v5760_v11, %v5762_v44 }
 0x86d   : > { %v2270_v14 = vmul.f32 1.442695, %v2059_v48  ;;  %v5766_v6 = vpop.eup %4238 }
 0x86e   : > { %4242 = vpow2.f32 %v2200_v15  ;;  %1953 = vmax.xlane.f32.xlu1 %v1952_v26  ;;  %8486 = vst [vmem:[#allocation94_spill] sm:$0xff] %v5766_v6  ;;  %v5770_v12 = vpop.eup %4240 }
 0x86f   : > { %4244 = vpow2.f32 %v2202_v34  ;;  %8487 = vst [vmem:[#allocation95_spill] sm:$0xff] %v5770_v12  ;;  %v2480_v42 = vadd.f32 %v5770_v12, %v5766_v6 }
 0x870   : > { %4246 = vpow2.f32 %v2268_v27 }
 0x871   : > { %4248 = vpow2.f32 %v2270_v14  ;;  %v5768_v33 = vpop.xlane.xlu1 %2385  ;;  %v1912_v47 = vpop.xlane.xlu2 %1911 }
 0x872   : > { %v5792_v14 = vpop.f32.mrf.mxu0  ;;  %v2060_v12 = vsub.f32 %v5530_v35, %v1912_v47 }
 0x873   : > { %v5784_v7 = vpop.f32.mrf.mxu3 }
 0x874   : > { %v5772_v60 = vpop.eup %4242 }
 0x875   : > { %8488 = vst [vmem:[#allocation96_spill] sm:$0xff] %v5772_v60  ;;  %v5774_v39 = vpop.eup %4244 }
 0x876   : > { %8489 = vst [vmem:[#allocation97_spill] sm:$0xff] %v5774_v39  ;;  %v5778_v55 = vpop.eup %4246  ;;  %v2432_v15 = vadd.f32 %v5774_v39, %v5772_v60  ;;  %2481 = vadd.xlane.f32.xlu1 %v2480_v42  ;;  %v2061_v39 = vsub.f32 %v5534_v45, %v1912_v47 }
 0x877   : > { %8490 = vst [vmem:[#allocation98_spill] sm:$0xff] %v5778_v55  ;;  %v5782_v26 = vpop.eup %4248 }
 0x878   : > { %8491 = vst [vmem:[#allocation99_spill] sm:$0xff] %v5782_v26  ;;  %v2483_v30 = vadd.f32 %v5782_v26, %v5778_v55  ;;  %2433 = vadd.xlane.f32.xlu2 %v2432_v15  ;;  %v1955_v15 = vmax.f32 %v5784_v7, %v5792_v14  ;;  %v2272_v26 = vmul.f32 1.442695, %v2060_v12  ;;  %v1986_v12 = vsub.f32 %v5188_v19, %v5600_v57 }
 0x879   : > { %v1861_v4 = vpop.xlane.xlu1 %1860  ;;  %v5788_v48 = vpop.xlane.xlu2 %2391 }
 0x87a   : > { %2484 = vadd.xlane.f32.xlu0 %v2483_v30  ;;  %v2026_v34 = vsub.f32 %v5508_v43, %v1861_v4  ;;  %v2027_v27 = vsub.f32 %v5444_v17, %v1861_v4  ;;  %v2274_v30 = vmul.f32 1.442695, %v2061_v39  ;;  %v5814_v39 = vpop.xlane.xlu0 %2388 }
 0x87b   : > { %v5800_v60 = vpop.f32.mrf.mxu3 }
 0x87c   : > { %v2204_v6 = vmul.f32 1.442695, %v2026_v34  ;;  %v2206_v42 = vmul.f32 1.442695, %v2027_v27  ;;  %v5808_v34 = vpop.f32.mrf.mxu0 }
 0x87d   : > { %8494 = vst [vmem:[#allocation102_spill] sm:$0xff] %v5808_v34 }
 0x87e   : > { %4250 = vpow2.f32 %v2204_v6 }
 0x87f   : > { %4252 = vpow2.f32 %v2206_v42 }
 0x880   : > { %1956 = vmax.xlane.f32.xlu2 %v1955_v15  ;;  %4254 = vpow2.f32 %v2272_v26  ;;  %v2124_v26 = vmul.f32 1.442695, %v1986_v12 }
 0x881   : > { %v1864_v55 = vpop.xlane.xlu1 %1863  ;;  %v1915_v43 = vpop.xlane.xlu2 %1914  ;;  %4256 = vpow2.f32 %v2274_v30 }
 0x882   : > { %v2028_v17 = vsub.f32 %v5532_v38, %v1864_v55  ;;  %v2029_v4 = vsub.f32 %v5464_v28, %v1864_v55  ;;  %v1958_v38 = vmax.f32 %v5800_v60, %v5808_v34  ;;  %v1987_v55 = vsub.f32 %v5198_v22, %v5600_v57 }
 0x883   : > { %v2062_v22 = vsub.f32 %v5554_v23, %v1915_v43 }
 0x884   : > { %v5802_v35 = vpop.eup %4250  ;;  %v2208_v45 = vmul.f32 1.442695, %v2028_v17  ;;  %v2210_v6 = vmul.f32 1.442695, %v2029_v4 }
 0x885   : > { %8492 = vst [vmem:[#allocation100_spill] sm:$0xff] %v5802_v35  ;;  %v5804_v47 = vpop.eup %4252 }
 0x886   : > { %8493 = vst [vmem:[#allocation101_spill] sm:$0xff] %v5804_v47  ;;  %4258 = vpow2.f32 %v2208_v45  ;;  %v2435_v28 = vadd.f32 %v5804_v47, %v5802_v35  ;;  %v5818_v42 = vpop.eup %4254 }
 0x887   : > { %4260 = vpow2.f32 %v2210_v6  ;;  %8495 = vst [vmem:[#allocation103_spill] sm:$0xff] %v5818_v42  ;;  %v5824_v45 = vpop.eup %4256  ;;  %v2016_v6 = vsub.f32 %v5418_v20, %v5690_v2 }
 0x888   : > { %1959 = vmax.xlane.f32.xlu2 %v1958_v38  ;;  %2436 = vadd.xlane.f32.xlu1 %v2435_v28  ;;  %8496 = vst [vmem:[#allocation104_spill] sm:$0xff] %v5824_v45  ;;  %4262 = vpow2.f32 %v2124_v26  ;;  %v2486_v23 = vadd.f32 %v5824_v45, %v5818_v42 }
 0x889   : > { %v1867_v19 = vpop.xlane.xlu1 %1866  ;;  %v1918_v27 = vpop.xlane.xlu2 %1917 }
 0x88a   : > { %v2030_v15 = vsub.f32 %v5548_v50, %v1867_v19  ;;  %v2031_v30 = vsub.f32 %v5488_v8, %v1867_v19  ;;  %v2064_v17 = vsub.f32 %v5570_v32, %v1918_v27  ;;  %v2065_v4 = vsub.f32 %v5572_v21, %v1918_v27  ;;  %v5836_v19 = vpop.f32.mrf.mxu3 }
 0x88b   : > { %v2126_v8 = vmul.f32 1.442695, %v1987_v55  ;;  %v2063_v32 = vsub.f32 %v5556_v62, %v1915_v43  ;;  %v2017_v21 = vsub.f32 %v5304_v16, %v5690_v2  ;;  %8499 = vst [vmem:[#allocation107_spill] sm:$0xff] %v5836_v19  ;;  %v2184_v27 = vmul.f32 1.442695, %v2016_v6 }
 0x88c   : > { %v5828_v38 = vpop.eup %4258  ;;  %v2212_v57 = vmul.f32 1.442695, %v2030_v15  ;;  %v2214_v12 = vmul.f32 1.442695, %v2031_v30  ;;  %v2280_v28 = vmul.f32 1.442695, %v2064_v17  ;;  %v5842_v15 = vpop.f32.mrf.mxu0 }
 0x88d   : > { %8497 = vst [vmem:[#allocation105_spill] sm:$0xff] %v5828_v38  ;;  %v5831_v47 = vpop.eup %4260  ;;  %v2282_v50 = vmul.f32 1.442695, %v2065_v4  ;;  %v2276_v55 = vmul.f32 1.442695, %v2062_v22 }
 0x88e   : > { %8498 = vst [vmem:[#allocation106_spill] sm:$0xff] %v5831_v47  ;;  %4264 = vpow2.f32 %v2212_v57  ;;  %v2438_v20 = vadd.f32 %v5831_v47, %v5828_v38  ;;  %v2278_v62 = vmul.f32 1.442695, %v2063_v32  ;;  %v2186_v43 = vmul.f32 1.442695, %v2017_v21  ;;  %v5846_v30 = vpop.eup %4262 }
 0x88f   : > { %4266 = vpow2.f32 %v2214_v12  ;;  %8500 = vst [vmem:[#allocation108_spill] sm:$0xff] %v5842_v15 }
 0x890   : > { %4268 = vpow2.f32 %v2280_v28  ;;  %2439 = vadd.xlane.f32.xlu0 %v2438_v20  ;;  %2487 = vadd.xlane.f32.xlu2 %v2486_v23  ;;  %8501 = vst [vmem:[#allocation109_spill] sm:$0xff] %v5846_v30 }
 0x891   : > { %4270 = vpow2.f32 %v2282_v50  ;;  %v5844_v16 = vpop.xlane.xlu1 %2394  ;;  %v1876_v2 = vpop.xlane.xlu0 %1875 }
 0x892   : > { %4272 = vpow2.f32 %v2126_v8  ;;  %v1873_v26 = vpop.xlane.xlu2 %1872  ;;  %v2036_v22 = vsub.f32 %v5596_v1, %v1876_v2  ;;  %v2037_v8 = vsub.f32 %v5558_v29, %v1876_v2  ;;  %v5866_v21 = vpop.f32.mrf.mxu3 }
 0x893   : > { %4274 = vpow2.f32 %v2184_v27  ;;  %v2034_v17 = vsub.f32 %v5582_v36, %v1873_v26  ;;  %v2035_v4 = vsub.f32 %v5540_v49, %v1873_v26  ;;  %v1961_v36 = vmax.f32 %v5836_v19, %v5842_v15  ;;  %8507 = vst [vmem:[#allocation115_spill] sm:$0xff] %v5866_v21 }
 0x894   : > { %v5850_v6 = vpop.eup %4264  ;;  %4276 = vpow2.f32 %v2276_v55  ;;  %v2224_v20 = vmul.f32 1.442695, %v2036_v22  ;;  %v2226_v27 = vmul.f32 1.442695, %v2037_v8  ;;  %v5882_v22 = vpop.f32.mrf.mxu0 }
 0x895   : > { %8502 = vst [vmem:[#allocation110_spill] sm:$0xff] %v5850_v6  ;;  %v5853_v57 = vpop.eup %4266  ;;  %4278 = vpow2.f32 %v2278_v62  ;;  %v2220_v12 = vmul.f32 1.442695, %v2034_v17  ;;  %v2222_v28 = vmul.f32 1.442695, %v2035_v4 }
 0x896   : > { %8503 = vst [vmem:[#allocation111_spill] sm:$0xff] %v5853_v57  ;;  %v5856_v32 = vpop.eup %4268  ;;  %4280 = vpow2.f32 %v2186_v43  ;;  %v2441_v49 = vadd.f32 %v5853_v57, %v5850_v6 }
 0x897   : > { %8504 = vst [vmem:[#allocation112_spill] sm:$0xff] %v5856_v32  ;;  %v5862_v50 = vpop.eup %4270  ;;  %4282 = vpow2.f32 %v2220_v12 }
 0x898   : > { %8505 = vst [vmem:[#allocation113_spill] sm:$0xff] %v5862_v50  ;;  %v5864_v1 = vpop.eup %4272  ;;  %4284 = vpow2.f32 %v2222_v28  ;;  %v2492_v29 = vadd.f32 %v5862_v50, %v5856_v32  ;;  %1962 = vmax.xlane.f32.xlu2 %v1961_v36  ;;  %2442 = vadd.xlane.f32.xlu1 %v2441_v49 }
 0x899   : > { %8506 = vst [vmem:[#allocation114_spill] sm:$0xff] %v5864_v1  ;;  %v5870_v23 = vpop.eup %4274  ;;  %4286 = vrcp.f32 %v5814_v39  ;;  %v1870_v55 = vpop.xlane.xlu1 %1869  ;;  %v2375_v38 = vadd.f32 %v5864_v1, %v5846_v30 }
 0x89a   : > { %8508 = vst [vmem:[#allocation116_spill] sm:$0xff] %v5870_v23  ;;  %v5873_v62 = vpop.xlane.xlu0 %2403  ;;  %v5875_v2 = vpop.eup %4276  ;;  %2493 = vadd.xlane.f32.xlu0 %v2492_v29  ;;  %v2032_v43 = vsub.f32 %v5566_v56, %v1870_v55  ;;  %v2033_v26 = vsub.f32 %v5514_v3, %v1870_v55  ;;  %v1964_v29 = vmax.f32 %v5866_v21, %v5882_v22 }
 0x89b   : > { %8509 = vst [vmem:[#allocation117_spill] sm:$0xff] %v5875_v2  ;;  %v1921_v17 = vpop.xlane.xlu2 %1920  ;;  %4288 = vrcp.f32 %v5873_v62  ;;  %v5880_v4 = vpop.eup %4278  ;;  %vm2753_vm3 = vweird.f32 %v5873_v62 }
 0x89c   : > { %8510 = vst [vmem:[#allocation118_spill] sm:$0xff] %v5880_v4  ;;  %4290 = vrcp.f32 %v5788_v48  ;;  %v5885_v12 = vpop.eup %4280  ;;  %v2216_v28 = vmul.f32 1.442695, %v2032_v43  ;;  %v2218_v8 = vmul.f32 1.442695, %v2033_v26  ;;  %v2066_v36 = vsub.f32 %v5608_v61, %v1921_v17 }
 0x89d   : > { %8511 = vst [vmem:[#allocation119_spill] sm:$0xff] %v5882_v22  ;;  %4292 = vpow2.f32 %v2224_v20  ;;  %v5888_v49 = vpop.eup %4282  ;;  %v2067_v56 = vsub.f32 %v5610_v31, %v1921_v17  ;;  %v2489_v55 = vadd.f32 %v5880_v4, %v5875_v2  ;;  %v2019_v4 = vsub.f32 %v5322_v37, %v5710_v10  ;;  %v5931_v2 = vpop.f32.mrf.mxu0 }
 0x89e   : > { %8512 = vst [vmem:[#allocation120_spill] sm:$0xff] %v5885_v12  ;;  %4294 = vpow2.f32 %v2226_v27  ;;  %v5891_v3 = vpop.eup %4284  ;;  %v2284_v31 = vmul.f32 1.442695, %v2066_v36 }
 0x89f   : > { %8513 = vst [vmem:[#allocation121_spill] sm:$0xff] %v5888_v49  ;;  %4296 = vpow2.f32 %v2216_v28  ;;  %v5897_v45 = vpop.eup %4286  ;;  %v2447_v61 = vadd.f32 %v5891_v3, %v5888_v49  ;;  %v2286_v43 = vmul.f32 1.442695, %v2067_v56  ;;  %v5922_v56 = vpop.f32.mrf.mxu3 }
 0x8a0   : > { %8514 = vst [vmem:[#allocation122_spill] sm:$0xff] %v5891_v3  ;;  %4298 = vpow2.f32 %v2218_v8  ;;  %1965 = vmax.xlane.f32.xlu2 %v1964_v29  ;;  %2490 = vadd.xlane.f32.xlu1 %v2489_v55  ;;  %v2018_v55 = vsub.f32 %v5434_v18, %v5710_v10  ;;  %v5935_v50 = vmul.f32 %v5897_v45, %v5814_v39 }
 0x8a1   : > { %v5901_v20 = vpop.eup %4288  ;;  %4300 = vrcp.f32 %v5768_v33  ;;  %v5909_v17 = vpop.xlane.xlu1 %2397  ;;  %8517 = vst [vmem:[#allocation125_spill] sm:$0xff] %v5922_v56  ;;  %v1967_v37 = vmax.f32 %v5922_v56, %v5931_v2 }
 0x8a2   : > { %v5904_v27 = vpop.eup %4290  ;;  %4302 = vrcp.f32 %v5844_v16  ;;  %v2749_v26 = vmul.f32 %v5901_v20, %v5873_v62  ;;  %v5911_v28 = vpop.xlane.xlu0 %2406  ;;  %2448 = vadd.xlane.f32.xlu0 %v2447_v61  ;;  %8520 = vst [vmem:[#allocation128_spill] sm:$0xff] %v5931_v2  ;;  %v5949_v47 = vmul.f32 1.442695, %v2018_v55  ;;  %v2420_v55 = vadd.f32 %v5885_v12, %v5870_v23 }
 0x8a3   : > { %v5913_v8 = vpop.eup %4292  ;;  %4304 = vrcp.f32 %v5909_v17  ;;  %v5916_v36 = vpop.xlane.xlu2 %1923  ;;  %v5939_v18 = vmul.f32 %v5904_v27, %v5788_v48  ;;  %vm2754_vm1 = vweird.f32 %v5901_v20  ;;  %v2773_v22 = vand.u32 2147483648, %v5911_v28 }
 0x8a4   : > { %8515 = vst [vmem:[#allocation123_spill] sm:$0xff] %v5913_v8  ;;  %v5918_v29 = vpop.eup %4294  ;;  %4306 = vrcp.f32 %v5911_v28  ;;  %v2750_v32 = vsub.f32 1.0, %v2749_v26  ;;  %v2069_v30 = vsub.f32 %v5640_v13, %v5916_v36  ;;  %vm2767_vm4 = vweird.f32 %v5911_v28  ;;  %vm6006_vm5 = vmor %vm2753_vm3, %vm2754_vm1 }
 0x8a5   : > { %8516 = vst [vmem:[#allocation124_spill] sm:$0xff] %v5918_v29  ;;  %v5925_v42 = vpop.eup %4296  ;;  %4308 = vpow2.f32 %v2284_v31  ;;  %v2450_v26 = vadd.f32 %v5918_v29, %v5913_v8  ;;  %v2068_v29 = vsub.f32 %v5638_v58, %v5916_v36  ;;  %v2757_v36 = vand.u32 2147483647, %v5873_v62 }
 0x8a6   : > { %8518 = vst [vmem:[#allocation126_spill] sm:$0xff] %v5925_v42  ;;  %v5929_v61 = vpop.eup %4298  ;;  %4310 = vpow2.f32 %v2286_v43  ;;  %v5956_v43 = vmul.f32 1.442695, %v2019_v4  ;;  %v2751_v3 = vmul.f32 %v5901_v20, %v2750_v32  ;;  %v2759_v32 = vand.u32 2147483648, %v5873_v62 }
 0x8a7   : > { %8519 = vst [vmem:[#allocation127_spill] sm:$0xff] %v5929_v61  ;;  %v5941_v35 = vpop.eup %4300  ;;  %v2444_v10 = vadd.f32 %v5929_v61, %v5925_v42  ;;  %4312 = vrcp.f32 %v5726_v24  ;;  %v2290_v34 = vmul.f32 1.442695, %v2069_v30  ;;  %vm2758_vm8 = vcmp.eq.f32.partialorder %v2757_v36, 8.507059e+37 }
 0x8a8   : > { %v5947_v31 = vpop.eup %4302  ;;  %4314 = vrcp.f32 %v5738_v53  ;;  %1968 = vmax.xlane.f32.xlu2 %v1967_v37  ;;  %v5966_v42 = vmul.f32 %v5941_v35, %v5768_v33  ;;  %v2752_v58 = vadd.f32 %v5901_v20, %v2751_v3  ;;  %v6017_v3 = vpop.f32.mrf.mxu3  ;;  %vm2725_vm12 = vweird.f32 %v5909_v17 }
 0x8a9   : > { %v5954_v57 = vpop.eup %4304  ;;  %2445 = vadd.xlane.f32.xlu1 %v2444_v10  ;;  %v5970_v49 = vpop.xlane.xlu1 %2400  ;;  %v5976_v10 = vmul.f32 %v5947_v31, %v5844_v16  ;;  %vm2712_vm1 = vweird.f32 %v5947_v31 }
 0x8aa   : > { %v4307_v6 = vpop.eup %4306  ;;  %v2721_v12 = vmul.f32 %v5954_v57, %v5909_v17  ;;  %2451 = vadd.xlane.f32.xlu0 %v2450_v26  ;;  %4316 = vrcp.f32 %v5970_v49  ;;  %v2771_v26 = vand.u32 2147483647, %v5911_v28  ;;  %vm2726_vm10 = vweird.f32 %v5954_v57 }
 0x8ab   : > { %v5972_v37 = vpop.eup %4308  ;;  %v2763_v61 = vmul.f32 %v4307_v6, %v5911_v28  ;;  %v1879_v23 = vpop.xlane.xlu2 %1878  ;;  %vm2768_vm2 = vweird.f32 %v4307_v6  ;;  %vm2739_vm11 = vweird.f32 %v5970_v49  ;;  %vm6052_vm0 = vmor %vm2725_vm12, %vm2726_vm10  ;;  %vm2683_vm10 = vweird.f32 %v5814_v39 }
 0x8ac   : > { %8521 = vst [vmem:[#allocation129_spill] sm:$0xff] %v5972_v37  ;;  %v5982_v4 = vpop.eup %4310  ;;  %v2038_v8 = vsub.f32 %v5620_v51, %v1879_v23  ;;  %v2039_v1 = vsub.f32 %v5576_v46, %v1879_v23  ;;  %v2722_v51 = vsub.f32 1.0, %v2721_v12  ;;  %v2288_v23 = vmul.f32 1.442695, %v2068_v29  ;;  %vm2769_vm6 = vmor %vm2767_vm4, %vm2768_vm2 }
 0x8ad   : > { %8522 = vst [vmem:[#allocation130_spill] sm:$0xff] %v5982_v4  ;;  %v2764_v2 = vsub.f32 1.0, %v2763_v61  ;;  %v5993_v56 = vpop.eup %4312  ;;  %v2495_v13 = vadd.f32 %v5982_v4, %v5972_v37  ;;  %v2760_v12 = vor.u32 1.1754944e-38, %v2759_v32  ;;  %vm2772_vm7 = vcmp.eq.f32.partialorder %v2771_v26, 8.507059e+37  ;;  %v6026_v26 = vpop.f32.mrf.mxu0 }
 0x8ae   : > { %v2228_v21 = vmul.f32 1.442695, %v2038_v8  ;;  %v2230_v15 = vmul.f32 1.442695, %v2039_v1  ;;  %v5997_v19 = vpop.eup %4314  ;;  %v2723_v62 = vmul.f32 %v5954_v57, %v2722_v51  ;;  %v2743_v51 = vand.u32 2147483647, %v5970_v49 }
 0x8af   : > { %v2765_v46 = vmul.f32 %v4307_v6, %v2764_v2  ;;  %v2708_v2 = vsub.f32 1.0, %v5976_v10  ;;  %vm2711_vm2 = vweird.f32 %v5844_v16 }
 0x8b0   : > { %4318 = vpow2.f32 %v2228_v21  ;;  %v4317_v61 = vpop.eup %4316  ;;  %2496 = vadd.xlane.f32.xlu2 %v2495_v13  ;;  %v2774_v21 = vor.u32 1.1754944e-38, %v2773_v22  ;;  %v2745_v22 = vand.u32 2147483648, %v5970_v49  ;;  %vm2744_vm14 = vcmp.eq.f32.partialorder %v2743_v51, 8.507059e+37  ;;  %vm6079_vm4 = vmor %vm2711_vm2, %vm2712_vm1 }
 0x8b1   : > { %v2766_v8 = vadd.f32 %v4307_v6, %v2765_v46  ;;  %4320 = vpow2.f32 %v2230_v15  ;;  %2376 = vadd.xlane.f32.xlu1 %v2375_v38  ;;  %v2735_v30 = vmul.f32 %v4317_v61, %v5970_v49  ;;  %v2756_v38 = vsel %vm6006_vm5, %v5901_v20, %v2752_v58 }
 0x8b2   : > { %2421 = vadd.xlane.f32.xlu0 %v2420_v55  ;;  %4322 = vpow2.f32 %v2288_v23  ;;  %v2761_v58 = vsel %vm2758_vm8, %v2760_v12, %v2756_v38  ;;  %vm2740_vm9 = vweird.f32 %v4317_v61  ;;  %v2709_v13 = vmul.f32 %v5947_v31, %v2708_v2 }
 0x8b3   : > { %v2770_v15 = vsel %vm2769_vm6, %v4307_v6, %v2766_v8  ;;  %v2736_v28 = vsub.f32 1.0, %v2735_v30  ;;  %v6019_v29 = vpop.xlane.xlu2 %1926  ;;  %4324 = vpow2.f32 %v2290_v34  ;;  %v1970_v34 = vmax.f32 %v6017_v3, %v6026_v26  ;;  %vm2741_vm13 = vmor %vm2739_vm11, %vm2740_vm9 }
 0x8b4   : > { %v2775_v10 = vsel %vm2772_vm7, %v2774_v21, %v2770_v15  ;;  %v2746_v8 = vor.u32 1.1754944e-38, %v2745_v22  ;;  %v3476_v1 = vmul.f32 %v5612_v41, %v2761_v58  ;;  %v2729_v2 = vand.u32 2147483647, %v5909_v17 }
 0x8b5   : > { %v3478_v32 = vmul.f32 %v5636_v52, %v2775_v10  ;;  %v3479_v55 = vmul.f32 %v5642_v0, %v2775_v10  ;;  %v2737_v20 = vmul.f32 %v4317_v61, %v2736_v28  ;;  %v2724_v0 = vadd.f32 %v5954_v57, %v2723_v62 }
 0x8b6   : > { %v6024_v6 = vpop.eup %4318  ;;  %v2731_v52 = vand.u32 2147483648, %v5909_v17  ;;  %v8526_v21 = vsub.f32 1.0, %v5939_v18  ;;  %v3477_v30 = vmul.f32 %v5616_v25, %v2761_v58  ;;  %v2710_v38 = vadd.f32 %v5947_v31, %v2709_v13 }
 0x8b7   : > { %v6029_v46 = vpop.eup %4320  ;;  %3576 = vmatpush.xpose.msra.mxu1 %v3478_v32  ;;  %3596 = vmatpush.xpose.msrb.mxu2 %v3479_v55  ;;  %v2738_v36 = vadd.f32 %v4317_v61, %v2737_v20  ;;  %v2728_v18 = vsel %vm6052_vm0, %v5954_v57, %v2724_v0  ;;  %v2717_v25 = vand.u32 2147483648, %v5844_v16  ;;  %4326 = vpow2.f32 %v5949_v47 }
 0x8b8   : > { %v2453_v23 = vadd.f32 %v6029_v46, %v6024_v6  ;;  %1971 = vmax.xlane.f32.xlu2 %v1970_v34  ;;  %v6044_v12 = vpop.eup %4322  ;;  %v2695_v49 = vmul.f32 %v5904_v27, %v8526_v21  ;;  %vm2730_vm3 = vcmp.eq.f32.partialorder %v2729_v2, 8.507059e+37  ;;  %v2715_v22 = vand.u32 2147483647, %v5844_v16  ;;  %v8537_v2 = vld [vmem:[#allocation48_spill] sm:$0xff] }
 0x8b9   : > { %8525 = vst [vmem:[#allocation131_spill] sm:$0xff] %v6044_v12  ;;  %v2742_v62 = vsel %vm2741_vm13, %v4317_v61, %v2738_v36  ;;  %v6056_v41 = vpop.eup %4324  ;;  %v2732_v61 = vor.u32 1.1754944e-38, %v2731_v52  ;;  %v2651_v57 = vmul.f32 %v5997_v19, %v5738_v53  ;;  %v8530_v32 = vsub.f32 1.0, %v5935_v50  ;;  %v8533_v52 = vld [vmem:[#allocation65_spill] sm:$0xff] }
 0x8ba   : > { %8529 = vst [vmem:[#allocation132_spill] sm:$0xff] %v6056_v41  ;;  %2454 = vadd.xlane.f32.xlu0 %v2453_v23  ;;  %v2747_v17 = vsel %vm2744_vm14, %v2746_v8, %v2742_v62  ;;  %v2666_v20 = vsub.f32 1.0, %v5966_v42  ;;  %v2498_v47 = vadd.f32 %v6056_v41, %v6044_v12  ;;  %v2714_v16 = vsel %vm6079_vm4, %v5947_v31, %v2710_v38 }
 0x8bb   : > { %3577 = vmatpush.xpose.msra.mxu1 %v3476_v1  ;;  %3597 = vmatpush.xpose.msrb.mxu2 %v3477_v30  ;;  %v3474_v28 = vmul.f32 %v5654_v59, %v2747_v17  ;;  %v3475_v10 = vmul.f32 %v5658_v63, %v2747_v17  ;;  %v2681_v55 = vmul.f32 %v5897_v45, %v8530_v32  ;;  %v6075_v58 = vpop.xlane.xlu2 %1935  ;;  %vm2698_vm5 = vweird.f32 %v5904_v27  ;;  %v6115_v17 = vpop.f32.mrf.mxu3 }
 0x8bc   : > { %v2733_v59 = vsel %vm2730_vm3, %v2732_v61, %v2728_v18  ;;  %v2696_v50 = vadd.f32 %v5904_v27, %v2695_v49  ;;  %4328 = vpow2.f32 %v5956_v43  ;;  %v2703_v42 = vand.u32 2147483648, %v5788_v48  ;;  %v8538_v49 = vld [vmem:[#allocation51_spill] sm:$0xff]  ;;  %v8539_v18 = vld [vmem:[#allocation60_spill] sm:$0xff]  ;;  %v6122_v61 = vpop.f32.mrf.mxu0 }
 0x8bd   : > { %v2718_v51 = vor.u32 1.1754944e-38, %v2717_v25  ;;  %vm2697_vm6 = vweird.f32 %v5788_v48  ;;  %v3472_v13 = vmul.f32 %v5630_v9, %v2733_v59  ;;  %vm2716_vm7 = vcmp.eq.f32.partialorder %v2715_v22, 8.507059e+37  ;;  %v6102_v8 = vpop.eup %4326 }
 0x8be   : > { %v2701_v34 = vand.u32 2147483647, %v5788_v48  ;;  %v2637_v31 = vmul.f32 %v5993_v56, %v5726_v24  ;;  %v2652_v0 = vsub.f32 1.0, %v2651_v57  ;;  %v3473_v23 = vmul.f32 %v8533_v52, %v2733_v59  ;;  %vm6098_vm8 = vmor %vm2697_vm6, %vm2698_vm5  ;;  %8536 = vst [vmem:[#allocation65_spill] sm:$0xff] %v6102_v8 }
 0x8bf   : > { %3578 = vmatpush.xpose.msra.mxu1 %v3474_v28  ;;  %3598 = vmatpush.xpose.msrb.mxu2 %v3475_v10  ;;  %v2719_v36 = vsel %vm2716_vm7, %v2718_v51, %v2714_v16  ;;  %v2667_v1 = vmul.f32 %v5941_v35, %v2666_v20  ;;  %v2700_v9 = vsel %vm6098_vm8, %v5904_v27, %v2696_v50  ;;  %vm2684_vm9 = vweird.f32 %v5897_v45  ;;  %v8541_v10 = vld [vmem:[#allocation61_spill] sm:$0xff]  ;;  %v8544_v50 = vld [vmem:[#allocation58_spill] sm:$0xff] }
 0x8c0   : > { %2499 = vadd.xlane.f32.xlu2 %v2498_v47  ;;  %v2682_v48 = vadd.f32 %v5897_v45, %v2681_v55  ;;  %v2054_v21 = vsub.f32 %v8537_v2, %v5740_v40  ;;  %v2055_v30 = vsub.f32 %v8538_v49, %v5740_v40  ;;  %v2689_v62 = vand.u32 2147483648, %v5814_v39  ;;  %vm6128_vm12 = vmor %vm2683_vm10, %vm2684_vm9  ;;  %v8549_v2 = vld [vmem:[#allocation54_spill] sm:$0xff] }
 0x8c1   : > { %v2704_v15 = vor.u32 1.1754944e-38, %v2703_v42  ;;  %v3470_v27 = vmul.f32 %v8539_v18, %v2719_v36  ;;  %vm2702_vm11 = vcmp.eq.f32.partialorder %v2701_v34, 8.507059e+37  ;;  %v2687_v38 = vand.u32 2147483647, %v5814_v39 }
 0x8c2   : > { %v6120_v25 = vpop.eup %4328  ;;  %v2638_v28 = vsub.f32 1.0, %v2637_v31  ;;  %v2653_v40 = vmul.f32 %v5997_v19, %v2652_v0  ;;  %v3471_v22 = vmul.f32 %v8541_v10, %v2719_v36  ;;  %v1973_v55 = vmax.f32 %v6115_v17, %v6122_v61  ;;  %v6196_v0 = vpop.xlane.xlu0 %1929 }
 0x8c3   : > { %3579 = vmatpush.xpose.msra.mxu1 %v3472_v13  ;;  %3599 = vmatpush.xpose.msrb.mxu2 %v3473_v23  ;;  %8540 = vst [vmem:[#allocation48_spill] sm:$0xff] %v6120_v25  ;;  %v2705_v57 = vsel %vm2702_vm11, %v2704_v15, %v2700_v9  ;;  %v2686_v39 = vsel %vm6128_vm12, %v5897_v45, %v2682_v48  ;;  %vm2670_vm13 = vweird.f32 %v5941_v35  ;;  %v2260_v59 = vmul.f32 1.442695, %v2054_v21  ;;  %v6140_v16 = vpop.xlane.xlu2 %1938  ;;  %v8545_v13 = vld [vmem:[#allocation59_spill] sm:$0xff] }
 0x8c4   : > { %v2668_v20 = vadd.f32 %v5941_v35, %v2667_v1  ;;  %v2690_v63 = vor.u32 1.1754944e-38, %v2689_v62  ;;  %v2675_v47 = vand.u32 2147483648, %v5768_v33  ;;  %vm2669_vm14 = vweird.f32 %v5768_v33  ;;  %v8548_v9 = vld [vmem:[#allocation71_spill] sm:$0xff]  ;;  %8560 = vst [vmem:[#allocation61_spill] sm:$0xff] %v6196_v0 }
 0x8c5   : > { %v3468_v42 = vmul.f32 %v8544_v50, %v2705_v57  ;;  %vm2688_vm0 = vcmp.eq.f32.partialorder %v2687_v38, 8.507059e+37  ;;  %v2673_v51 = vand.u32 2147483647, %v5768_v33  ;;  %v2262_v45 = vmul.f32 1.442695, %v2055_v30  ;;  %vm6146_vm1 = vmor %vm2669_vm14, %vm2670_vm13  ;;  %v8551_v30 = vld [vmem:[#allocation55_spill] sm:$0xff] }
 0x8c6   : > { %v3469_v34 = vmul.f32 %v8545_v13, %v2705_v57  ;;  %v2691_v31 = vsel %vm2688_vm0, %v2690_v63, %v2686_v39  ;;  %v2639_v52 = vmul.f32 %v5993_v56, %v2638_v28  ;;  %v2672_v23 = vsel %vm6146_vm1, %v5941_v35, %v2668_v20  ;;  %v8550_v35 = vld [vmem:[#allocation73_spill] sm:$0xff] }
 0x8c7   : > { %3580 = vmatpush.xpose.msra.mxu1 %v3470_v27  ;;  %3600 = vmatpush.xpose.msrb.mxu2 %v3471_v22  ;;  %v2654_v36 = vadd.f32 %v5997_v19, %v2653_v40  ;;  %vm2656_vm2 = vweird.f32 %v5997_v19  ;;  %vm2655_vm3 = vweird.f32 %v5738_v53  ;;  %v2661_v33 = vand.u32 2147483648, %v5738_v53  ;;  %v8554_v22 = vld [vmem:[#allocation56_spill] sm:$0xff]  ;;  %v8555_v39 = vld [vmem:[#allocation57_spill] sm:$0xff] }
 0x8c8   : > { %1974 = vmax.xlane.f32.xlu2 %v1973_v55  ;;  %v2676_v43 = vor.u32 1.1754944e-38, %v2675_v47  ;;  %v2659_v1 = vand.u32 2147483647, %v5738_v53  ;;  %4330 = vpow2.f32 %v2260_v59  ;;  %v2070_v48 = vsub.f32 %v8548_v9, %v6019_v29  ;;  %vm6165_vm5 = vmor %vm2655_vm3, %vm2656_vm2 }
 0x8c9   : > { %v3466_v21 = vmul.f32 %v8549_v2, %v2691_v31  ;;  %vm2674_vm4 = vcmp.eq.f32.partialorder %v2673_v51, 8.507059e+37  ;;  %4332 = vpow2.f32 %v2262_v45  ;;  %v2071_v49 = vsub.f32 %v8550_v35, %v6019_v29  ;;  %v6178_v10 = vpop.xlane.xlu1 %1944  ;;  %v8559_v45 = vld [vmem:[#allocation53_spill] sm:$0xff] }
 0x8ca   : > { %v3467_v62 = vmul.f32 %v8551_v30, %v2691_v31  ;;  %v2677_v15 = vsel %vm2674_vm4, %v2676_v43, %v2672_v23  ;;  %v2423_v53 = vadd.f32 %v6120_v25, %v6102_v8  ;;  %v2658_v27 = vsel %vm6165_vm5, %v5997_v19, %v2654_v36  ;;  %v8562_v36 = vld [vmem:[#allocation50_spill] sm:$0xff]  ;;  %v6210_v30 = vpop.xlane.xlu0 %1932 }
 0x8cb   : > { %3581 = vmatpush.xpose.msra.mxu1 %v3468_v42  ;;  %3601 = vmatpush.xpose.msrb.mxu2 %v3469_v34  ;;  %v2640_v38 = vadd.f32 %v5993_v56, %v2639_v52  ;;  %vm2642_vm6 = vweird.f32 %v5993_v56  ;;  %vm2641_vm7 = vweird.f32 %v5726_v24  ;;  %v2647_v29 = vand.u32 2147483648, %v5726_v24  ;;  %v6182_v55 = vpop.xlane.xlu2 %1941 }
 0x8cc   : > { %v2662_v28 = vor.u32 1.1754944e-38, %v2661_v33  ;;  %v2292_v40 = vmul.f32 1.442695, %v2070_v48  ;;  %v3464_v57 = vmul.f32 %v8554_v22, %v2677_v15  ;;  %vm2660_vm8 = vcmp.eq.f32.partialorder %v2659_v1, 8.507059e+37  ;;  %vm2643_vm9 = vmor %vm2641_vm7, %vm2642_vm6 }
 0x8cd   : > { %v2645_v32 = vand.u32 2147483647, %v5726_v24  ;;  %v2294_v19 = vmul.f32 1.442695, %v2071_v49  ;;  %v3465_v20 = vmul.f32 %v8555_v39, %v2677_v15  ;;  %v2644_v47 = vsel %vm2643_vm9, %v5993_v56, %v2640_v38  ;;  %v8558_v24 = vld [vmem:[#allocation52_spill] sm:$0xff]  ;;  %v8561_v56 = vld [vmem:[#allocation49_spill] sm:$0xff] }
 0x8ce   : > { %v2663_v59 = vsel %vm2660_vm8, %v2662_v28, %v2658_v27  ;;  %v6187_v63 = vpop.eup %4330  ;;  %v2648_v42 = vor.u32 1.1754944e-38, %v2647_v29  ;;  %4334 = vpow2.f32 %v2292_v40 }
 0x8cf   : > { %3582 = vmatpush.xpose.msra.mxu1 %v3466_v21  ;;  %3602 = vmatpush.xpose.msrb.mxu2 %v3467_v62  ;;  %8556 = vst [vmem:[#allocation51_spill] sm:$0xff] %v6187_v63  ;;  %v6190_v50 = vpop.eup %4332  ;;  %v3462_v51 = vmul.f32 %v8558_v24, %v2663_v59  ;;  %vm2646_vm10 = vcmp.eq.f32.partialorder %v2645_v32, 8.507059e+37  ;;  %4336 = vpow2.f32 %v2294_v19  ;;  %v3463_v13 = vmul.f32 %v8559_v45, %v2663_v59 }
 0x8d0   : > { %2424 = vadd.xlane.f32.xlu2 %v2423_v53  ;;  %8557 = vst [vmem:[#allocation60_spill] sm:$0xff] %v6190_v50  ;;  %v2649_v34 = vsel %vm2646_vm10, %v2648_v42, %v2644_v47  ;;  %v2477_v31 = vadd.f32 %v6190_v50, %v6187_v63  ;;  %v8570_v47 = vld [vmem:[#allocation36_spill] sm:$0xff]  ;;  %v8571_v42 = vld [vmem:[#allocation11_spill] sm:$0xff] }
 0x8d1   : > { %v3460_v52 = vmul.f32 %v8561_v56, %v2649_v34  ;;  %v3461_v33 = vmul.f32 %v8562_v36, %v2649_v34  ;;  %v1976_v24 = vsub.f32 %v8571_v42, %v8570_v47 }
 0x8d2   : > { %v6220_v29 = vpop.xlane.xlu0 %1947 }
 0x8d3   : > { %3583 = vmatpush.xpose.msra.mxu1 %v3464_v57  ;;  %3603 = vmatpush.xpose.msrb.mxu2 %v3465_v20 }
 0x8d4   : > { %v6200_v43 = vpop.eup %4334  ;;  %v6202_v1 = vpop.xlane.xlu1 %2427 }
 0x8d5   : > { %8563 = vst [vmem:[#allocation58_spill] sm:$0xff] %v6200_v43  ;;  %v6206_v2 = vpop.eup %4336 }
 0x8d6   : > { %8564 = vst [vmem:[#allocation59_spill] sm:$0xff] %v6206_v2  ;;  %v2501_v49 = vadd.f32 %v6206_v2, %v6200_v43 }
 0x8d7   : > { %3584 = vmatpush.xpose.msra.mxu1 %v3462_v51  ;;  %3604 = vmatpush.xpose.msrb.mxu2 %v3463_v13  ;;  %v8573_v13 = vld [vmem:[#allocation12_spill] sm:$0xff] }
 0x8d8   : > { %2478 = vadd.xlane.f32.xlu2 %v2477_v31  ;;  %v1977_v34 = vsub.f32 %v8573_v13, %v8570_v47 }
 0x8d9   : > { %v1951_v23 = vpop.xlane.xlu2 %1950 }
 0x8da   : > { %v2086_v9 = vsub.f32 %v5745_v54, %v1951_v23  ;;  %v2087_v48 = vsub.f32 %v5742_v5, %v1951_v23 }
 0x8db   : > { %3585 = vmatpush.xpose.msra.mxu1 %v3460_v52  ;;  %3605 = vmatpush.xpose.msrb.mxu2 %v3461_v33  ;;  %v6230_v22 = vpop.xlane.xlu0 %2430  ;;  %v8576_v52 = vld [vmem:[#allocation13_spill] sm:$0xff]  ;;  %v8578_v33 = vld [vmem:[#allocation87_spill] sm:$0xff] }
 0x8dc   : > { %v2324_v21 = vmul.f32 1.442695, %v2086_v9  ;;  %v2326_v35 = vmul.f32 1.442695, %v2087_v48  ;;  %v8579_v9 = vld [vmem:[#allocation46_spill] sm:$0xff] }
 0x8dd   : > { %v2052_v48 = vsub.f32 %v8579_v9, %v8578_v33  ;;  %v8591_v9 = vld [vmem:[#allocation19_spill] sm:$0xff] }
 0x8de   : > { %4338 = vpow2.f32 %v2324_v21 }
 0x8df   : > { %4340 = vpow2.f32 %v2326_v35  ;;  %v2256_v47 = vmul.f32 1.442695, %v2052_v48 }
 0x8e0   : > { %2502 = vadd.xlane.f32.xlu2 %v2501_v49 }
 0x8e1   : > { %v1954_v62 = vpop.xlane.xlu1 %1953 }
 0x8e2   : > { %v2088_v15 = vsub.f32 %v5760_v11, %v1954_v62  ;;  %v2089_v54 = vsub.f32 %v5762_v44, %v1954_v62  ;;  %v2104_v62 = vmul.f32 1.442695, %v1976_v24  ;;  %v8586_v24 = vld [vmem:[#allocation41_spill] sm:$0xff] }
 0x8e4   : > { %v6214_v5 = vpop.eup %4338  ;;  %v2328_v53 = vmul.f32 1.442695, %v2088_v15  ;;  %v2330_v27 = vmul.f32 1.442695, %v2089_v54  ;;  %v8581_v15 = vld [vmem:[#allocation47_spill] sm:$0xff] }
 0x8e5   : > { %8565 = vst [vmem:[#allocation71_spill] sm:$0xff] %v6214_v5  ;;  %v6216_v18 = vpop.eup %4340  ;;  %v2053_v54 = vsub.f32 %v8581_v15, %v8578_v33  ;;  %v8590_v33 = vld [vmem:[#allocation44_spill] sm:$0xff] }
 0x8e6   : > { %8566 = vst [vmem:[#allocation54_spill] sm:$0xff] %v6216_v18  ;;  %v2525_v38 = vadd.f32 %v6216_v18, %v6214_v5  ;;  %4342 = vpow2.f32 %v2328_v53  ;;  %v2106_v53 = vmul.f32 1.442695, %v1977_v34  ;;  %v1984_v48 = vsub.f32 %v8591_v9, %v8590_v33 }
 0x8e7   : > { %4344 = vpow2.f32 %v2330_v27  ;;  %v2258_v34 = vmul.f32 1.442695, %v2053_v54  ;;  %v8594_v54 = vld [vmem:[#allocation20_spill] sm:$0xff] }
 0x8e8   : > { %2526 = vadd.xlane.f32.xlu0 %v2525_v38 }
 0x8e9   : > { %v6234_v59 = vpop.xlane.xlu1 %2481 }
 0x8ea   : > { %8569 = vst [vmem:[#allocation56_spill] sm:$0xff] %v6234_v59 }
 0x8eb   : > { %v6222_v28 = vpop.xlane.xlu2 %2433 }
 0x8ec   : > { %v6224_v40 = vpop.eup %4342 }
 0x8ed   : > { %8567 = vst [vmem:[#allocation73_spill] sm:$0xff] %v6224_v40  ;;  %v6226_v11 = vpop.eup %4344  ;;  %v6238_v51 = vpop.xlane.xlu0 %2484 }
 0x8ee   : > { %8568 = vst [vmem:[#allocation55_spill] sm:$0xff] %v6226_v11  ;;  %v2528_v44 = vadd.f32 %v6226_v11, %v6224_v40  ;;  %v8622_v40 = vld [vmem:[#allocation119_spill] sm:$0xff] }
 0x8ef   : > { %8572 = vst [vmem:[#allocation57_spill] sm:$0xff] %v6238_v51 }
 0x8f0   : > { %2529 = vadd.xlane.f32.xlu2 %v2528_v44 }
 0x8f3   : > { %v1957_v57 = vpop.xlane.xlu2 %1956 }
 0x8f4   : > { %v2090_v32 = vsub.f32 %v5784_v7, %v1957_v57  ;;  %v2091_v19 = vsub.f32 %v5792_v14, %v1957_v57  ;;  %v8574_v7 = vld [vmem:[#allocation102_spill] sm:$0xff]  ;;  %v8575_v14 = vld [vmem:[#allocation35_spill] sm:$0xff]  ;;  %v8583_v57 = vld [vmem:[#allocation40_spill] sm:$0xff] }
 0x8f5   : > { %v1978_v23 = vsub.f32 %v8576_v52, %v8575_v14 }
 0x8f6   : > { %v2332_v39 = vmul.f32 1.442695, %v2090_v32  ;;  %v2334_v20 = vmul.f32 1.442695, %v2091_v19  ;;  %v8584_v32 = vld [vmem:[#allocation15_spill] sm:$0xff] }
 0x8f7   : > { %v2108_v44 = vmul.f32 1.442695, %v1978_v23  ;;  %v1980_v19 = vsub.f32 %v8584_v32, %v8583_v57  ;;  %v8597_v32 = vld [vmem:[#allocation77_spill] sm:$0xff] }
 0x8f8   : > { %4346 = vpow2.f32 %v2332_v39  ;;  %v8585_v39 = vld [vmem:[#allocation16_spill] sm:$0xff] }
 0x8f9   : > { %4348 = vpow2.f32 %v2334_v20  ;;  %v1981_v20 = vsub.f32 %v8585_v39, %v8583_v57  ;;  %v2112_v23 = vmul.f32 1.442695, %v1980_v19  ;;  %v8598_v19 = vld [vmem:[#allocation29_spill] sm:$0xff] }
 0x8fa   : > { %v2010_v39 = vsub.f32 %v8598_v19, %v8597_v32 }
 0x8fb   : > { %v1960_v45 = vpop.xlane.xlu2 %1959  ;;  %v6262_v42 = vpop.xlane.xlu1 %2436 }
 0x8fc   : > { %v2092_v31 = vsub.f32 %v5800_v60, %v1960_v45  ;;  %v2093_v56 = vsub.f32 %v8574_v7, %v1960_v45  ;;  %v8582_v60 = vld [vmem:[#allocation14_spill] sm:$0xff]  ;;  %v8587_v45 = vld [vmem:[#allocation17_spill] sm:$0xff]  ;;  %v2172_v19 = vmul.f32 1.442695, %v2010_v39 }
 0x8fd   : > { %v1979_v27 = vsub.f32 %v8582_v60, %v8575_v14  ;;  %v1982_v13 = vsub.f32 %v8587_v45, %v8586_v24  ;;  %v8589_v14 = vld [vmem:[#allocation18_spill] sm:$0xff]  ;;  %v1985_v60 = vsub.f32 %v8594_v54, %v8590_v33  ;;  %v8603_v33 = vld [vmem:[#allocation107_spill] sm:$0xff] }
 0x8fe   : > { %v6246_v36 = vpop.eup %4346  ;;  %v2336_v21 = vmul.f32 1.442695, %v2092_v31  ;;  %v2338_v35 = vmul.f32 1.442695, %v2093_v56  ;;  %v1983_v52 = vsub.f32 %v8589_v14, %v8586_v24  ;;  %v8599_v24 = vld [vmem:[#allocation22_spill] sm:$0xff]  ;;  %v8601_v14 = vld [vmem:[#allocation67_spill] sm:$0xff] }
 0x8ff   : > { %8577 = vst [vmem:[#allocation52_spill] sm:$0xff] %v6246_v36  ;;  %v6250_v49 = vpop.eup %4348  ;;  %v2110_v56 = vmul.f32 1.442695, %v1979_v27  ;;  %v2116_v15 = vmul.f32 1.442695, %v1982_v13  ;;  %v2011_v45 = vsub.f32 %v8599_v24, %v8597_v32 }
 0x900   : > { %8580 = vst [vmem:[#allocation53_spill] sm:$0xff] %v6250_v49  ;;  %4350 = vpow2.f32 %v2336_v21  ;;  %v2531_v38 = vadd.f32 %v6250_v49, %v6246_v36 }
 0x901   : > { %4352 = vpow2.f32 %v2338_v35  ;;  %v2114_v35 = vmul.f32 1.442695, %v1981_v20 }
 0x902   : > { %2532 = vadd.xlane.f32.xlu1 %v2531_v38  ;;  %4354 = vpow2.f32 %v2104_v62 }
 0x903   : > { %v6266_v31 = vpop.xlane.xlu2 %2487  ;;  %v6268_v7 = vpop.xlane.xlu0 %2439  ;;  %4356 = vpow2.f32 %v2106_v53  ;;  %v2118_v53 = vmul.f32 1.442695, %v1983_v52  ;;  %v8602_v52 = vld [vmem:[#allocation28_spill] sm:$0xff] }
 0x904   : > { %8588 = vst [vmem:[#allocation49_spill] sm:$0xff] %v6266_v31  ;;  %4358 = vpow2.f32 %v2108_v44  ;;  %v2120_v44 = vmul.f32 1.442695, %v1984_v48  ;;  %v8604_v48 = vld [vmem:[#allocation108_spill] sm:$0xff] }
 0x905   : > { %4360 = vpow2.f32 %v2256_v47  ;;  %v2122_v47 = vmul.f32 1.442695, %v1985_v60 }
 0x906   : > { %v6274_v21 = vpop.eup %4350  ;;  %4362 = vpow2.f32 %v2258_v34 }
 0x907   : > { %8592 = vst [vmem:[#allocation50_spill] sm:$0xff] %v6274_v21  ;;  %v6276_v62 = vpop.eup %4352  ;;  %4364 = vpow2.f32 %v2110_v56 }
 0x908   : > { %8593 = vst [vmem:[#allocation36_spill] sm:$0xff] %v6276_v62  ;;  %v2534_v27 = vadd.f32 %v6276_v62, %v6274_v21  ;;  %v6282_v38 = vpop.eup %4354  ;;  %4366 = vpow2.f32 %v2112_v23  ;;  %v2042_v23 = vsub.f32 %v8602_v52, %v8601_v14 }
 0x909   : > { %8595 = vst [vmem:[#allocation11_spill] sm:$0xff] %v6282_v38  ;;  %v6284_v57 = vpop.eup %4356  ;;  %4368 = vpow2.f32 %v2114_v35 }
 0x90a   : > { %8596 = vst [vmem:[#allocation12_spill] sm:$0xff] %v6284_v57  ;;  %2535 = vadd.xlane.f32.xlu0 %v2534_v27  ;;  %v6288_v20 = vpop.eup %4358  ;;  %4370 = vpow2.f32 %v2116_v15  ;;  %v8606_v15 = vld [vmem:[#allocation30_spill] sm:$0xff] }
 0x90b   : > { %v1963_v13 = vpop.xlane.xlu2 %1962  ;;  %v6292_v34 = vpop.xlane.xlu1 %2442  ;;  %4372 = vpow2.f32 %v2118_v53  ;;  %v2043_v60 = vsub.f32 %v8606_v15, %v8601_v14  ;;  %v8608_v53 = vld [vmem:[#allocation83_spill] sm:$0xff]  ;;  %v2236_v14 = vmul.f32 1.442695, %v2042_v23 }
 0x90c   : > { %v6294_v56 = vpop.eup %4360  ;;  %v2094_v9 = vsub.f32 %v8603_v33, %v1963_v13  ;;  %v2095_v35 = vsub.f32 %v8604_v48, %v1963_v13  ;;  %4374 = vpow2.f32 %v2120_v44  ;;  %v2080_v24 = vsub.f32 %v8608_v53, %v6182_v55  ;;  %v8610_v33 = vld [vmem:[#allocation80_spill] sm:$0xff]  ;;  %v8613_v53 = vld [vmem:[#allocation81_spill] sm:$0xff] }
 0x90d   : > { %8600 = vst [vmem:[#allocation102_spill] sm:$0xff] %v6294_v56  ;;  %v6300_v54 = vpop.eup %4362  ;;  %v6304_v27 = vpop.xlane.xlu0 %2493  ;;  %4376 = vpow2.f32 %v2122_v47  ;;  %v2174_v13 = vmul.f32 1.442695, %v2011_v45  ;;  %v2081_v44 = vsub.f32 %v8610_v33, %v6182_v55  ;;  %v2238_v49 = vmul.f32 1.442695, %v2043_v60  ;;  %v8619_v60 = vld [vmem:[#allocation74_spill] sm:$0xff] }
 0x90e   : > { %8605 = vst [vmem:[#allocation35_spill] sm:$0xff] %v6300_v54  ;;  %v6306_v32 = vpop.eup %4364  ;;  %v2340_v62 = vmul.f32 1.442695, %v2094_v9  ;;  %v2342_v52 = vmul.f32 1.442695, %v2095_v35  ;;  %v2474_v15 = vadd.f32 %v6300_v54, %v6294_v56  ;;  %v8614_v9 = vld [vmem:[#allocation32_spill] sm:$0xff] }
 0x90f   : > { %8607 = vst [vmem:[#allocation13_spill] sm:$0xff] %v6304_v27  ;;  %v6310_v21 = vpop.eup %4366  ;;  %v2012_v35 = vsub.f32 %v8614_v9, %v8613_v53  ;;  %v2312_v47 = vmul.f32 1.442695, %v2080_v24  ;;  %v2314_v23 = vmul.f32 1.442695, %v2081_v44  ;;  %v8620_v56 = vld [vmem:[#allocation34_spill] sm:$0xff] }
 0x910   : > { %8609 = vst [vmem:[#allocation87_spill] sm:$0xff] %v6310_v21  ;;  %v6314_v48 = vpop.eup %4368  ;;  %4378 = vpow2.f32 %v2340_v62  ;;  %v8617_v62 = vld [vmem:[#allocation23_spill] sm:$0xff]  ;;  %v2046_v9 = vsub.f32 %v8620_v56, %v8619_v60 }
 0x911   : > { %8611 = vst [vmem:[#allocation46_spill] sm:$0xff] %v6314_v48  ;;  %v6318_v39 = vpop.eup %4370  ;;  %4380 = vpow2.f32 %v2342_v52  ;;  %v2013_v45 = vsub.f32 %v8617_v62, %v8613_v53  ;;  %v8621_v52 = vld [vmem:[#allocation115_spill] sm:$0xff]  ;;  %v8626_v62 = vld [vmem:[#allocation78_spill] sm:$0xff] }
 0x912   : > { %8612 = vst [vmem:[#allocation47_spill] sm:$0xff] %v6318_v39  ;;  %v6322_v36 = vpop.eup %4372  ;;  %4382 = vpow2.f32 %v2172_v19  ;;  %2475 = vadd.xlane.f32.xlu0 %v2474_v15  ;;  %v2176_v15 = vmul.f32 1.442695, %v2012_v35 }
 0x913   : > { %8615 = vst [vmem:[#allocation14_spill] sm:$0xff] %v6322_v36  ;;  %v6324_v55 = vpop.eup %4374  ;;  %4384 = vpow2.f32 %v2174_v13  ;;  %v1966_v33 = vpop.xlane.xlu2 %1965  ;;  %v8624_v13 = vld [vmem:[#allocation38_spill] sm:$0xff] }
 0x914   : > { %8616 = vst [vmem:[#allocation40_spill] sm:$0xff] %v6324_v55  ;;  %v6328_v54 = vpop.xlane.xlu1 %2490  ;;  %4386 = vpow2.f32 %v2236_v14  ;;  %v2096_v11 = vsub.f32 %v8621_v52, %v1966_v33  ;;  %v2097_v19 = vsub.f32 %v8622_v40, %v1966_v33  ;;  %v6334_v24 = vpop.eup %4376  ;;  %v2047_v18 = vsub.f32 %v8624_v13, %v8619_v60  ;;  %v8627_v14 = vld [vmem:[#allocation37_spill] sm:$0xff]  ;;  %v8629_v33 = vld [vmem:[#allocation24_spill] sm:$0xff] }
 0x915   : > { %8618 = vst [vmem:[#allocation15_spill] sm:$0xff] %v6328_v54  ;;  %4388 = vpow2.f32 %v2238_v49  ;;  %v6338_v53 = vpop.xlane.xlu0 %2448  ;;  %v2014_v5 = vsub.f32 %v8627_v14, %v8626_v62  ;;  %v2178_v40 = vmul.f32 1.442695, %v2013_v45  ;;  %v2015_v49 = vsub.f32 %v8629_v33, %v8626_v62  ;;  %v8633_v62 = vld [vmem:[#allocation84_spill] sm:$0xff] }
 0x916   : > { %8623 = vst [vmem:[#allocation16_spill] sm:$0xff] %v6334_v24  ;;  %v6340_v44 = vpop.eup %4378  ;;  %4390 = vpow2.f32 %v2312_v47  ;;  %v2344_v56 = vmul.f32 1.442695, %v2096_v11  ;;  %v2346_v50 = vmul.f32 1.442695, %v2097_v19  ;;  %v2369_v14 = vadd.f32 %v6322_v36, %v6318_v39  ;;  %v8644_v39 = vld [vmem:[#allocation43_spill] sm:$0xff] }
 0x917   : > { %8625 = vst [vmem:[#allocation41_spill] sm:$0xff] %v6340_v44  ;;  %v6344_v52 = vpop.eup %4380  ;;  %4392 = vpow2.f32 %v2314_v23  ;;  %v2244_v60 = vmul.f32 1.442695, %v2046_v9  ;;  %v2246_v11 = vmul.f32 1.442695, %v2047_v18  ;;  %v8634_v23 = vld [vmem:[#allocation39_spill] sm:$0xff]  ;;  %vm2963_vm8 = vweird.f32 %v6338_v53 }
 0x918   : > { %8628 = vst [vmem:[#allocation17_spill] sm:$0xff] %v6344_v52  ;;  %v6348_v35 = vpop.eup %4382  ;;  %4394 = vpow2.f32 %v2344_v56  ;;  %v2537_v13 = vadd.f32 %v6344_v52, %v6340_v44  ;;  %v2180_v45 = vmul.f32 1.442695, %v2014_v5  ;;  %v2048_v33 = vsub.f32 %v8634_v23, %v8633_v62  ;;  %v8636_v52 = vld [vmem:[#allocation42_spill] sm:$0xff]  ;;  %v8638_v18 = vld [vmem:[#allocation125_spill] sm:$0xff] }
 0x919   : > { %8630 = vst [vmem:[#allocation18_spill] sm:$0xff] %v6348_v35  ;;  %v6354_v47 = vpop.eup %4384  ;;  %4396 = vpow2.f32 %v2346_v50  ;;  %v2182_v56 = vmul.f32 1.442695, %v2015_v49  ;;  %v2049_v44 = vsub.f32 %v8636_v52, %v8633_v62 }
 0x91a   : > { %8631 = vst [vmem:[#allocation44_spill] sm:$0xff] %v6354_v47  ;;  %v6356_v19 = vpop.eup %4386  ;;  %4398 = vpow2.f32 %v2176_v15  ;;  %2538 = vadd.xlane.f32.xlu2 %v2537_v13  ;;  %2370 = vadd.xlane.f32.xlu0 %v2369_v14  ;;  %v8639_v15 = vld [vmem:[#allocation128_spill] sm:$0xff]  ;;  %v2248_v49 = vmul.f32 1.442695, %v2048_v33  ;;  %v8648_v33 = vld [vmem:[#allocation85_spill] sm:$0xff] }
 0x91b   : > { %8632 = vst [vmem:[#allocation19_spill] sm:$0xff] %v6356_v19  ;;  %v6360_v9 = vpop.eup %4388  ;;  %4400 = vpow2.f32 %v2178_v40  ;;  %v1969_v63 = vpop.xlane.xlu2 %1968  ;;  %v2250_v36 = vmul.f32 1.442695, %v2049_v44  ;;  %v2083_v44 = vsub.f32 %v8648_v33, %v6178_v10 }
 0x91c   : > { %8635 = vst [vmem:[#allocation20_spill] sm:$0xff] %v6360_v9  ;;  %v6364_v2 = vpop.xlane.xlu1 %2445  ;;  %v6366_v50 = vpop.eup %4390  ;;  %4402 = vpow2.f32 %v2244_v60  ;;  %v2098_v5 = vsub.f32 %v8638_v18, %v1969_v63  ;;  %v2099_v43 = vsub.f32 %v8639_v15, %v1969_v63  ;;  %v8643_v60 = vld [vmem:[#allocation82_spill] sm:$0xff] }
 0x91d   : > { %8637 = vst [vmem:[#allocation77_spill] sm:$0xff] %v6366_v50  ;;  %v6370_v23 = vpop.eup %4392  ;;  %4404 = vpow2.f32 %v2246_v11  ;;  %v6372_v13 = vpop.xlane.xlu0 %2451  ;;  %v2050_v18 = vsub.f32 %v8644_v39, %v8643_v60  ;;  %v8646_v63 = vld [vmem:[#allocation86_spill] sm:$0xff] }
 0x91e   : > { %8640 = vst [vmem:[#allocation29_spill] sm:$0xff] %v6370_v23  ;;  %v6374_v40 = vpop.eup %4394  ;;  %4406 = vpow2.f32 %v2180_v45  ;;  %v2348_v52 = vmul.f32 1.442695, %v2098_v5  ;;  %v2350_v14 = vmul.f32 1.442695, %v2099_v43  ;;  %v2082_v11 = vsub.f32 %v8646_v63, %v6178_v10 }
 0x91f   : > { %8641 = vst [vmem:[#allocation22_spill] sm:$0xff] %v6374_v40  ;;  %v6376_v62 = vpop.eup %4396  ;;  %4408 = vpow2.f32 %v2182_v56  ;;  %v2516_v45 = vadd.f32 %v6370_v23, %v6366_v50  ;;  %v2252_v5 = vmul.f32 1.442695, %v2050_v18  ;;  %v8656_v18 = vld [vmem:[#allocation45_spill] sm:$0xff]  ;;  %vm2977_vm2 = vweird.f32 %v6372_v13 }
 0x920   : > { %8642 = vst [vmem:[#allocation67_spill] sm:$0xff] %v6376_v62  ;;  %v6380_v41 = vpop.eup %4398  ;;  %4410 = vpow2.f32 %v2348_v52  ;;  %v2540_v15 = vadd.f32 %v6376_v62, %v6374_v40  ;;  %v2316_v50 = vmul.f32 1.442695, %v2082_v11 }
 0x921   : > { %8645 = vst [vmem:[#allocation28_spill] sm:$0xff] %v6380_v41  ;;  %v6388_v43 = vpop.eup %4400  ;;  %4412 = vpow2.f32 %v2350_v14  ;;  %v2318_v14 = vmul.f32 1.442695, %v2083_v44  ;;  %v2411_v44 = vadd.f32 %v6354_v47, %v6348_v35  ;;  %v8661_v35 = vld [vmem:[#allocation88_spill] sm:$0xff] }
 0x922   : > { %8647 = vst [vmem:[#allocation107_spill] sm:$0xff] %v6388_v43  ;;  %v6392_v56 = vpop.eup %4402  ;;  %4414 = vpow2.f32 %v2248_v49  ;;  %2541 = vadd.xlane.f32.xlu1 %v2540_v15  ;;  %2517 = vadd.xlane.f32.xlu0 %v2516_v45  ;;  %v2051_v45 = vsub.f32 %v8656_v18, %v8643_v60  ;;  %v6428_v60 = vadd.f32 %v6284_v57, %v6282_v38  ;;  %v8660_v38 = vld [vmem:[#allocation89_spill] sm:$0xff] }
 0x923   : > { %8649 = vst [vmem:[#allocation108_spill] sm:$0xff] %v6392_v56  ;;  %v6394_v39 = vpop.eup %4404  ;;  %4416 = vpow2.f32 %v2250_v36  ;;  %v6396_v52 = vpop.xlane.xlu2 %2496  ;;  %v2084_v47 = vsub.f32 %v8660_v38, %v6220_v29 }
 0x924   : > { %8650 = vst [vmem:[#allocation30_spill] sm:$0xff] %v6394_v39  ;;  %v6398_v63 = vpop.xlane.xlu1 %2376  ;;  %v6400_v23 = vpop.eup %4406  ;;  %4418 = vrcp.f32 %v6372_v13 }
 0x925   : > { %8651 = vst [vmem:[#allocation83_spill] sm:$0xff] %v6396_v52  ;;  %v6403_v10 = vpop.eup %4408  ;;  %4420 = vrcp.f32 %v6398_v63  ;;  %v6406_v49 = vpop.xlane.xlu0 %2421  ;;  %v2633_v38 = vand.u32 2147483648, %v6398_v63  ;;  %vm2627_vm12 = vweird.f32 %v6398_v63 }
 0x926   : > { %8652 = vst [vmem:[#allocation80_spill] sm:$0xff] %v6400_v23  ;;  %v6408_v15 = vpop.eup %4410  ;;  %4422 = vrcp.f32 %v6338_v53  ;;  %v6477_v54 = vadd.f32 %v6403_v10, %v6400_v23 }
 0x927   : > { %8653 = vst [vmem:[#allocation81_spill] sm:$0xff] %v6403_v10  ;;  %v6411_v36 = vpop.eup %4412  ;;  %4424 = vpow2.f32 %v2252_v5  ;;  %v2254_v5 = vmul.f32 1.442695, %v2051_v45 }
 0x928   : > { %8654 = vst [vmem:[#allocation32_spill] sm:$0xff] %v6408_v15  ;;  %v6415_v11 = vpop.eup %4414  ;;  %4426 = vpow2.f32 %v2316_v50  ;;  %v2543_v33 = vadd.f32 %v6411_v36, %v6408_v15 }
 0x929   : > { %8655 = vst [vmem:[#allocation23_spill] sm:$0xff] %v6411_v36  ;;  %v6421_v62 = vpop.eup %4416  ;;  %4428 = vpow2.f32 %v2318_v14  ;;  %v6433_v36 = vadd.f32 %v6334_v24, %v6324_v55  ;;  %v6437_v14 = vadd.f32 %v6360_v9, %v6356_v19  ;;  %v2085_v24 = vsub.f32 %v8661_v35, %v6220_v29 }
 0x92a   : > { %8657 = vst [vmem:[#allocation74_spill] sm:$0xff] %v6415_v11  ;;  %v6423_v40 = vpop.eup %4418  ;;  %4430 = vrcp.f32 %v6292_v34  ;;  %2544 = vadd.xlane.f32.xlu2 %v2543_v33  ;;  %2412 = vadd.xlane.f32.xlu0 %v2411_v44  ;;  %v2465_v35 = vadd.f32 %v6394_v39, %v6392_v56  ;;  %v6481_v56 = vmul.f32 1.442695, %v2084_v47 }
 0x92b   : > { %8658 = vst [vmem:[#allocation34_spill] sm:$0xff] %v6421_v62  ;;  %v4421_v50 = vpop.eup %4420  ;;  %4432 = vrcp.f32 %v6364_v2  ;;  %v1972_v18 = vpop.xlane.xlu2 %1971  ;;  %v2973_v9 = vmul.f32 %v6423_v40, %v6372_v13  ;;  %vm2978_vm0 = vweird.f32 %v6423_v40 }
 0x92c   : > { %v6439_v15 = vpop.eup %4422  ;;  %4434 = vrcp.f32 %v6262_v42  ;;  %v2623_v33 = vmul.f32 %v4421_v50, %v6398_v63  ;;  %v2100_v44 = vsub.f32 %v6017_v3, %v1972_v18  ;;  %v2101_v45 = vsub.f32 %v6026_v26, %v1972_v18  ;;  %vm6542_vm4 = vmor %vm2977_vm2, %vm2978_vm0 }
 0x92d   : > { %v6445_v57 = vpop.eup %4424  ;;  %4436 = vrcp.f32 %v6268_v7  ;;  %v6454_v19 = vpop.xlane.xlu0 %2454  ;;  %v2959_v29 = vmul.f32 %v6439_v15, %v6338_v53  ;;  %vm2628_vm11 = vweird.f32 %v4421_v50  ;;  %vm2964_vm5 = vweird.f32 %v6439_v15 }
 0x92e   : > { %8659 = vst [vmem:[#allocation115_spill] sm:$0xff] %v6445_v57  ;;  %v6456_v55 = vpop.eup %4426  ;;  %v2624_v3 = vsub.f32 1.0, %v2623_v33  ;;  %v2352_v12 = vmul.f32 1.442695, %v2100_v44  ;;  %v2354_v26 = vmul.f32 1.442695, %v2101_v45  ;;  %4438 = vrcp.f32 %v6454_v19  ;;  %vm2629_vm13 = vmor %vm2627_vm12, %vm2628_vm11 }
 0x92f   : > { %8662 = vst [vmem:[#allocation119_spill] sm:$0xff] %v6456_v55  ;;  %v6459_v18 = vpop.eup %4428  ;;  %4440 = vpow2.f32 %v2254_v5  ;;  %v2631_v33 = vand.u32 2147483647, %v6398_v63  ;;  %v2974_v45 = vsub.f32 1.0, %v2973_v9  ;;  %v6473_v5 = vadd.f32 %v6388_v43, %v6380_v41  ;;  %vm6565_vm10 = vmor %vm2963_vm8, %vm2964_vm5 }
 0x930   : > { %8663 = vst [vmem:[#allocation38_spill] sm:$0xff] %v6459_v18  ;;  %v6466_v4 = vpop.eup %4430  ;;  %v2625_v37 = vmul.f32 %v4421_v50, %v2624_v3  ;;  %4442 = vpow2.f32 %v2352_v12  ;;  %v6483_v12 = vmul.f32 1.442695, %v2085_v24  ;;  %v2960_v43 = vsub.f32 1.0, %v2959_v29 }
 0x931   : > { %v6469_v44 = vpop.eup %4432  ;;  %4444 = vpow2.f32 %v2354_v26  ;;  %v6491_v26 = vmul.f32 %v6466_v4, %v6292_v34  ;;  %v2634_v41 = vor.u32 1.1754944e-38, %v2633_v38  ;;  %vm2632_vm14 = vcmp.eq.f32.partialorder %v2631_v33, 8.507059e+37  ;;  %v8667_v33 = vld [vmem:[#allocation109_spill] sm:$0xff] }
 0x932   : > { %v6479_v39 = vpop.eup %4434  ;;  %2466 = vadd.xlane.f32.xlu0 %v2465_v35  ;;  %v2626_v3 = vadd.f32 %v4421_v50, %v2625_v37  ;;  %4446 = vrcp.f32 %v6202_v1  ;;  %v2945_v47 = vmul.f32 %v6469_v44, %v6364_v2  ;;  %v6500_v37 = vadd.f32 %v6459_v18, %v6456_v55  ;;  %v8668_v18 = vld [vmem:[#allocation114_spill] sm:$0xff] }
 0x933   : > { %v6486_v9 = vpop.eup %4436  ;;  %v6493_v10 = vpop.xlane.xlu2 %2499  ;;  %4448 = vrcp.f32 %v6230_v22  ;;  %v2975_v29 = vmul.f32 %v6423_v40, %v2974_v45  ;;  %v2997_v51 = vand.u32 2147483648, %v6454_v19  ;;  %v2995_v59 = vand.u32 2147483647, %v6454_v19 }
 0x934   : > { %8664 = vst [vmem:[#allocation78_spill] sm:$0xff] %v6493_v10  ;;  %v4439_v24 = vpop.eup %4438  ;;  %v2630_v63 = vsel %vm2629_vm13, %v4421_v50, %v2626_v3  ;;  %4450 = vrcp.f32 %v6222_v28  ;;  %v6512_v50 = vmul.f32 %v6479_v39, %v6262_v42  ;;  %v6520_v45 = vmul.f32 %v6486_v9, %v6268_v7 }
 0x935   : > { %v6502_v35 = vpop.eup %4440  ;;  %v2987_v38 = vmul.f32 %v4439_v24, %v6454_v19  ;;  %v2635_v23 = vsel %vm2632_vm14, %v2634_v41, %v2630_v63  ;;  %v2932_v41 = vsub.f32 1.0, %v6491_v26  ;;  %v2961_v63 = vmul.f32 %v6439_v15, %v2960_v43 }
 0x936   : > { %8665 = vst [vmem:[#allocation37_spill] sm:$0xff] %v6502_v35  ;;  %v6507_v10 = vpop.eup %4442  ;;  %v3458_v3 = vmul.f32 %v8667_v33, %v2635_v23  ;;  %v3459_v55 = vmul.f32 %v8668_v18, %v2635_v23  ;;  %v2946_v27 = vsub.f32 1.0, %v2945_v47  ;;  %vm2992_vm1 = vweird.f32 %v4439_v24 }
 0x937   : > { %8666 = vst [vmem:[#allocation24_spill] sm:$0xff] %v6507_v10  ;;  %v6516_v52 = vpop.eup %4444  ;;  %v2988_v31 = vsub.f32 1.0, %v2987_v38  ;;  %v2976_v26 = vadd.f32 %v6423_v40, %v2975_v29  ;;  %v2969_v43 = vand.u32 2147483648, %v6338_v53  ;;  %v2983_v47 = vand.u32 2147483648, %v6372_v13 }
 0x938   : > { %8669 = vst [vmem:[#allocation84_spill] sm:$0xff] %v6516_v52  ;;  %3586 = vmatpush.xpose.msra.mxu1 %v3458_v3  ;;  %3606 = vmatpush.xpose.msrb.mxu2 %v3459_v55  ;;  %v2546_v33 = vadd.f32 %v6516_v52, %v6507_v10  ;;  %v6528_v23 = vpop.eup %4446  ;;  %v2967_v55 = vand.u32 2147483647, %v6338_v53  ;;  %vm2991_vm3 = vweird.f32 %v6454_v19  ;;  %v2981_v52 = vand.u32 2147483647, %v6372_v13  ;;  %v8675_v53 = vld [vmem:[#allocation124_spill] sm:$0xff] }
 0x939   : > { %v2989_v18 = vmul.f32 %v4439_v24, %v2988_v31  ;;  %v6537_v38 = vpop.eup %4448  ;;  %vm2993_vm6 = vmor %vm2991_vm3, %vm2992_vm1  ;;  %v2962_v10 = vadd.f32 %v6439_v15, %v2961_v63  ;;  %v2947_v0 = vmul.f32 %v6469_v44, %v2946_v27  ;;  %vm2996_vm7 = vcmp.eq.f32.partialorder %v2995_v59, 8.507059e+37 }
 0x93a   : > { %2547 = vadd.xlane.f32.xlu2 %v2546_v33  ;;  %2361 = vadd.xlane.f32.xlu0 %v6428_v60  ;;  %v6548_v33 = vpop.eup %4450  ;;  %v2998_v60 = vor.u32 1.1754944e-38, %v2997_v51  ;;  %v2980_v13 = vsel %vm6542_vm4, %v6423_v40, %v2976_v26  ;;  %v2984_v21 = vor.u32 1.1754944e-38, %v2983_v47  ;;  %vm2982_vm9 = vcmp.eq.f32.partialorder %v2981_v52, 8.507059e+37  ;;  %v8678_v26 = vld [vmem:[#allocation121_spill] sm:$0xff]  ;;  %v8679_v47 = vld [vmem:[#allocation122_spill] sm:$0xff] }
 0x93b   : > { %v2990_v3 = vadd.f32 %v4439_v24, %v2989_v18  ;;  %v1975_v31 = vpop.xlane.xlu2 %1974  ;;  %v2918_v51 = vsub.f32 1.0, %v6520_v45  ;;  %v2933_v59 = vmul.f32 %v6466_v4, %v2932_v41  ;;  %vm2950_vm11 = vweird.f32 %v6469_v44 }
 0x93c   : > { %v2102_v18 = vsub.f32 %v6115_v17, %v1975_v31  ;;  %v2103_v19 = vsub.f32 %v6122_v61, %v1975_v31  ;;  %v2985_v27 = vsel %vm2982_vm9, %v2984_v21, %v2980_v13  ;;  %v2955_v21 = vand.u32 2147483648, %v6364_v2 }
 0x93d   : > { %v2994_v48 = vsel %vm2993_vm6, %v4439_v24, %v2990_v3  ;;  %vm2968_vm12 = vcmp.eq.f32.partialorder %v2967_v55, 8.507059e+37  ;;  %vm2949_vm13 = vweird.f32 %v6364_v2  ;;  %v3509_v52 = vmul.f32 %v8675_v53, %v2985_v27 }
 0x93e   : > { %v2356_v25 = vmul.f32 1.442695, %v2102_v18  ;;  %v2358_v8 = vmul.f32 1.442695, %v2103_v19  ;;  %v2999_v35 = vsel %vm2996_vm7, %v2998_v60, %v2994_v48  ;;  %vm6588_vm14 = vmor %vm2949_vm13, %vm2950_vm11  ;;  %vm2936_vm0 = vweird.f32 %v6466_v4  ;;  %v8693_v18 = vld [vmem:[#allocation105_spill] sm:$0xff] }
 0x93f   : > { %v3510_v17 = vmul.f32 %v6024_v6, %v2999_v35  ;;  %v3511_v61 = vmul.f32 %v6029_v46, %v2999_v35  ;;  %v2966_v6 = vsel %vm6565_vm10, %v6439_v15, %v2962_v10  ;;  %v2948_v46 = vadd.f32 %v6469_v44, %v2947_v0 }
 0x940   : > { %4452 = vpow2.f32 %v2356_v25  ;;  %v2970_v25 = vor.u32 1.1754944e-38, %v2969_v43  ;;  %v2953_v0 = vand.u32 2147483647, %v6364_v2  ;;  %v2904_v10 = vsub.f32 1.0, %v6512_v50 }
 0x941   : > { %4454 = vpow2.f32 %v2358_v8  ;;  %3616 = vmatpush.xpose.msrb.mxu3 %v3510_v17  ;;  %3636 = vmatpush.xpose.msrb.mxu0 %v3511_v61  ;;  %v8674_v8 = vld [vmem:[#allocation123_spill] sm:$0xff]  ;;  %v2952_v2 = vsel %vm6588_vm14, %v6469_v44, %v2948_v46  ;;  %v2875_v50 = vmul.f32 %v6537_v38, %v6230_v22  ;;  %vm2935_vm1 = vweird.f32 %v6292_v34 }
 0x942   : > { %4456 = vpow2.f32 %v6481_v56  ;;  %2373 = vadd.xlane.f32.xlu2 %v6433_v36  ;;  %2460 = vadd.xlane.f32.xlu0 %v6437_v14  ;;  %v3508_v48 = vmul.f32 %v8674_v8, %v2985_v27  ;;  %v2889_v56 = vmul.f32 %v6548_v33, %v6222_v28  ;;  %v2971_v15 = vsel %vm2968_vm12, %v2970_v25, %v2966_v6  ;;  %vm6618_vm3 = vmor %vm2935_vm1, %vm2936_vm0  ;;  %v8684_v27 = vld [vmem:[#allocation126_spill] sm:$0xff] }
 0x943   : > { %4458 = vpow2.f32 %v6483_v12  ;;  %v2919_v14 = vmul.f32 %v6486_v9, %v2918_v51  ;;  %v6593_v24 = vpop.xlane.xlu2 %2424  ;;  %v2934_v12 = vadd.f32 %v6466_v4, %v2933_v59  ;;  %v2941_v45 = vand.u32 2147483648, %v6292_v34 }
 0x944   : > { %v2956_v41 = vor.u32 1.1754944e-38, %v2955_v21  ;;  %v3506_v43 = vmul.f32 %v8678_v26, %v2971_v15  ;;  %v3507_v44 = vmul.f32 %v8679_v47, %v2971_v15  ;;  %vm2954_vm2 = vcmp.eq.f32.partialorder %v2953_v0, 8.507059e+37  ;;  %v8688_v15 = vld [vmem:[#allocation110_spill] sm:$0xff] }
 0x945   : > { %3617 = vmatpush.xpose.msrb.mxu3 %v3508_v48  ;;  %3637 = vmatpush.xpose.msrb.mxu0 %v3509_v52  ;;  %v2939_v55 = vand.u32 2147483647, %v6292_v34  ;;  %v2890_v31 = vsub.f32 1.0, %v2889_v56  ;;  %4460 = vrcp.f32 %v6593_v24  ;;  %v2905_v19 = vmul.f32 %v6479_v39, %v2904_v10 }
 0x946   : > { %v6600_v35 = vpop.eup %4452  ;;  %v2957_v60 = vsel %vm2954_vm2, %v2956_v41, %v2952_v2  ;;  %v2938_v34 = vsel %vm6618_vm3, %v6466_v4, %v2934_v12  ;;  %v2920_v13 = vadd.f32 %v6486_v9, %v2919_v14  ;;  %vm2922_vm4 = vweird.f32 %v6486_v9  ;;  %v8685_v4 = vld [vmem:[#allocation127_spill] sm:$0xff] }
 0x947   : > { %v6606_v63 = vpop.eup %4454  ;;  %v2861_v61 = vmul.f32 %v6528_v23, %v6202_v1  ;;  %vm2921_vm5 = vweird.f32 %v6268_v7  ;;  %v2927_v51 = vand.u32 2147483648, %v6268_v7  ;;  %v2942_v59 = vor.u32 1.1754944e-38, %v2941_v45  ;;  %v8689_v14 = vld [vmem:[#allocation111_spill] sm:$0xff] }
 0x948   : > { %v6611_v3 = vpop.eup %4456  ;;  %v2549_v29 = vadd.f32 %v6606_v63, %v6600_v35  ;;  %v3504_v40 = vmul.f32 %v8684_v27, %v2957_v60  ;;  %v3505_v6 = vmul.f32 %v8685_v4, %v2957_v60  ;;  %vm2940_vm6 = vcmp.eq.f32.partialorder %v2939_v55, 8.507059e+37  ;;  %vm6641_vm7 = vmor %vm2921_vm5, %vm2922_vm4 }
 0x949   : > { %8680 = vst [vmem:[#allocation39_spill] sm:$0xff] %v6611_v3  ;;  %3618 = vmatpush.xpose.msrb.mxu3 %v3506_v43  ;;  %3638 = vmatpush.xpose.msrb.mxu0 %v3507_v44  ;;  %v6628_v17 = vpop.eup %4458  ;;  %v2925_v46 = vand.u32 2147483647, %v6268_v7  ;;  %v2876_v25 = vsub.f32 1.0, %v2875_v50  ;;  %4462 = vrcp.f32 %v6406_v49  ;;  %v2943_v21 = vsel %vm2940_vm6, %v2942_v59, %v2938_v34  ;;  %v8694_v34 = vld [vmem:[#allocation106_spill] sm:$0xff] }
 0x94a   : > { %8683 = vst [vmem:[#allocation42_spill] sm:$0xff] %v6628_v17  ;;  %2520 = vadd.xlane.f32.xlu2 %v6500_v37  ;;  %2550 = vadd.xlane.f32.xlu1 %v2549_v29  ;;  %v6647_v37 = vadd.f32 %v6421_v62, %v6415_v11  ;;  %v2891_v48 = vmul.f32 %v6548_v33, %v2890_v31  ;;  %vm2908_vm8 = vweird.f32 %v6479_v39  ;;  %v2862_v0 = vsub.f32 1.0, %v2861_v61 }
 0x94b   : > { %v2924_v7 = vsel %vm6641_vm7, %v6486_v9, %v2920_v13  ;;  %v2906_v53 = vadd.f32 %v6479_v39, %v2905_v19  ;;  %v6655_v52 = vpop.eup %4460  ;;  %vm2907_vm9 = vweird.f32 %v6262_v42  ;;  %v2913_v56 = vand.u32 2147483648, %v6262_v42  ;;  %v8690_v9 = vld [vmem:[#allocation76_spill] sm:$0xff]  ;;  %v3740_v13 = vld [vmem:[%s8182_s8] sm:$0xff] }
 0x94c   : > { %v2928_v10 = vor.u32 1.1754944e-38, %v2927_v51  ;;  %v3502_v36 = vmul.f32 %v8688_v15, %v2943_v21  ;;  %v3503_v2 = vmul.f32 %v8689_v14, %v2943_v21  ;;  %vm2926_vm10 = vcmp.eq.f32.partialorder %v2925_v46, 8.507059e+37  ;;  %vm6667_vm11 = vmor %vm2907_vm9, %vm2908_vm8  ;;  %v8695_v51 = vld [vmem:[#allocation68_spill] sm:$0xff] }
 0x94d   : > { %3619 = vmatpush.xpose.msrb.mxu3 %v3504_v40  ;;  %3639 = vmatpush.xpose.msrb.mxu0 %v3505_v6  ;;  %v2911_v12 = vand.u32 2147483647, %v6262_v42  ;;  %v2076_v50 = vsub.f32 %v8690_v9, %v6075_v58  ;;  %v2877_v45 = vmul.f32 %v6537_v38, %v2876_v25  ;;  %v2522_v41 = vadd.f32 %v6628_v17, %v6611_v3  ;;  %v8698_v21 = vld [vmem:[#allocation100_spill] sm:$0xff] }
 0x94e   : > { %v2929_v26 = vsel %vm2926_vm10, %v2928_v10, %v2924_v7  ;;  %v2847_v47 = vmul.f32 %v6655_v52, %v6593_v24  ;;  %v2910_v42 = vsel %vm6667_vm11, %v6479_v39, %v2906_v53  ;;  %v2892_v44 = vadd.f32 %v6548_v33, %v2891_v48  ;;  %v8699_v48 = vld [vmem:[#allocation101_spill] sm:$0xff]  ;;  %v8720_v10 = vld [vmem:[#allocation26_spill] sm:$0xff]  ;;  %v8802_v17 = vld [vmem:[#allocation40_spill] sm:$0xff] }
 0x94f   : > { %vm2894_vm12 = vweird.f32 %v6548_v33  ;;  %v6678_v55 = vpop.eup %4462  ;;  %v2863_v31 = vmul.f32 %v6528_v23, %v2862_v0  ;;  %vm2893_vm13 = vweird.f32 %v6222_v28  ;;  %v2899_v29 = vand.u32 2147483648, %v6222_v28 }
 0x950   : > { %v2914_v60 = vor.u32 1.1754944e-38, %v2913_v56  ;;  %v3500_v19 = vmul.f32 %v8693_v18, %v2929_v26  ;;  %v3501_v39 = vmul.f32 %v8694_v34, %v2929_v26  ;;  %vm2912_vm14 = vcmp.eq.f32.partialorder %v2911_v12, 8.507059e+37  ;;  %vm6695_vm1 = vmor %vm2893_vm13, %vm2894_vm12  ;;  %v8702_v12 = vld [vmem:[#allocation69_spill] sm:$0xff]  ;;  %v8706_v26 = vld [vmem:[#allocation96_spill] sm:$0xff] }
 0x951   : > { %3620 = vmatpush.xpose.msrb.mxu3 %v3502_v36  ;;  %3640 = vmatpush.xpose.msrb.mxu0 %v3503_v2  ;;  %v2897_v61 = vand.u32 2147483647, %v6222_v28  ;;  %v2077_v59 = vsub.f32 %v8695_v51, %v6075_v58  ;;  %vm2879_vm0 = vweird.f32 %v6230_v22  ;;  %vm2880_vm2 = vweird.f32 %v6537_v38  ;;  %v8709_v18 = vld [vmem:[#allocation75_spill] sm:$0xff] }
 0x952   : > { %2415 = vadd.xlane.f32.xlu2 %v6473_v5  ;;  %2523 = vadd.xlane.f32.xlu1 %v2522_v41  ;;  %v2915_v27 = vsel %vm2912_vm14, %v2914_v60, %v2910_v42  ;;  %v2833_v40 = vmul.f32 %v6678_v55, %v6406_v49  ;;  %v2848_v4 = vsub.f32 1.0, %v2847_v47  ;;  %v2896_v58 = vsel %vm6695_vm1, %v6548_v33, %v2892_v44  ;;  %vm6718_vm6 = vmor %vm2879_vm0, %vm2880_vm2  ;;  %v8707_v47 = vld [vmem:[#allocation97_spill] sm:$0xff] }
 0x953   : > { %v2878_v28 = vadd.f32 %v6537_v38, %v2877_v45  ;;  %v2885_v6 = vand.u32 2147483648, %v6230_v22  ;;  %v2900_v46 = vor.u32 1.1754944e-38, %v2899_v29  ;;  %v2883_v25 = vand.u32 2147483647, %v6230_v22  ;;  %v8703_v22 = vld [vmem:[#allocation64_spill] sm:$0xff] }
 0x954   : > { %vm2866_vm3 = vweird.f32 %v6528_v23  ;;  %v3498_v8 = vmul.f32 %v8698_v21, %v2915_v27  ;;  %v3499_v7 = vmul.f32 %v8699_v48, %v2915_v27  ;;  %vm2898_vm4 = vcmp.eq.f32.partialorder %v2897_v61, 8.507059e+37  ;;  %v8711_v61 = vld [vmem:[#allocation93_spill] sm:$0xff]  ;;  %v8716_v48 = vld [vmem:[#allocation90_spill] sm:$0xff] }
 0x955   : > { %3621 = vmatpush.xpose.msrb.mxu3 %v3500_v19  ;;  %3641 = vmatpush.xpose.msrb.mxu0 %v3501_v39  ;;  %v2864_v53 = vadd.f32 %v6528_v23, %v2863_v31  ;;  %v2304_v0 = vmul.f32 1.442695, %v2076_v50  ;;  %vm2865_vm5 = vweird.f32 %v6202_v1  ;;  %v2871_v33 = vand.u32 2147483648, %v6202_v1  ;;  %v8710_v39 = vld [vmem:[#allocation92_spill] sm:$0xff] }
 0x956   : > { %3746 = vperm.xlu0 %4187, %v3740_v13   ;;  %v2901_v56 = vsel %vm2898_vm4, %v2900_v46, %v2896_v58  ;;  %v2834_v15 = vsub.f32 1.0, %v2833_v40  ;;  %v2849_v36 = vmul.f32 %v6655_v52, %v2848_v4  ;;  %v2882_v14 = vsel %vm6718_vm6, %v6537_v38, %v2878_v28  ;;  %vm6737_vm7 = vmor %vm2865_vm5, %vm2866_vm3  ;;  %v8712_v4 = vld [vmem:[#allocation37_spill] sm:$0xff] }
 0x957   : > { %v2869_v2 = vand.u32 2147483647, %v6202_v1  ;;  %v2074_v9 = vsub.f32 %v8702_v12, %v6210_v30  ;;  %v2075_v50 = vsub.f32 %v8703_v22, %v6210_v30  ;;  %v2306_v45 = vmul.f32 1.442695, %v2077_v59  ;;  %v3743_v30 = vld [vmem:[%s8182_s8 + $0x18] sm:$0xff]  ;;  %v8708_v1 = vld [vmem:[#allocation79_spill] sm:$0xff] }
 0x958   : > { %v2886_v41 = vor.u32 1.1754944e-38, %v2885_v6  ;;  %v3496_v43 = vmul.f32 %v8706_v26, %v2901_v56  ;;  %v3497_v42 = vmul.f32 %v8707_v47, %v2901_v56  ;;  %vm2884_vm8 = vcmp.eq.f32.partialorder %v2883_v25, 8.507059e+37  ;;  %v8719_v56 = vld [vmem:[#allocation70_spill] sm:$0xff]  ;;  %v8725_v22 = vld [vmem:[#allocation25_spill] sm:$0xff]  ;;  %v8728_v47 = vld [vmem:[#allocation48_spill] sm:$0xff] }
 0x959   : > { %3622 = vmatpush.xpose.msrb.mxu3 %v3498_v8  ;;  %3642 = vmatpush.xpose.msrb.mxu0 %v3499_v7  ;;  %4464 = vpow2.f32 %v2304_v0  ;;  %v2872_v44 = vor.u32 1.1754944e-38, %v2871_v33  ;;  %v2835_v29 = vmul.f32 %v6678_v55, %v2834_v15  ;;  %vm2870_vm9 = vcmp.eq.f32.partialorder %v2869_v2, 8.507059e+37  ;;  %v8723_v2 = vld [vmem:[#allocation21_spill] sm:$0xff] }
 0x95a   : > { %2469 = vadd.xlane.f32.xlu2 %v6647_v37  ;;  %2418 = vadd.xlane.f32.xlu1 %v6477_v54  ;;  %v2868_v54 = vsel %vm6737_vm7, %v6528_v23, %v2864_v53  ;;  %v2078_v37 = vsub.f32 %v8708_v1, %v6140_v16  ;;  %v2887_v31 = vsel %vm2884_vm8, %v2886_v41, %v2882_v14  ;;  %vm2852_vm10 = vweird.f32 %v6655_v52  ;;  %v8717_v53 = vld [vmem:[#allocation91_spill] sm:$0xff]  ;;  %v8727_v26 = vld [vmem:[#allocation65_spill] sm:$0xff] }
 0x95b   : > { %v2850_v60 = vadd.f32 %v6655_v52, %v2849_v36  ;;  %4466 = vpow2.f32 %v2306_v45  ;;  %v2079_v19 = vsub.f32 %v8709_v18, %v6140_v16  ;;  %v2857_v23 = vand.u32 2147483648, %v6593_v24  ;;  %v8726_v45 = vld [vmem:[#allocation27_spill] sm:$0xff] }
 0x95c   : > { %v2873_v34 = vsel %vm2870_vm9, %v2872_v44, %v2868_v54  ;;  %vm2851_vm11 = vweird.f32 %v6593_v24  ;;  %v3494_v13 = vmul.f32 %v8710_v39, %v2887_v31  ;;  %v3495_v51 = vmul.f32 %v8711_v61, %v2887_v31  ;;  %v8729_v1 = vld [vmem:[#allocation87_spill] sm:$0xff]  ;;  %v8734_v39 = vld [vmem:[#allocation120_spill] sm:$0xff] }
 0x95d   : > { %3623 = vmatpush.xpose.msrb.mxu3 %v3496_v43  ;;  %3643 = vmatpush.xpose.msrb.mxu0 %v3497_v42  ;;  %v2855_v59 = vand.u32 2147483647, %v6593_v24  ;;  %v2300_v27 = vmul.f32 1.442695, %v2074_v9  ;;  %v2302_v5 = vmul.f32 1.442695, %v2075_v50  ;;  %v2363_v40 = vadd.f32 %v6306_v32, %v6288_v20  ;;  %vm6765_vm12 = vmor %vm2851_vm11, %vm2852_vm10 }
 0x95e   : > { %3761 = vperm.xlu0 %4187, %v3743_v30   ;;  %v2471_v16 = vadd.f32 %v8712_v4, %v6445_v57  ;;  %v2308_v28 = vmul.f32 1.442695, %v2078_v37  ;;  %v2854_v6 = vsel %vm6765_vm12, %v6655_v52, %v2850_v60  ;;  %v2836_v24 = vadd.f32 %v6678_v55, %v2835_v29  ;;  %v8724_v9 = vld [vmem:[#allocation63_spill] sm:$0xff]  ;;  %v8803_v4 = vld [vmem:[#allocation16_spill] sm:$0xff] }
 0x95f   : > { %vm2838_vm13 = vweird.f32 %v6678_v55  ;;  %v6774_v46 = vpop.eup %4464  ;;  %v2310_v25 = vmul.f32 1.442695, %v2079_v19  ;;  %v2843_v21 = vand.u32 2147483648, %v6406_v49  ;;  %v2858_v8 = vor.u32 1.1754944e-38, %v2857_v23  ;;  %v8733_v23 = vld [vmem:[#allocation116_spill] sm:$0xff] }
 0x960   : > { %8715 = vst [vmem:[#allocation125_spill] sm:$0xff] %v6774_v46  ;;  %v3492_v7 = vmul.f32 %v8716_v48, %v2873_v34  ;;  %vm2837_vm14 = vweird.f32 %v6406_v49  ;;  %v3493_v0 = vmul.f32 %v8717_v53, %v2873_v34  ;;  %vm2856_vm0 = vcmp.eq.f32.partialorder %v2855_v59, 8.507059e+37  ;;  %v8737_v59 = vld [vmem:[#allocation72_spill] sm:$0xff]  ;;  %v8743_v53 = vld [vmem:[#allocation66_spill] sm:$0xff] }
 0x961   : > { %3624 = vmatpush.xpose.msrb.mxu3 %v3494_v13  ;;  %3644 = vmatpush.xpose.msrb.mxu0 %v3495_v51  ;;  %v2841_v52 = vand.u32 2147483647, %v6406_v49  ;;  %v6781_v33 = vpop.eup %4466  ;;  %v2008_v15 = vsub.f32 %v8720_v10, %v8719_v56  ;;  %4468 = vpow2.f32 %v2300_v27  ;;  %v2859_v36 = vsel %vm2856_vm0, %v2858_v8, %v2854_v6  ;;  %vm6787_vm1 = vmor %vm2837_vm14, %vm2838_vm13  ;;  %v8738_v27 = vld [vmem:[#allocation31_spill] sm:$0xff] }
 0x962   : > { %2364 = vadd.xlane.f32.xlu2 %v2363_v40  ;;  %2472 = vadd.xlane.f32.xlu1 %v2471_v16  ;;  %8718 = vst [vmem:[#allocation128_spill] sm:$0xff] %v6781_v33  ;;  %v2009_v12 = vsub.f32 %v8723_v2, %v8719_v56  ;;  %4470 = vpow2.f32 %v2302_v5  ;;  %v2840_v49 = vsel %vm6787_vm1, %v6678_v55, %v2836_v24  ;;  %v2844_v38 = vor.u32 1.1754944e-38, %v2843_v21  ;;  %v8730_v55 = vld [vmem:[#allocation46_spill] sm:$0xff]  ;;  %v8739_v40 = vld [vmem:[#allocation33_spill] sm:$0xff] }
 0x963   : > { %v2040_v50 = vsub.f32 %v8725_v22, %v8724_v9  ;;  %v2041_v41 = vsub.f32 %v8726_v45, %v8724_v9  ;;  %4472 = vpow2.f32 %v2308_v28  ;;  %v3490_v43 = vmul.f32 %v8727_v26, %v2859_v36  ;;  %v6846_v9 = vpop.xlane.xlu2 %2478  ;;  %v3742_v26 = vld [vmem:[%s8182_s8 + $0x10] sm:$0xff] }
 0x964   : > { %4474 = vpow2.f32 %v2310_v25  ;;  %v3491_v42 = vmul.f32 %v8728_v47, %v2859_v36  ;;  %vm2842_vm2 = vcmp.eq.f32.partialorder %v2841_v52, 8.507059e+37  ;;  %v2168_v30 = vmul.f32 1.442695, %v2008_v15  ;;  %v8744_v52 = vld [vmem:[#allocation62_spill] sm:$0xff]  ;;  %v8749_v47 = vld [vmem:[#allocation56_spill] sm:$0xff] }
 0x965   : > { %3625 = vmatpush.xpose.msrb.mxu3 %v3492_v7  ;;  %3645 = vmatpush.xpose.msrb.mxu0 %v3493_v0  ;;  %v2510_v54 = vadd.f32 %v6781_v33, %v6774_v46  ;;  %v2366_v37 = vadd.f32 %v8730_v55, %v8729_v1  ;;  %v2845_v44 = vsel %vm2842_vm2, %v2844_v38, %v2840_v49  ;;  %v2170_v31 = vmul.f32 1.442695, %v2009_v12  ;;  %v8742_v7 = vld [vmem:[#allocation61_spill] sm:$0xff]  ;;  %v6856_v38 = vpop.xlane.xlu0 %2526 }
 0x966   : > { %v2232_v60 = vmul.f32 1.442695, %v2040_v50  ;;  %v2234_v19 = vmul.f32 1.442695, %v2041_v41  ;;  %v3488_v34 = vmul.f32 %v8733_v23, %v2845_v44  ;;  %v3489_v13 = vmul.f32 %v8734_v39, %v2845_v44  ;;  %v8753_v44 = vld [vmem:[#allocation83_spill] sm:$0xff]  ;;  %v8755_v39 = vld [vmem:[#allocation78_spill] sm:$0xff] }
 0x967   : > { %v6806_v29 = vpop.eup %4468  ;;  %4476 = vpow2.f32 %v2168_v30  ;;  %v2044_v5 = vsub.f32 %v8738_v27, %v8737_v59  ;;  %v2045_v16 = vsub.f32 %v8739_v40, %v8737_v59  ;;  %v2072_v0 = vsub.f32 %v8743_v53, %v8742_v7  ;;  %v8750_v30 = vld [vmem:[#allocation57_spill] sm:$0xff]  ;;  %v3741_v59 = vld [vmem:[%s8182_s8 + $0x8] sm:$0xff] }
 0x968   : > { %8731 = vst [vmem:[#allocation82_spill] sm:$0xff] %v6806_v29  ;;  %v6808_v18 = vpop.eup %4470  ;;  %4478 = vpow2.f32 %v2170_v31  ;;  %v2073_v56 = vsub.f32 %v8744_v52, %v8742_v7  ;;  %v8754_v31 = vld [vmem:[#allocation15_spill] sm:$0xff]  ;;  %v3123_v52 = vand.u32 2147483648, %v8749_v47  ;;  %vm3131_vm8 = vweird.f32 %v8750_v30 }
 0x969   : > { %3626 = vmatpush.xpose.msrb.mxu3 %v3490_v43  ;;  %3646 = vmatpush.xpose.msrb.mxu0 %v3491_v42  ;;  %8732 = vst [vmem:[#allocation43_spill] sm:$0xff] %v6808_v18  ;;  %v6812_v61 = vpop.eup %4472  ;;  %4480 = vpow2.f32 %v2232_v60  ;;  %v2507_v58 = vadd.f32 %v6808_v18, %v6806_v29  ;;  %v2240_v24 = vmul.f32 1.442695, %v2044_v5  ;;  %v2242_v21 = vmul.f32 1.442695, %v2045_v16 }
 0x96a   : > { %2511 = vadd.xlane.f32.xlu2 %v2510_v54  ;;  %2367 = vadd.xlane.f32.xlu1 %v2366_v37  ;;  %8735 = vst [vmem:[#allocation86_spill] sm:$0xff] %v6812_v61  ;;  %v6814_v51 = vpop.eup %4474  ;;  %4482 = vpow2.f32 %v2234_v19  ;;  %v2296_v36 = vmul.f32 1.442695, %v2072_v0  ;;  %v2298_v14 = vmul.f32 1.442695, %v2073_v56  ;;  %v8751_v54 = vld [vmem:[#allocation13_spill] sm:$0xff]  ;;  %vm3159_vm6 = vweird.f32 %v8754_v31 }
 0x96b   : > { %8736 = vst [vmem:[#allocation85_spill] sm:$0xff] %v6814_v51  ;;  %v2513_v28 = vadd.f32 %v6814_v51, %v6812_v61  ;;  %4484 = vpow2.f32 %v2240_v24  ;;  %v6854_v41 = vpop.xlane.xlu2 %2502  ;;  %v8752_v37 = vld [vmem:[#allocation49_spill] sm:$0xff]  ;;  %vm3173_vm4 = vweird.f32 %v8751_v54  ;;  %vm3187_vm12 = vweird.f32 %v8753_v44 }
 0x96c   : > { %4486 = vpow2.f32 %v2242_v21  ;;  %vm3145_vm3 = vweird.f32 %v8752_v37  ;;  %vm3117_vm13 = vweird.f32 %v8749_v47  ;;  %vm3201_vm14 = vweird.f32 %v8755_v39 }
 0x96d   : > { %3627 = vmatpush.xpose.msrb.mxu3 %v3488_v34  ;;  %3647 = vmatpush.xpose.msrb.mxu0 %v3489_v13  ;;  %v6824_v6 = vpop.eup %4476  ;;  %4488 = vpow2.f32 %v2296_v36 }
 0x96e   : > { %v6826_v25 = vpop.eup %4478  ;;  %4490 = vpow2.f32 %v2298_v14  ;;  %v3151_v14 = vand.u32 2147483648, %v8752_v37 }
 0x96f   : > { %v6828_v8 = vpop.eup %4480  ;;  %v2408_v15 = vadd.f32 %v6826_v25, %v6824_v6  ;;  %4492 = vrcp.f32 %v8749_v47 }
 0x970   : > { %8740 = vst [vmem:[#allocation45_spill] sm:$0xff] %v6828_v8  ;;  %v6830_v48 = vpop.eup %4482  ;;  %4494 = vrcp.f32 %v8750_v30 }
 0x971   : > { %8741 = vst [vmem:[#allocation89_spill] sm:$0xff] %v6830_v48  ;;  %v2456_v10 = vadd.f32 %v6830_v48, %v6828_v8  ;;  %v6840_v2 = vpop.eup %4484  ;;  %4496 = vrcp.f32 %v8751_v54  ;;  %v6925_v48 = vor.u32 1.1754944e-38, %v3151_v14 }
 0x972   : > { %2508 = vadd.xlane.f32.xlu2 %v2507_v58  ;;  %2514 = vadd.xlane.f32.xlu1 %v2513_v28  ;;  %8745 = vst [vmem:[#allocation88_spill] sm:$0xff] %v6840_v2  ;;  %v6842_v12 = vpop.eup %4486  ;;  %4498 = vrcp.f32 %v8752_v37 }
 0x973   : > { %8746 = vst [vmem:[#allocation109_spill] sm:$0xff] %v6842_v12  ;;  %v2462_v49 = vadd.f32 %v6842_v12, %v6840_v2  ;;  %v6848_v22 = vpop.eup %4488  ;;  %v6861_v43 = vpop.xlane.xlu2 %2529  ;;  %4500 = vrcp.f32 %v8753_v44  ;;  %v3221_v2 = vand.u32 2147483648, %v6854_v41 }
 0x974   : > { %8747 = vst [vmem:[#allocation114_spill] sm:$0xff] %v6848_v22  ;;  %v6850_v50 = vpop.eup %4490  ;;  %4502 = vrcp.f32 %v8754_v31 }
 0x975   : > { %8748 = vst [vmem:[#allocation123_spill] sm:$0xff] %v6850_v50  ;;  %v2504_v45 = vadd.f32 %v6850_v50, %v6848_v22  ;;  %v6871_v60 = vpop.eup %4492  ;;  %4504 = vrcp.f32 %v8755_v39  ;;  %v6912_v50 = vor.u32 1.1754944e-38, %v3123_v52  ;;  %v3222_v11 = vor.u32 1.1754944e-38, %v3221_v2 }
 0x976   : > { %v6875_v23 = vpop.eup %4494  ;;  %v3113_v58 = vmul.f32 %v6871_v60, %v8749_v47 }
 0x977   : > { %v6877_v34 = vpop.eup %4496  ;;  %v3127_v28 = vmul.f32 %v6875_v23, %v8750_v30 }
 0x978   : > { %v6880_v13 = vpop.eup %4498  ;;  %v3169_v16 = vmul.f32 %v6877_v34, %v8751_v54  ;;  %vm3174_vm5 = vweird.f32 %v6877_v34 }
 0x979   : > { %v6885_v27 = vpop.eup %4500  ;;  %v3141_v7 = vmul.f32 %v6880_v13, %v8752_v37  ;;  %v3128_v36 = vsub.f32 1.0, %v3127_v28  ;;  %vm6956_vm10 = vmor %vm3173_vm4, %vm3174_vm5  ;;  %vm3146_vm1 = vweird.f32 %v6880_v13 }
 0x97a   : > { %2457 = vadd.xlane.f32.xlu2 %v2456_v10  ;;  %2409 = vadd.xlane.f32.xlu1 %v2408_v15  ;;  %v6889_v40 = vpop.eup %4502  ;;  %v3183_v24 = vmul.f32 %v6885_v27, %v8753_v44  ;;  %v3170_v56 = vsub.f32 1.0, %v3169_v16  ;;  %v3114_v10 = vsub.f32 1.0, %v3113_v58  ;;  %v3137_v15 = vand.u32 2147483648, %v8750_v30 }
 0x97b   : > { %v6899_v21 = vpop.eup %4504  ;;  %v3155_v53 = vmul.f32 %v6889_v40, %v8754_v31  ;;  %v3179_v58 = vand.u32 2147483648, %v8751_v54  ;;  %v3129_v29 = vmul.f32 %v6875_v23, %v3128_v36  ;;  %v3193_v36 = vand.u32 2147483648, %v8753_v44 }
 0x97c   : > { %v3171_v22 = vmul.f32 %v6877_v34, %v3170_v56  ;;  %v6916_v18 = vmul.f32 %v6871_v60, %v3114_v10  ;;  %v6918_v16 = vor.u32 1.1754944e-38, %v3137_v15  ;;  %v3165_v10 = vand.u32 2147483648, %v8754_v31  ;;  %v6933_v15 = vpop.xlane.xlu1 %2532 }
 0x97d   : > { %v6864_v42 = vpop.xlane.xlu0 %2535  ;;  %vm3188_vm9 = vweird.f32 %v6885_v27  ;;  %vm3160_vm11 = vweird.f32 %v6889_v40  ;;  %vm3202_vm2 = vweird.f32 %v6899_v21 }
 0x97e   : > { %v3172_v14 = vadd.f32 %v6877_v34, %v3171_v22  ;;  %v3205_v22 = vand.u32 2147483647, %v8755_v39  ;;  %vm6968_vm0 = vmor %vm3187_vm12, %vm3188_vm9  ;;  %vm3118_vm12 = vweird.f32 %v6871_v60 }
 0x97f   : > { %vm6986_vm4 = vmor %vm3159_vm6, %vm3160_vm11 }
 0x980   : > { %v3176_v51 = vsel %vm6956_vm10, %v6877_v34, %v3172_v14  ;;  %vm6996_vm5 = vcmp.eq.f32.partialorder %v3205_v22, 8.507059e+37  ;;  %vm7010_vm6 = vmor %vm3145_vm3, %vm3146_vm1  ;;  %v3149_v22 = vand.u32 2147483647, %v8752_v37 }
 0x981   : > { %vm7023_vm10 = vmor %vm3201_vm14, %vm3202_vm2  ;;  %vm3215_vm2 = vweird.f32 %v6854_v41 }
 0x982   : > { %2463 = vadd.xlane.f32.xlu1 %v2462_v49  ;;  %v3184_v49 = vsub.f32 1.0, %v3183_v24  ;;  %v3177_v24 = vand.u32 2147483647, %v8751_v54  ;;  %v8772_v54 = vld [vmem:[#allocation112_spill] sm:$0xff]  ;;  %vm3150_vm14 = vcmp.eq.f32.partialorder %v3149_v22, 8.507059e+37 }
 0x984   : > { %vm6943_vm7 = vcmp.eq.f32.partialorder %v3177_v24, 8.507059e+37 }
 0x985   : > { %v6887_v5 = vpop.xlane.xlu0 %2475 }
 0x986   : > { %8756 = vst [vmem:[#allocation124_spill] sm:$0xff] %v6887_v5 }
 0x98a   : > { %2505 = vadd.xlane.f32.xlu1 %v2504_v45  ;;  %v3197_v45 = vmul.f32 %v6899_v21, %v8755_v39 }
 0x98d   : > { %v6873_v19 = vpop.xlane.xlu2 %2538  ;;  %v6921_v28 = vpop.xlane.xlu0 %2370 }
 0x98e   : > { %4506 = vrcp.f32 %v6921_v28 }
 0x98f   : > { %4508 = vrcp.f32 %v6854_v41 }
 0x992   : > { %3756 = vperm.xlu2 %4189, %v3742_v26   ;;  %v3142_v26 = vsub.f32 1.0, %v3141_v7  ;;  %v3185_v7 = vmul.f32 %v6885_v27, %v3184_v49  ;;  %v3180_v49 = vor.u32 1.1754944e-38, %v3179_v58  ;;  %v3191_v58 = vand.u32 2147483647, %v8753_v44 }
 0x994   : > { %v3143_v52 = vmul.f32 %v6880_v13, %v3142_v26  ;;  %v3186_v33 = vadd.f32 %v6885_v27, %v3185_v7  ;;  %v3194_v7 = vor.u32 1.1754944e-38, %v3193_v36  ;;  %v6975_v44 = vpop.eup %4506  ;;  %vm3192_vm9 = vcmp.eq.f32.partialorder %v3191_v58, 8.507059e+37 }
 0x995   : > { %v6992_v24 = vpop.xlane.xlu1 %2541  ;;  %v3130_v58 = vadd.f32 %v6875_v23, %v3129_v29 }
 0x996   : > { %v3144_v61 = vadd.f32 %v6880_v13, %v3143_v52  ;;  %v3190_v34 = vsel %vm6968_vm0, %v6885_v27, %v3186_v33  ;;  %v6990_v52 = vpop.eup %4508  ;;  %v3181_v33 = vsel %vm6943_vm7, %v3180_v49, %v3176_v51  ;;  %vm3132_vm7 = vweird.f32 %v6875_v23  ;;  %v7033_v49 = vpop.xlane.xlu0 %2517  ;;  %vm7074_vm0 = vmor %vm3117_vm13, %vm3118_vm12 }
 0x997   : > { %v2595_v51 = vmul.f32 %v6975_v44, %v6921_v28  ;;  %v3211_v29 = vmul.f32 %v6990_v52, %v6854_v41  ;;  %8771 = vst [vmem:[#allocation121_spill] sm:$0xff] %v7033_v49  ;;  %vm7044_vm11 = vmor %vm3131_vm8, %vm3132_vm7  ;;  %vm2599_vm7 = vweird.f32 %v6921_v28 }
 0x998   : > { %v3148_v37 = vsel %vm7010_vm6, %v6880_v13, %v3144_v61  ;;  %v3116_v13 = vadd.f32 %v6871_v60, %v6916_v18  ;;  %v3121_v18 = vand.u32 2147483647, %v8749_v47 }
 0x999   : > { %v3153_v27 = vsel %vm3150_vm14, %v6925_v48, %v3148_v37 }
 0x99a   : > { %v3120_v47 = vsel %vm7074_vm0, %v6871_v60, %v3116_v13  ;;  %vm3122_vm13 = vcmp.eq.f32.partialorder %v3121_v18, 8.507059e+37  ;;  %v8794_v13 = vld [vmem:[#allocation98_spill] sm:$0xff] }
 0x99d   : > { %v6905_v0 = vpop.xlane.xlu2 %2544 }
 0x99e   : > { %v7123_v18 = vpop.xlane.xlu0 %2412 }
 0x9a3   : > { %3751 = vperm.xlu1 %4188, %v3741_v59   ;;  %v3156_v59 = vsub.f32 1.0, %v3155_v53  ;;  %v3198_v53 = vsub.f32 1.0, %v3197_v45  ;;  %v3135_v45 = vand.u32 2147483647, %v8750_v30  ;;  %v3134_v30 = vsel %vm7044_vm11, %v6875_v23, %v3130_v58  ;;  %v8786_v58 = vld [vmem:[#allocation118_spill] sm:$0xff] }
 0x9a5   : > { %v3157_v56 = vmul.f32 %v6889_v40, %v3156_v59  ;;  %v3199_v26 = vmul.f32 %v6899_v21, %v3198_v53  ;;  %v3207_v59 = vand.u32 2147483648, %v8755_v39  ;;  %v3166_v53 = vor.u32 1.1754944e-38, %v3165_v10 }
 0x9a6   : > { %vm3136_vm8 = vcmp.eq.f32.partialorder %v3135_v45, 8.507059e+37  ;;  %v8789_v45 = vld [vmem:[#allocation103_spill] sm:$0xff] }
 0x9a7   : > { %v3158_v46 = vadd.f32 %v6889_v40, %v3157_v56  ;;  %v3163_v56 = vand.u32 2147483647, %v8754_v31  ;;  %v3208_v10 = vor.u32 1.1754944e-38, %v3207_v59  ;;  %v3200_v36 = vadd.f32 %v6899_v21, %v3199_v26 }
 0x9a8   : > { %v7100_v61 = vmul.f32 %v8789_v45, %v3153_v27 }
 0x9a9   : > { %v3162_v31 = vsel %vm6986_vm4, %v6889_v40, %v3158_v46  ;;  %v3195_v40 = vsel %vm3192_vm9, %v3194_v7, %v3190_v34  ;;  %vm3164_vm3 = vcmp.eq.f32.partialorder %v3163_v56, 8.507059e+37  ;;  %v3204_v39 = vsel %vm7023_vm10, %v6899_v21, %v3200_v36  ;;  %v8776_v34 = vld [vmem:[#allocation129_spill] sm:$0xff] }
 0x9aa   : > { %v7040_v7 = vmul.f32 %v8772_v54, %v3181_v33  ;;  %v3167_v56 = vsel %vm3164_vm3, %v3166_v53, %v3162_v31  ;;  %v7052_v14 = vmul.f32 %v8776_v34, %v3195_v40  ;;  %v8778_v21 = vld [vmem:[#allocation113_spill] sm:$0xff]  ;;  %v2596_v53 = vsub.f32 1.0, %v2595_v51  ;;  %v8780_v34 = vld [vmem:[#allocation130_spill] sm:$0xff]  ;;  %8790 = vst [vmem:[#allocation105_spill] sm:$0xff] %v7100_v61 }
 0x9ab   : > { %v7055_v36 = vmul.f32 %v8778_v21, %v3181_v33  ;;  %v3209_v31 = vsel %vm6996_vm5, %v3208_v10, %v3204_v39  ;;  %v3212_v54 = vsub.f32 1.0, %v3211_v29  ;;  %v7067_v12 = vmul.f32 %v8780_v34, %v3195_v40  ;;  %v8782_v33 = vld [vmem:[#allocation117_spill] sm:$0xff]  ;;  %v8788_v29 = vld [vmem:[#allocation131_spill] sm:$0xff]  ;;  %v8791_v21 = vld [vmem:[#allocation104_spill] sm:$0xff] }
 0x9ac   : > { %8773 = vst [vmem:[#allocation122_spill] sm:$0xff] %v7040_v7  ;;  %v7070_v22 = vmul.f32 %v8782_v33, %v3167_v56  ;;  %v7085_v51 = vmul.f32 %v8786_v58, %v3167_v56  ;;  %v7088_v40 = vsel %vm3136_vm8, %v6918_v16, %v3134_v30  ;;  %v7097_v39 = vmul.f32 %v8788_v29, %v3209_v31  ;;  %v8793_v34 = vld [vmem:[#allocation132_spill] sm:$0xff] }
 0x9ad   : > { %v6935_v8 = vpop.xlane.xlu2 %2547  ;;  %8777 = vst [vmem:[#allocation126_spill] sm:$0xff] %v7052_v14  ;;  %v7103_v56 = vmul.f32 %v8791_v21, %v3153_v27  ;;  %v2597_v16 = vmul.f32 %v6975_v44, %v2596_v53  ;;  %v7107_v33 = vmul.f32 %v8793_v34, %v3209_v31  ;;  %v3213_v60 = vmul.f32 %v6990_v52, %v3212_v54 }
 0x9ae   : > { %8779 = vst [vmem:[#allocation127_spill] sm:$0xff] %v7055_v36  ;;  %v7113_v23 = vmul.f32 %v8794_v13, %v7088_v40  ;;  %v3125_v58 = vsel %vm3122_vm13, %v6912_v50, %v3120_v47  ;;  %v3219_v31 = vand.u32 2147483647, %v6854_v41  ;;  %vm2600_vm4 = vweird.f32 %v6975_v44 }
 0x9af   : > { %8781 = vst [vmem:[#allocation110_spill] sm:$0xff] %v7067_v12  ;;  %v2598_v29 = vadd.f32 %v6975_v44, %v2597_v16  ;;  %v3214_v21 = vadd.f32 %v6990_v52, %v3213_v60  ;;  %vm3216_vm9 = vweird.f32 %v6990_v52  ;;  %v2603_v13 = vand.u32 2147483647, %v6921_v28  ;;  %vm7159_vm10 = vmor %vm2599_vm7, %vm2600_vm4 }
 0x9b0   : > { %8783 = vst [vmem:[#allocation111_spill] sm:$0xff] %v7070_v22  ;;  %vm7167_vm3 = vmor %vm3215_vm2, %vm3216_vm9  ;;  %vm3220_vm14 = vcmp.eq.f32.partialorder %v3219_v31, 8.507059e+37  ;;  %vm3103_vm8 = vweird.f32 %v6846_v9  ;;  %v7205_v31 = vpop.xlane.xlu0 %2466  ;;  %v3375_v61 = vand.u32 2147483648, %v6864_v42  ;;  %v3095_v22 = vand.u32 2147483648, %v6887_v5 }
 0x9b1   : > { %8787 = vst [vmem:[#allocation76_spill] sm:$0xff] %v7085_v51  ;;  %v3218_v41 = vsel %vm7167_vm3, %v6990_v52, %v3214_v21  ;;  %vm2604_vm12 = vcmp.eq.f32.partialorder %v2603_v13, 8.507059e+37  ;;  %v8806_v52 = vld [vmem:[#allocation99_spill] sm:$0xff]  ;;  %vm2795_vm9 = vweird.f32 %v7123_v18 }
 0x9b2   : > { %8792 = vst [vmem:[#allocation106_spill] sm:$0xff] %v7103_v56  ;;  %v7193_v21 = vmul.f32 %v8806_v52, %v7088_v40 }
 0x9b3   : > { %8795 = vst [vmem:[#allocation68_spill] sm:$0xff] %v7113_v23 }
 0x9b4   : > { %8807 = vst [vmem:[#allocation69_spill] sm:$0xff] %v7193_v21 }
 0x9b5   : > { %v6994_v59 = vpop.xlane.xlu2 %2373 }
 0x9b6   : > { %4510 = vrcp.f32 %v6994_v59  ;;  %v2619_v54 = vand.u32 2147483648, %v6994_v59  ;;  %vm2613_vm5 = vweird.f32 %v6994_v59  ;;  %v2617_v47 = vand.u32 2147483647, %v6994_v59 }
 0x9b7   : > { %4512 = vrcp.f32 %v6846_v9 }
 0x9b8   : > { %4514 = vrcp.f32 %v6856_v38  ;;  %v2620_v62 = vor.u32 1.1754944e-38, %v2619_v54  ;;  %vm2618_vm11 = vcmp.eq.f32.partialorder %v2617_v47, 8.507059e+37 }
 0x9b9   : > { %4516 = vrcp.f32 %v6861_v43 }
 0x9ba   : > { %4518 = vrcp.f32 %v6933_v15 }
 0x9bb   : > { %4520 = vrcp.f32 %v6864_v42 }
 0x9bc   : > { %v7064_v46 = vpop.eup %4510  ;;  %4522 = vrcp.f32 %v6887_v5 }
 0x9bd   : > { %v2609_v48 = vmul.f32 %v7064_v46, %v6994_v59  ;;  %v7080_v10 = vpop.xlane.xlu2 %2520  ;;  %v7082_v26 = vpop.xlane.xlu1 %2550  ;;  %vm2614_vm1 = vweird.f32 %v7064_v46 }
 0x9be   : > { %v7093_v37 = vpop.eup %4512  ;;  %vm7139_vm6 = vmor %vm2613_vm5, %vm2614_vm1 }
 0x9bf   : > { %v2610_v30 = vsub.f32 1.0, %v2609_v48  ;;  %v3099_v27 = vmul.f32 %v7093_v37, %v6846_v9  ;;  %v7131_v45 = vpop.eup %4514  ;;  %vm3104_vm0 = vweird.f32 %v7093_v37 }
 0x9c0   : > { %vm7262_vm13 = vmor %vm3103_vm8, %vm3104_vm0 }
 0x9c1   : > { %v2611_v48 = vmul.f32 %v7064_v46, %v2610_v30  ;;  %v2605_v30 = vand.u32 2147483648, %v6921_v28  ;;  %v3100_v53 = vsub.f32 1.0, %v3099_v27  ;;  %v2602_v27 = vsel %vm7159_vm10, %v6975_v44, %v2598_v29 }
 0x9c2   : > { %v3333_v44 = vand.u32 2147483648, %v6856_v38 }
 0x9c3   : > { %v2612_v50 = vadd.f32 %v7064_v46, %v2611_v48  ;;  %v7153_v48 = vpop.eup %4516  ;;  %v2606_v54 = vor.u32 1.1754944e-38, %v2605_v30  ;;  %v8810_v30 = vld [vmem:[#allocation95_spill] sm:$0xff]  ;;  %v3101_v13 = vmul.f32 %v7093_v37, %v3100_v53 }
 0x9c4   : > { %v3337_v34 = vmul.f32 %v7153_v48, %v6861_v43  ;;  %v7185_v47 = vpop.eup %4518 }
 0x9c5   : > { %v7145_v59 = vpop.xlane.xlu2 %2415  ;;  %v7147_v16 = vpop.xlane.xlu1 %2523  ;;  %v2616_v60 = vsel %vm7139_vm6, %v7064_v46, %v2612_v50  ;;  %v3323_v46 = vmul.f32 %v7131_v45, %v6856_v38  ;;  %8804 = vst [vmem:[#allocation100_spill] sm:$0xff] %v7185_v47  ;;  %v3102_v56 = vadd.f32 %v7093_v37, %v3101_v13  ;;  %v3107_v13 = vand.u32 2147483647, %v6846_v9 }
 0x9c6   : > { %4524 = vrcp.f32 %v7145_v59  ;;  %v2621_v50 = vsel %vm2618_vm11, %v2620_v62, %v2616_v60  ;;  %v2607_v62 = vsel %vm2604_vm12, %v2606_v54, %v2602_v27  ;;  %v7189_v29 = vpop.eup %4520  ;;  %v7199_v60 = vmul.f32 %v8810_v30, %v3125_v58 }
 0x9c7   : > { %4526 = vrcp.f32 %v6873_v19  ;;  %v3456_v3 = vmul.f32 %v8802_v17, %v2621_v50  ;;  %v3457_v57 = vmul.f32 %v8803_v4, %v2621_v50  ;;  %8805 = vst [vmem:[#allocation101_spill] sm:$0xff] %v7189_v29  ;;  %v8808_v17 = vld [vmem:[#allocation94_spill] sm:$0xff]  ;;  %v7201_v2 = vpop.eup %4522  ;;  %v3324_v28 = vsub.f32 1.0, %v3323_v46 }
 0x9c8   : > { %4528 = vrcp.f32 %v7123_v18  ;;  %v7196_v4 = vmul.f32 %v8808_v17, %v3125_v58  ;;  %8811 = vst [vmem:[#allocation96_spill] sm:$0xff] %v7199_v60  ;;  %v3338_v40 = vsub.f32 1.0, %v3337_v34  ;;  %v3347_v27 = vand.u32 2147483648, %v6861_v43  ;;  %v8814_v58 = vld [vmem:[#allocation47_spill] sm:$0xff]  ;;  %v8815_v17 = vld [vmem:[#allocation14_spill] sm:$0xff] }
 0x9c9   : > { %3587 = vmatpush.xpose.msra.mxu1 %v3456_v3  ;;  %3607 = vmatpush.xpose.msrb.mxu2 %v3457_v57  ;;  %8812 = vst [vmem:[#allocation97_spill] sm:$0xff] %v7201_v2  ;;  %v3223_v57 = vsel %vm3220_vm14, %v3222_v11, %v3218_v41  ;;  %v3454_v52 = vmul.f32 %v8814_v58, %v2607_v62  ;;  %v8817_v46 = vand.u32 2147483648, %v6846_v9  ;;  %v3361_v34 = vand.u32 2147483648, %v6933_v15 }
 0x9ca   : > { %8809 = vst [vmem:[#allocation64_spill] sm:$0xff] %v7196_v4  ;;  %v3455_v30 = vmul.f32 %v8815_v17, %v2607_v62  ;;  %v7220_v4 = vor.u32 1.1754944e-38, %v3333_v44  ;;  %v3351_v41 = vmul.f32 %v7185_v47, %v6933_v15  ;;  %v3365_v11 = vmul.f32 %v7189_v29, %v6864_v42  ;;  %v8818_v62 = vld [vmem:[#allocation58_spill] sm:$0xff]  ;;  %v8819_v17 = vld [vmem:[#allocation59_spill] sm:$0xff] }
 0x9cb   : > { %v3110_v60 = vor.u32 1.1754944e-38, %v8817_v46  ;;  %v7229_v58 = vmul.f32 %v8818_v62, %v3223_v57  ;;  %v7232_v21 = vmul.f32 %v8819_v17, %v3223_v57  ;;  %v7237_v46 = vmul.f32 %v7131_v45, %v3324_v28 }
 0x9cc   : > { %v7207_v3 = vpop.eup %4524  ;;  %v3085_v57 = vmul.f32 %v7201_v2, %v6887_v5  ;;  %v3352_v28 = vsub.f32 1.0, %v3351_v41  ;;  %v7252_v17 = vor.u32 1.1754944e-38, %v3361_v34  ;;  %v3366_v51 = vsub.f32 1.0, %v3365_v11 }
 0x9cd   : > { %v7210_v54 = vpop.xlane.xlu2 %2469  ;;  %v7212_v50 = vpop.xlane.xlu1 %2418  ;;  %3588 = vmatpush.xpose.msra.mxu1 %v3454_v52  ;;  %3608 = vmatpush.xpose.msrb.mxu2 %v3455_v30  ;;  %v2805_v23 = vmul.f32 %v7207_v3, %v7145_v59  ;;  %v7244_v52 = vmul.f32 %v7153_v48, %v3338_v40  ;;  %v7246_v30 = vor.u32 1.1754944e-38, %v3347_v27  ;;  %v3389_v41 = vand.u32 2147483648, %v6873_v19 }
 0x9ce   : > { %8813 = vst [vmem:[#allocation79_spill] sm:$0xff] %v7210_v54  ;;  %v7216_v53 = vpop.eup %4526  ;;  %4530 = vrcp.f32 %v7212_v50  ;;  %v3106_v11 = vsel %vm7262_vm13, %v7093_v37, %v3102_v56  ;;  %v3086_v36 = vsub.f32 1.0, %v3085_v57  ;;  %v3403_v5 = vand.u32 2147483648, %v6992_v24 }
 0x9cf   : > { %8816 = vst [vmem:[#allocation75_spill] sm:$0xff] %v7216_v53  ;;  %v7234_v44 = vpop.eup %4528  ;;  %v3379_v62 = vmul.f32 %v7216_v53, %v6873_v19  ;;  %4532 = vrcp.f32 %v6992_v24  ;;  %v2806_v34 = vsub.f32 1.0, %v2805_v23  ;;  %v3291_v9 = vand.u32 2147483648, %v7033_v49 }
 0x9d0   : > { %8820 = vst [vmem:[#allocation92_spill] sm:$0xff] %v7246_v30  ;;  %v2791_v40 = vmul.f32 %v7234_v44, %v7123_v18  ;;  %4534 = vrcp.f32 %v7033_v49  ;;  %v7280_v54 = vmul.f32 %v7185_v47, %v3352_v28  ;;  %v7282_v23 = vor.u32 1.1754944e-38, %v3375_v61 }
 0x9d1   : > { %8821 = vst [vmem:[#allocation93_spill] sm:$0xff] %v7252_v17  ;;  %v3380_v7 = vsub.f32 1.0, %v3379_v62  ;;  %vm3108_vm1 = vcmp.eq.f32.partialorder %v3107_v13, 8.507059e+37  ;;  %v7286_v56 = vor.u32 1.1754944e-38, %v3095_v22  ;;  %v7288_v62 = vpop.xlane.xlu0 %2361  ;;  %v7292_v30 = vmul.f32 %v7189_v29, %v3366_v51 }
 0x9d2   : > { %8825 = vst [vmem:[#allocation91_spill] sm:$0xff] %v7280_v54  ;;  %v2792_v57 = vsub.f32 1.0, %v2791_v40  ;;  %v3111_v27 = vsel %vm3108_vm1, %v3110_v60, %v3106_v11  ;;  %v2807_v61 = vmul.f32 %v7207_v3, %v2806_v34  ;;  %v7300_v13 = vmul.f32 %v7201_v2, %v3086_v36 }
 0x9d3   : > { %8826 = vst [vmem:[#allocation70_spill] sm:$0xff] %v7282_v23  ;;  %v7303_v22 = vmul.f32 %v7216_v53, %v3380_v7  ;;  %v7305_v40 = vor.u32 1.1754944e-38, %v3403_v5  ;;  %v3331_v11 = vand.u32 2147483647, %v6856_v38  ;;  %v2829_v7 = vand.u32 2147483648, %v7212_v50  ;;  %v8835_v5 = vld [vmem:[#allocation60_spill] sm:$0xff] }
 0x9d4   : > { %v7271_v17 = vpop.eup %4530  ;;  %8827 = vst [vmem:[#allocation26_spill] sm:$0xff] %v7286_v56  ;;  %v7307_v56 = vor.u32 1.1754944e-38, %v3291_v9  ;;  %v2793_v36 = vmul.f32 %v7234_v44, %v2792_v57  ;;  %vm2810_vm2 = vweird.f32 %v7207_v3  ;;  %v7321_v9 = vmul.f32 %v8835_v5, %v3111_v27 }
 0x9d5   : > { %v7275_v12 = vpop.xlane.xlu2 %2364  ;;  %v7277_v14 = vpop.xlane.xlu1 %2472  ;;  %v2819_v37 = vmul.f32 %v7271_v17, %v7212_v50  ;;  %8828 = vst [vmem:[#allocation21_spill] sm:$0xff] %v7292_v30  ;;  %vm2824_vm4 = vweird.f32 %v7271_v17  ;;  %vm2809_vm5 = vweird.f32 %v7145_v59  ;;  %vm2823_vm6 = vweird.f32 %v7212_v50  ;;  %v8839_v30 = vld [vmem:[#allocation80_spill] sm:$0xff] }
 0x9d6   : > { %8824 = vst [vmem:[#allocation90_spill] sm:$0xff] %v7277_v14  ;;  %4536 = vrcp.f32 %v7275_v12  ;;  %v7294_v14 = vor.u32 1.1754944e-38, %v3389_v41  ;;  %v7297_v23 = vpop.eup %4532  ;;  %v8833_v41 = vld [vmem:[#allocation51_spill] sm:$0xff]  ;;  %vm7342_vm7 = vmor %vm2809_vm5, %vm2810_vm2  ;;  %vm2796_vm3 = vweird.f32 %v7234_v44  ;;  %vm3327_vm11 = vweird.f32 %v6856_v38 }
 0x9d7   : > { %v2820_v28 = vsub.f32 1.0, %v2819_v37  ;;  %8830 = vst [vmem:[#allocation25_spill] sm:$0xff] %v7300_v13  ;;  %v7309_v60 = vpop.eup %4534  ;;  %4538 = vrcp.f32 %v7288_v62  ;;  %v7314_v34 = vmul.f32 %v8833_v41, %v3111_v27  ;;  %v2808_v41 = vadd.f32 %v7207_v3, %v2807_v61  ;;  %vm2825_vm10 = vmor %vm2823_vm6, %vm2824_vm4 }
 0x9d8   : > { %8829 = vst [vmem:[#allocation63_spill] sm:$0xff] %v7294_v14  ;;  %v3393_v57 = vmul.f32 %v7297_v23, %v6992_v24  ;;  %v2815_v27 = vand.u32 2147483648, %v7145_v59  ;;  %4540 = vrcp.f32 %v6905_v0  ;;  %v2794_v14 = vadd.f32 %v7234_v44, %v2793_v36  ;;  %vm7373_vm8 = vmor %vm2795_vm9, %vm2796_vm3 }
 0x9d9   : > { %8831 = vst [vmem:[#allocation27_spill] sm:$0xff] %v7305_v40  ;;  %v2821_v51 = vmul.f32 %v7271_v17, %v2820_v28  ;;  %v2827_v28 = vand.u32 2147483647, %v7212_v50  ;;  %v2799_v29 = vand.u32 2147483647, %v7123_v18  ;;  %v8840_v40 = vld [vmem:[#allocation81_spill] sm:$0xff]  ;;  %vm3328_vm1 = vweird.f32 %v7131_v45 }
 0x9da   : > { %8832 = vst [vmem:[#allocation65_spill] sm:$0xff] %v7307_v56  ;;  %v3281_v56 = vmul.f32 %v7309_v60, %v7033_v49  ;;  %v2816_v49 = vor.u32 1.1754944e-38, %v2815_v27  ;;  %v3394_v53 = vsub.f32 1.0, %v3393_v57  ;;  %vm7382_vm0 = vcmp.eq.f32.partialorder %v3331_v11, 8.507059e+37  ;;  %vm7419_vm2 = vmor %vm3327_vm11, %vm3328_vm1 }
 0x9db   : > { %8834 = vst [vmem:[#allocation48_spill] sm:$0xff] %v7314_v34  ;;  %v2822_v37 = vadd.f32 %v7271_v17, %v2821_v51  ;;  %v2813_v51 = vand.u32 2147483647, %v7145_v59  ;;  %vm2828_vm12 = vcmp.eq.f32.partialorder %v2827_v28, 8.507059e+37  ;;  %v2812_v59 = vsel %vm7342_vm7, %v7207_v3, %v2808_v41 }
 0x9dc   : > { %8836 = vst [vmem:[#allocation87_spill] sm:$0xff] %v7321_v9  ;;  %v7327_v34 = vpop.eup %4536  ;;  %v2830_v9 = vor.u32 1.1754944e-38, %v2829_v7  ;;  %v2801_v7 = vand.u32 2147483648, %v7123_v18  ;;  %v2798_v28 = vsel %vm7373_vm8, %v7234_v44, %v2794_v14  ;;  %vm2800_vm13 = vcmp.eq.f32.partialorder %v2799_v29, 8.507059e+37  ;;  %v8846_v14 = vld [vmem:[#allocation107_spill] sm:$0xff] }
 0x9dd   : > { %v7335_v5 = vpop.xlane.xlu1 %2367  ;;  %v7352_v13 = vpop.eup %4538  ;;  %v2567_v50 = vmul.f32 %v7327_v34, %v7275_v12  ;;  %v2826_v2 = vsel %vm2825_vm10, %v7271_v17, %v2822_v37  ;;  %vm2814_vm14 = vcmp.eq.f32.partialorder %v2813_v51, 8.507059e+37  ;;  %v3417_v17 = vand.u32 2147483648, %v6905_v0 }
 0x9de   : > { %4542 = vrcp.f32 %v7335_v5  ;;  %v2831_v36 = vsel %vm2828_vm12, %v2830_v9, %v2826_v2  ;;  %v2553_v37 = vmul.f32 %v7352_v13, %v7288_v62  ;;  %v2817_v3 = vsel %vm2814_vm14, %v2816_v49, %v2812_v59  ;;  %v7377_v9 = vpop.eup %4540 }
 0x9df   : > { %4544 = vrcp.f32 %v7082_v26  ;;  %v3486_v54 = vmul.f32 %v8839_v30, %v2831_v36  ;;  %v3487_v47 = vmul.f32 %v8840_v40, %v2831_v36  ;;  %v3282_v30 = vsub.f32 1.0, %v3281_v56 }
 0x9e0   : > { %v2568_v40 = vsub.f32 1.0, %v2567_v50  ;;  %v2802_v18 = vor.u32 1.1754944e-38, %v2801_v7  ;;  %4546 = vrcp.f32 %v6935_v8  ;;  %v3485_v44 = vmul.f32 %v8846_v14, %v2817_v3 }
 0x9e1   : > { %3628 = vmatpush.xpose.msrb.mxu3 %v3486_v54  ;;  %3648 = vmatpush.xpose.msrb.mxu0 %v3487_v47  ;;  %v8845_v54 = vld [vmem:[#allocation28_spill] sm:$0xff]  ;;  %v3326_v11 = vadd.f32 %v7131_v45, %v7237_v46  ;;  %v7399_v27 = vmul.f32 %v7297_v23, %v3394_v53  ;;  %v7401_v61 = vor.u32 1.1754944e-38, %v3417_v17  ;;  %v2554_v51 = vsub.f32 1.0, %v2553_v37 }
 0x9e2   : > { %v3484_v56 = vmul.f32 %v8845_v54, %v2817_v3  ;;  %v2803_v50 = vsel %vm2800_vm13, %v2802_v18, %v2798_v28  ;;  %v7406_v59 = vmul.f32 %v7309_v60, %v3282_v30  ;;  %v2569_v7 = vmul.f32 %v7327_v34, %v2568_v40  ;;  %v8849_v30 = vld [vmem:[#allocation18_spill] sm:$0xff]  ;;  %v8850_v28 = vld [vmem:[#allocation44_spill] sm:$0xff] }
 0x9e3   : > { %v3407_v53 = vmul.f32 %v7377_v9, %v6905_v0  ;;  %4548 = vrcp.f32 %v7205_v31  ;;  %v3053_v46 = vand.u32 2147483648, %v7205_v31  ;;  %v3415_v17 = vand.u32 2147483647, %v6905_v0 }
 0x9e4   : > { %v7386_v41 = vpop.eup %4542  ;;  %v3482_v40 = vmul.f32 %v8849_v30, %v2803_v50  ;;  %v3483_v18 = vmul.f32 %v8850_v28, %v2803_v50  ;;  %v2591_v14 = vand.u32 2147483648, %v7335_v5  ;;  %vm2572_vm4 = vweird.f32 %v7327_v34 }
 0x9e5   : > { %v7389_v57 = vpop.xlane.xlu1 %2514  ;;  %v2581_v47 = vmul.f32 %v7386_v41, %v7335_v5  ;;  %v7403_v29 = vpop.eup %4544  ;;  %3629 = vmatpush.xpose.msrb.mxu3 %v3484_v56  ;;  %3649 = vmatpush.xpose.msrb.mxu0 %v3485_v44  ;;  %v2555_v56 = vmul.f32 %v7352_v13, %v2554_v51  ;;  %vm2586_vm5 = vweird.f32 %v7386_v41  ;;  %v2589_v50 = vand.u32 2147483647, %v7335_v5 }
 0x9e6   : > { %v7429_v54 = vpop.eup %4546  ;;  %v3435_v38 = vmul.f32 %v7403_v29, %v7082_v26  ;;  %vm2571_vm9 = vweird.f32 %v7275_v12  ;;  %v2577_v51 = vand.u32 2147483648, %v7275_v12  ;;  %vm2585_vm6 = vweird.f32 %v7335_v5 }
 0x9e7   : > { %v2582_v36 = vsub.f32 1.0, %v2581_v47  ;;  %v3330_v47 = vsel %vm7419_vm2, %v7131_v45, %v3326_v11  ;;  %v2570_v45 = vadd.f32 %v7327_v34, %v2569_v7  ;;  %v3408_v11 = vsub.f32 1.0, %v3407_v53  ;;  %vm7452_vm7 = vmor %vm2571_vm9, %vm2572_vm4 }
 0x9e8   : > { %v7447_v37 = vsel %vm7382_vm0, %v7220_v4, %v3330_v47  ;;  %v2575_v7 = vand.u32 2147483647, %v7275_v12  ;;  %vm2558_vm10 = vweird.f32 %v7352_v13  ;;  %v2592_v28 = vor.u32 1.1754944e-38, %v2591_v14  ;;  %vm2587_vm3 = vmor %vm2585_vm6, %vm2586_vm5 }
 0x9e9   : > { %v2583_v2 = vmul.f32 %v7386_v41, %v2582_v36  ;;  %3630 = vmatpush.xpose.msrb.mxu3 %v3482_v40  ;;  %3650 = vmatpush.xpose.msrb.mxu0 %v3483_v18  ;;  %v7458_v53 = vpop.eup %4548  ;;  %v3436_v40 = vsub.f32 1.0, %v3435_v38  ;;  %v2556_v4 = vadd.f32 %v7352_v13, %v2555_v56  ;;  %v2563_v5 = vand.u32 2147483648, %v7288_v62 }
 0x9ea   : > { %vm2590_vm11 = vcmp.eq.f32.partialorder %v2589_v50, 8.507059e+37  ;;  %v2574_v12 = vsel %vm7452_vm7, %v7327_v34, %v2570_v45  ;;  %vm2557_vm12 = vweird.f32 %v7288_v62  ;;  %v2578_v18 = vor.u32 1.1754944e-38, %v2577_v51  ;;  %v8855_v45 = vld [vmem:[#allocation71_spill] sm:$0xff] }
 0x9eb   : > { %v2584_v44 = vadd.f32 %v7386_v41, %v2583_v2  ;;  %v3421_v2 = vmul.f32 %v7429_v54, %v6935_v8  ;;  %v2561_v38 = vand.u32 2147483647, %v7288_v62  ;;  %vm3342_vm14 = vweird.f32 %v7153_v48  ;;  %vm7478_vm0 = vmor %vm2557_vm12, %vm2558_vm10 }
 0x9ec   : > { %v7472_v14 = vor.u32 1.1754944e-38, %v3053_v46  ;;  %vm2576_vm8 = vcmp.eq.f32.partialorder %v2575_v7, 8.507059e+37  ;;  %vm3341_vm13 = vweird.f32 %v6861_v43  ;;  %v3437_v62 = vmul.f32 %v7403_v29, %v3436_v40 }
 0x9ed   : > { %v7442_v36 = vpop.xlane.xlu1 %2409  ;;  %v2588_v49 = vsel %vm2587_vm3, %v7386_v41, %v2584_v44  ;;  %v3422_v34 = vsub.f32 1.0, %v3421_v2  ;;  %v2579_v44 = vsel %vm2576_vm8, %v2578_v18, %v2574_v12  ;;  %v2560_v46 = vsel %vm7478_vm0, %v7352_v13, %v2556_v4 }
 0x9ee   : > { %4550 = vrcp.f32 %v7442_v36  ;;  %v2593_v47 = vsel %vm2590_vm11, %v2592_v28, %v2588_v49  ;;  %v2564_v50 = vor.u32 1.1754944e-38, %v2563_v5  ;;  %v7494_v51 = vmul.f32 %v8855_v45, %v7447_v37  ;;  %v7511_v5 = vpop.xlane.xlu0 %2460 }
 0x9ef   : > { %v3452_v56 = vmul.f32 %v8729_v1, %v2593_v47  ;;  %v3453_v3 = vmul.f32 %v8730_v55, %v2593_v47  ;;  %v3409_v1 = vmul.f32 %v7377_v9, %v3408_v11  ;;  %v7490_v55 = vmul.f32 %v7458_v53, %v7205_v31  ;;  %v8856_v47 = vld [vmem:[#allocation11_spill] sm:$0xff] }
 0x9f0   : > { %vm3425_vm1 = vweird.f32 %v6935_v8  ;;  %vm2562_vm2 = vcmp.eq.f32.partialorder %v2561_v38, 8.507059e+37  ;;  %vm3412_vm4 = vweird.f32 %v7377_v9  ;;  %v7500_v13 = vadd.f32 %v7153_v48, %v7244_v52 }
 0x9f1   : > { %3589 = vmatpush.xpose.msra.mxu1 %v3452_v56  ;;  %3609 = vmatpush.xpose.msrb.mxu2 %v3453_v3  ;;  %vm3411_vm5 = vweird.f32 %v6905_v0  ;;  %v3450_v3 = vmul.f32 %v6288_v20, %v2579_v44  ;;  %v3451_v30 = vmul.f32 %v6306_v32, %v2579_v44  ;;  %v2565_v7 = vsel %vm2562_vm2, %v2564_v50, %v2560_v46  ;;  %vm7550_vm2 = vmor %vm3341_vm13, %vm3342_vm14 }
 0x9f2   : > { %v3423_v40 = vmul.f32 %v7429_v54, %v3422_v34  ;;  %v3431_v28 = vand.u32 2147483648, %v6935_v8  ;;  %v3438_v4 = vadd.f32 %v7403_v29, %v3437_v62  ;;  %vm3440_vm9 = vweird.f32 %v7403_v29  ;;  %v8859_v34 = vld [vmem:[#allocation12_spill] sm:$0xff] }
 0x9f3   : > { %v3044_v52 = vsub.f32 1.0, %v7490_v55  ;;  %v3445_v49 = vand.u32 2147483648, %v7082_v26  ;;  %v3429_v20 = vand.u32 2147483647, %v6935_v8  ;;  %vm3439_vm6 = vweird.f32 %v7082_v26 }
 0x9f4   : > { %v4551_v2 = vpop.eup %4550  ;;  %v3443_v32 = vand.u32 2147483647, %v7082_v26  ;;  %v2787_v18 = vand.u32 2147483648, %v7442_v36  ;;  %v3448_v38 = vmul.f32 %v8856_v47, %v2565_v7  ;;  %vm7519_vm7 = vmor %vm3439_vm6, %vm3440_vm9  ;;  %v3449_v62 = vmul.f32 %v8859_v34, %v2565_v7  ;;  %v8881_v34 = vld [vmem:[#allocation126_spill] sm:$0xff] }
 0x9f5   : > { %v2777_v11 = vmul.f32 %v4551_v2, %v7442_v36  ;;  %3590 = vmatpush.xpose.msra.mxu1 %v3450_v3  ;;  %3610 = vmatpush.xpose.msrb.mxu2 %v3451_v30  ;;  %vm2782_vm10 = vweird.f32 %v4551_v2  ;;  %v2785_v44 = vand.u32 2147483647, %v7442_v36  ;;  %vm7527_vm3 = vcmp.eq.f32.partialorder %v3415_v17, 8.507059e+37 }
 0x9f6   : > { %v8862_v26 = vand.u32 2147483647, %v6861_v43  ;;  %vm3397_vm12 = vweird.f32 %v6992_v24  ;;  %4552 = vrcp.f32 %v7511_v5  ;;  %v3442_v50 = vsel %vm7519_vm7, %v7403_v29, %v3438_v4  ;;  %v8892_v43 = vld [vmem:[#allocation73_spill] sm:$0xff] }
 0x9f7   : > { %v2778_v12 = vsub.f32 1.0, %v2777_v11  ;;  %v3424_v45 = vadd.f32 %v7429_v54, %v3423_v40  ;;  %vm3426_vm8 = vweird.f32 %v7429_v54  ;;  %v3446_v17 = vor.u32 1.1754944e-38, %v3445_v49  ;;  %v7587_v49 = vpop.xlane.xlu2 %2511 }
 0x9f8   : > { %vm7533_vm11 = vcmp.eq.f32.partialorder %v8862_v26, 8.507059e+37  ;;  %vm2781_vm0 = vweird.f32 %v7442_v36  ;;  %v3410_v3 = vadd.f32 %v7377_v9, %v3409_v1  ;;  %v3432_v29 = vor.u32 1.1754944e-38, %v3431_v28  ;;  %vm7562_vm14 = vmor %vm3425_vm1, %vm3426_vm8  ;;  %v8884_v26 = vld [vmem:[#allocation84_spill] sm:$0xff] }
 0x9f9   : > { %v2779_v41 = vmul.f32 %v4551_v2, %v2778_v12  ;;  %3591 = vmatpush.xpose.msra.mxu1 %v3448_v38  ;;  %3611 = vmatpush.xpose.msrb.mxu2 %v3449_v62  ;;  %4554 = vrcp.f32 %v7080_v10  ;;  %vm3444_vm9 = vcmp.eq.f32.partialorder %v3443_v32, 8.507059e+37  ;;  %v2788_v7 = vor.u32 1.1754944e-38, %v2787_v18  ;;  %vm2783_vm6 = vmor %vm2781_vm0, %vm2782_vm10  ;;  %v8876_v32 = vld [vmem:[#allocation92_spill] sm:$0xff]  ;;  %v8877_v38 = vld [vmem:[#allocation90_spill] sm:$0xff] }
 0x9fa   : > { %vm2786_vm7 = vcmp.eq.f32.partialorder %v2785_v44, 8.507059e+37  ;;  %v3447_v1 = vsel %vm3444_vm9, %v3446_v17, %v3442_v50  ;;  %vm7566_vm13 = vcmp.eq.f32.partialorder %v3429_v20, 8.507059e+37  ;;  %vm7577_vm10 = vmor %vm3411_vm5, %vm3412_vm4  ;;  %v3401_v8 = vand.u32 2147483647, %v6992_v24  ;;  %v8882_v62 = vld [vmem:[#allocation110_spill] sm:$0xff]  ;;  %v8883_v44 = vld [vmem:[#allocation24_spill] sm:$0xff] }
 0x9fb   : > { %v2780_v11 = vadd.f32 %v4551_v2, %v2779_v41  ;;  %v3344_v28 = vsel %vm7550_vm2, %v7153_v48, %v7500_v13  ;;  %v3025_v4 = vand.u32 2147483648, %v7511_v5  ;;  %v3414_v0 = vsel %vm7577_vm10, %v7377_v9, %v3410_v3  ;;  %v8880_v41 = vld [vmem:[#allocation79_spill] sm:$0xff]  ;;  %v8885_v17 = vld [vmem:[#allocation32_spill] sm:$0xff] }
 0x9fc   : > { %v7594_v20 = vpop.eup %4552  ;;  %vm3383_vm1 = vweird.f32 %v6873_v19  ;;  %v3574_v48 = vmul.f32 %v6600_v35, %v3447_v1  ;;  %v3575_v13 = vmul.f32 %v6606_v63, %v3447_v1  ;;  %vm3398_vm4 = vweird.f32 %v7297_v23  ;;  %v8873_v35 = vld [vmem:[#allocation54_spill] sm:$0xff]  ;;  %v8886_v3 = vld [vmem:[#allocation23_spill] sm:$0xff]  ;;  %v8889_v1 = vld [vmem:[#allocation100_spill] sm:$0xff] }
 0x9fd   : > { %3656 = vmatpush.xpose.msrb.mxu1 %v7229_v58  ;;  %3676 = vmatpush.xpose.msra.mxu2 %v7232_v21  ;;  %v2784_v36 = vsel %vm2783_vm6, %v4551_v2, %v2780_v11  ;;  %v3428_v21 = vsel %vm7562_vm14, %v7429_v54, %v3424_v45  ;;  %vm3355_vm5 = vweird.f32 %v6933_v15  ;;  %4556 = vrcp.f32 %v7147_v16 }
 0x9fe   : > { %v2789_v58 = vsel %vm2786_vm7, %v2788_v7, %v2784_v36  ;;  %v7613_v63 = vmul.f32 %v8873_v35, %v7447_v37  ;;  %vm3369_vm8 = vweird.f32 %v6864_v42  ;;  %v3419_v9 = vsel %vm7527_vm3, %v7401_v61, %v3414_v0  ;;  %vm7640_vm3 = vmor %vm3397_vm12, %vm3398_vm4  ;;  %v8888_v7 = vld [vmem:[#allocation75_spill] sm:$0xff]  ;;  %v8896_v0 = vld [vmem:[#allocation122_spill] sm:$0xff] }
 0x9ff   : > { %v3480_v54 = vmul.f32 %v6824_v6, %v2789_v58  ;;  %v3481_v12 = vmul.f32 %v6826_v25, %v2789_v58  ;;  %v3396_v6 = vadd.f32 %v7297_v23, %v7399_v27  ;;  %v7606_v25 = vmul.f32 %v7458_v53, %v3044_v52  ;;  %v8923_v35 = vld [vmem:[#allocation106_spill] sm:$0xff] }
 0xa00   : > { %vm7621_vm0 = vcmp.eq.f32.partialorder %v3401_v8, 8.507059e+37  ;;  %v3359_v52 = vand.u32 2147483647, %v6933_v15  ;;  %v3349_v37 = vsel %vm7533_vm11, %v8876_v32, %v3344_v28  ;;  %v7631_v18 = vmul.f32 %v7594_v20, %v7511_v5  ;;  %v7696_v32 = vpop.xlane.xlu2 %2508 }
 0xa01   : > { %3657 = vmatpush.xpose.msrb.mxu1 %v7097_v39  ;;  %3677 = vmatpush.xpose.msra.mxu2 %v7107_v33  ;;  %v3433_v39 = vsel %vm7566_vm13, %v3432_v29, %v3428_v21  ;;  %v7615_v33 = vpop.eup %4554  ;;  %v7633_v47 = vor.u32 1.1754944e-38, %v3025_v4  ;;  %4558 = vrcp.f32 %v8877_v38  ;;  %v3373_v56 = vand.u32 2147483647, %v6864_v42  ;;  %v8887_v29 = vld [vmem:[#allocation124_spill] sm:$0xff]  ;;  %v8893_v21 = vld [vmem:[#allocation27_spill] sm:$0xff] }
 0xa02   : > { %3631 = vmatpush.xpose.msrb.mxu3 %v3480_v54  ;;  %3651 = vmatpush.xpose.msrb.mxu0 %v3481_v12  ;;  %4560 = vrcp.f32 %v8880_v41  ;;  %v3572_v46 = vmul.f32 %v8883_v44, %v3433_v39  ;;  %v3573_v55 = vmul.f32 %v8884_v26, %v3433_v39  ;;  %v3400_v24 = vsel %vm7640_vm3, %v7297_v23, %v3396_v6  ;;  %v8895_v4 = vld [vmem:[#allocation55_spill] sm:$0xff]  ;;  %v8899_v6 = vld [vmem:[#allocation101_spill] sm:$0xff] }
 0xa03   : > { %v3295_v50 = vmul.f32 %v7615_v33, %v7080_v10  ;;  %v3305_v45 = vand.u32 2147483648, %v7080_v10  ;;  %v3570_v11 = vmul.f32 %v8885_v17, %v3419_v9  ;;  %v3571_v30 = vmul.f32 %v8886_v3, %v3419_v9  ;;  %v7670_v58 = vpop.eup %4556  ;;  %v8907_v26 = vld [vmem:[#allocation121_spill] sm:$0xff]  ;;  %v8912_v3 = vld [vmem:[#allocation111_spill] sm:$0xff] }
 0xa04   : > { %vm3089_vm11 = vweird.f32 %v8887_v29  ;;  %v3382_v36 = vadd.f32 %v8888_v7, %v7303_v22  ;;  %vm3384_vm12 = vweird.f32 %v8888_v7  ;;  %vm3356_vm2 = vweird.f32 %v8889_v1  ;;  %v8894_v22 = vld [vmem:[#allocation91_spill] sm:$0xff]  ;;  %v8911_v17 = vld [vmem:[#allocation97_spill] sm:$0xff] }
 0xa05   : > { %3658 = vmatpush.xpose.msrb.mxu1 %v8881_v34  ;;  %3678 = vmatpush.xpose.msra.mxu2 %v8882_v62  ;;  %vm7663_vm9 = vcmp.eq.f32.partialorder %v3359_v52, 8.507059e+37  ;;  %v7668_v40 = vmul.f32 %v8892_v43, %v3349_v37  ;;  %v3405_v2 = vsel %vm7621_vm0, %v8893_v21, %v3400_v24  ;;  %v3387_v8 = vand.u32 2147483647, %v6873_v19  ;;  %vm7702_vm14 = vmor %vm3383_vm1, %vm3384_vm12  ;;  %v8904_v62 = vld [vmem:[#allocation22_spill] sm:$0xff]  ;;  %v8908_v24 = vld [vmem:[#allocation67_spill] sm:$0xff] }
 0xa06   : > { %3696 = vmatpush.xpose.msra.mxu3 %v3574_v48  ;;  %3716 = vmatpush.xpose.msra.mxu0 %v3575_v13  ;;  %v3354_v28 = vadd.f32 %v8889_v1, %v8894_v22  ;;  %v7679_v54 = vmul.f32 %v8895_v4, %v3349_v37  ;;  %v3016_v12 = vsub.f32 1.0, %v7631_v18  ;;  %v8897_v48 = vld [vmem:[#allocation127_spill] sm:$0xff]  ;;  %v8898_v13 = vld [vmem:[#allocation21_spill] sm:$0xff]  ;;  %vm3370_vm6 = vweird.f32 %v8899_v6  ;;  %vm7720_vm13 = vmor %vm3355_vm5, %vm3356_vm2 }
 0xa07   : > { %v3368_v39 = vadd.f32 %v8899_v6, %v8898_v13  ;;  %vm7687_vm7 = vcmp.eq.f32.partialorder %v3373_v56, 8.507059e+37  ;;  %v7691_v9 = vpop.eup %4558  ;;  %v3296_v27 = vsub.f32 1.0, %v3295_v50  ;;  %v7693_v52 = vor.u32 1.1754944e-38, %v3305_v45  ;;  %vm7732_vm4 = vmor %vm3369_vm8, %vm3370_vm6  ;;  %v8915_v21 = vld [vmem:[#allocation63_spill] sm:$0xff]  ;;  %v8917_v13 = vld [vmem:[#allocation93_spill] sm:$0xff] }
 0xa08   : > { %4562 = vrcp.f32 %v7587_v49  ;;  %v3093_v18 = vand.u32 2147483647, %v8887_v29  ;;  %v7707_v61 = vpop.eup %4560  ;;  %v3309_v56 = vmul.f32 %v7670_v58, %v7147_v16  ;;  %v3319_v34 = vand.u32 2147483648, %v7147_v16 }
 0xa09   : > { %3659 = vmatpush.xpose.msrb.mxu1 %v8896_v0  ;;  %3679 = vmatpush.xpose.msra.mxu2 %v8897_v48  ;;  %v3568_v44 = vmul.f32 %v8904_v62, %v3405_v2  ;;  %v3386_v19 = vsel %vm7702_vm14, %v8888_v7, %v3382_v36  ;;  %vm3285_vm10 = vweird.f32 %v8907_v26  ;;  %v3569_v50 = vmul.f32 %v8908_v24, %v3405_v2  ;;  %v8914_v7 = vld [vmem:[#allocation25_spill] sm:$0xff]  ;;  %v8916_v0 = vld [vmem:[#allocation70_spill] sm:$0xff] }
 0xa0a   : > { %3697 = vmatpush.xpose.msra.mxu3 %v3572_v46  ;;  %3717 = vmatpush.xpose.msra.mxu0 %v3573_v55  ;;  %v7725_v55 = vpop.xlane.xlu1 %2463  ;;  %vm3388_vm1 = vcmp.eq.f32.partialorder %v3387_v8, 8.507059e+37  ;;  %v3358_v15 = vsel %vm7720_vm13, %v8889_v1, %v3354_v28  ;;  %vm3090_vm5 = vweird.f32 %v8911_v17  ;;  %4564 = vrcp.f32 %v7696_v32  ;;  %v8925_v62 = vld [vmem:[#allocation17_spill] sm:$0xff] }
 0xa0b   : > { %v3372_v42 = vsel %vm7732_vm4, %v8899_v6, %v3368_v39  ;;  %v3088_v36 = vadd.f32 %v8911_v17, %v8914_v7  ;;  %v7751_v1 = vmul.f32 %v7594_v20, %v3016_v12  ;;  %v3057_v43 = vmul.f32 %v7707_v61, %v8880_v41  ;;  %vm7776_vm8 = vmor %vm3089_vm11, %vm3090_vm5  ;;  %v8928_v7 = vld [vmem:[#allocation26_spill] sm:$0xff]  ;;  %v8932_v39 = vld [vmem:[#allocation36_spill] sm:$0xff] }
 0xa0c   : > { %4566 = vrcp.f32 %v7389_v57  ;;  %v3391_v2 = vsel %vm3388_vm1, %v8915_v21, %v3386_v19  ;;  %v7758_v8 = vmul.f32 %v7615_v33, %v3296_v27  ;;  %v3310_v22 = vsub.f32 1.0, %v3309_v56  ;;  %v8922_v56 = vld [vmem:[#allocation105_spill] sm:$0xff] }
 0xa0d   : > { %3660 = vmatpush.xpose.msrb.mxu1 %v8912_v3  ;;  %v3067_v28 = vand.u32 2147483648, %v8880_v41  ;;  %4568 = vrcp.f32 %v7725_v55  ;;  %v7764_v12 = vor.u32 1.1754944e-38, %v3319_v34  ;;  %v3377_v48 = vsel %vm7687_vm7, %v8916_v0, %v3372_v42  ;;  %v8924_v34 = vld [vmem:[#allocation41_spill] sm:$0xff]  ;;  %v8931_v0 = vld [vmem:[#allocation50_spill] sm:$0xff] }
 0xa0e   : > { %3698 = vmatpush.xpose.msra.mxu3 %v3570_v11  ;;  %3718 = vmatpush.xpose.msra.mxu0 %v3571_v30  ;;  %v3071_v11 = vmul.f32 %v7691_v9, %v8877_v38  ;;  %v8913_v30 = vld [vmem:[#allocation76_spill] sm:$0xff]  ;;  %v7762_v4 = vpop.eup %4562  ;;  %v3363_v6 = vsel %vm7663_vm9, %v8917_v13, %v3358_v15  ;;  %vm7780_vm0 = vcmp.eq.f32.partialorder %v3093_v18, 8.507059e+37  ;;  %v3566_v23 = vmul.f32 %v8924_v34, %v3391_v2 }
 0xa0f   : > { %3680 = vmatpush.xpose.msra.mxu2 %v8913_v30  ;;  %v3092_v29 = vsel %vm7776_vm8, %v8911_v17, %v3088_v36  ;;  %v3058_v19 = vsub.f32 1.0, %v3057_v43  ;;  %v3081_v46 = vand.u32 2147483648, %v8877_v38  ;;  %v3284_v18 = vadd.f32 %v7309_v60, %v7406_v59  ;;  %v8926_v17 = vld [vmem:[#allocation52_spill] sm:$0xff]  ;;  %v7807_v59 = vpop.xlane.xlu2 %2457  ;;  %v8927_v30 = vld [vmem:[#allocation53_spill] sm:$0xff] }
 0xa10   : > { %v3072_v37 = vsub.f32 1.0, %v3071_v11  ;;  %vm3286_vm3 = vweird.f32 %v7309_v60  ;;  %v7795_v24 = vpop.eup %4564  ;;  %v7798_v45 = vor.u32 1.1754944e-38, %v3067_v28  ;;  %v3253_v15 = vmul.f32 %v7762_v4, %v7587_v49  ;;  %v8930_v28 = vld [vmem:[#allocation69_spill] sm:$0xff] }
 0xa11   : > { %3661 = vmatpush.xpose.msrb.mxu1 %v8922_v56  ;;  %v3562_v11 = vmul.f32 %v8926_v17, %v3363_v6  ;;  %vm3047_vm11 = vweird.f32 %v7205_v31  ;;  %vm3075_vm12 = vweird.f32 %v8877_v38  ;;  %v3563_v42 = vmul.f32 %v8927_v30, %v3363_v6  ;;  %vm7827_vm9 = vmor %vm3285_vm10, %vm3286_vm3  ;;  %v8938_v17 = vld [vmem:[#allocation96_spill] sm:$0xff] }
 0xa12   : > { %3699 = vmatpush.xpose.msra.mxu3 %v3568_v44  ;;  %3719 = vmatpush.xpose.msra.mxu0 %v3569_v50  ;;  %v3567_v44 = vmul.f32 %v8925_v62, %v3391_v2  ;;  %v3311_v50 = vmul.f32 %v7670_v58, %v3310_v22  ;;  %v7803_v3 = vpop.eup %4566  ;;  %v3097_v36 = vsel %vm7780_vm0, %v8928_v7, %v3092_v29  ;;  %v3289_v43 = vand.u32 2147483647, %v8907_v26  ;;  %v8929_v22 = vld [vmem:[#allocation68_spill] sm:$0xff]  ;;  %v8935_v26 = vld [vmem:[#allocation102_spill] sm:$0xff] }
 0xa13   : > { %3681 = vmatpush.xpose.msra.mxu2 %v8923_v35  ;;  %v7814_v21 = vpop.eup %4568  ;;  %vm3313_vm2 = vweird.f32 %v7147_v16  ;;  %v3073_v2 = vmul.f32 %v7691_v9, %v3072_v37  ;;  %v3564_v13 = vmul.f32 %v8931_v0, %v3377_v48  ;;  %v3565_v6 = vmul.f32 %v8932_v39, %v3377_v48 }
 0xa14   : > { %v3051_v56 = vand.u32 2147483647, %v7205_v31  ;;  %v3059_v37 = vmul.f32 %v7707_v61, %v3058_v19  ;;  %v7832_v35 = vor.u32 1.1754944e-38, %v3081_v46  ;;  %v3239_v34 = vmul.f32 %v7795_v24, %v7696_v32  ;;  %v8951_v31 = vld [vmem:[#allocation29_spill] sm:$0xff] }
 0xa15   : > { %3662 = vmatpush.xpose.msrb.mxu1 %v8929_v22  ;;  %v3288_v48 = vsel %vm7827_vm9, %v7309_v60, %v3284_v18  ;;  %vm3061_vm6 = vweird.f32 %v8880_v41  ;;  %4570 = vrcp.f32 %v7807_v59  ;;  %v7842_v62 = vmul.f32 %v8935_v26, %v3097_v36  ;;  %v7853_v18 = vpop.xlane.xlu1 %2505 }
 0xa16   : > { %3700 = vmatpush.xpose.msra.mxu3 %v3566_v23  ;;  %3720 = vmatpush.xpose.msra.mxu0 %v3567_v44  ;;  %v3254_v23 = vsub.f32 1.0, %v3253_v15  ;;  %v8936_v44 = vld [vmem:[#allocation35_spill] sm:$0xff]  ;;  %v3263_v19 = vand.u32 2147483648, %v7587_v49  ;;  %v3267_v46 = vmul.f32 %v7803_v3, %v7389_v57  ;;  %v3029_v60 = vmul.f32 %v7814_v21, %v7725_v55  ;;  %v8937_v15 = vld [vmem:[#allocation64_spill] sm:$0xff] }
 0xa17   : > { %3682 = vmatpush.xpose.msra.mxu2 %v8930_v28  ;;  %v7845_v29 = vmul.f32 %v8936_v44, %v3097_v36  ;;  %vm3290_vm7 = vcmp.eq.f32.partialorder %v3289_v43, 8.507059e+37  ;;  %vm3299_vm14 = vweird.f32 %v7080_v10  ;;  %v3074_v30 = vadd.f32 %v7691_v9, %v3073_v2  ;;  %v8941_v36 = vld [vmem:[#allocation65_spill] sm:$0xff] }
 0xa18   : > { %vm3076_vm13 = vweird.f32 %v7691_v9  ;;  %vm7859_vm10 = vcmp.eq.f32.partialorder %v3051_v56, 8.507059e+37  ;;  %v3293_v22 = vsel %vm3290_vm7, %v8941_v36, %v3288_v48  ;;  %v937_v28 = vld [vmem:[#allocation2 + $0x10] sm:$0xff]  ;;  %v3240_v43 = vsub.f32 1.0, %v3239_v34  ;;  %v936_v56 = vld [vmem:[#allocation2 + $0x20] sm:$0xff]  ;;  %v8945_v48 = vld [vmem:[#allocation48_spill] sm:$0xff] }
 0xa19   : > { %3663 = vmatpush.xpose.msrb.mxu1 %v8937_v15  ;;  %v3277_v0 = vand.u32 2147483648, %v7389_v57  ;;  %vm3048_vm1 = vweird.f32 %v7458_v53  ;;  %3632 = vmatmul.f32.vlgmr.msrb.gmra.mxu3 %v937_v28  ;;  %v7869_v2 = vmul.f32 %v7762_v4, %v3254_v23  ;;  %v3079_v39 = vand.u32 2147483647, %v8877_v38  ;;  %vm7879_vm5 = vmor %vm3075_vm12, %vm3076_vm13  ;;  %v8946_v23 = vld [vmem:[#allocation87_spill] sm:$0xff] }
 0xa1a   : > { %3701 = vmatpush.xpose.msra.mxu3 %v3564_v13  ;;  %3721 = vmatpush.xpose.msra.mxu0 %v3565_v6  ;;  %v3046_v13 = vadd.f32 %v7458_v53, %v7606_v25  ;;  %v3312_v6 = vadd.f32 %v7670_v58, %v3311_v50  ;;  %vm3314_vm4 = vweird.f32 %v7670_v58  ;;  %v3268_v27 = vsub.f32 1.0, %v3267_v46  ;;  %vm7900_vm0 = vmor %vm3047_vm11, %vm3048_vm1  ;;  %v935_v36 = vld [vmem:[#allocation2 + $0x40] sm:$0xff]  ;;  %v8964_v46 = vld [vmem:[#allocation108_spill] sm:$0xff] }
 0xa1b   : > { %3683 = vmatpush.xpose.msra.mxu2 %v8938_v17  ;;  %v3030_v34 = vsub.f32 1.0, %v3029_v60  ;;  %4572 = vrcp.f32 %v7853_v18  ;;  %v7886_v50 = vpop.eup %4570  ;;  %v3078_v26 = vsel %vm7879_vm5, %v7691_v9, %v3074_v30  ;;  %v3060_v38 = vadd.f32 %v7707_v61, %v3059_v37  ;;  %vm7911_vm3 = vmor %vm3313_vm2, %vm3314_vm4  ;;  %3592 = vmatmul.f32.vlgmr.msra.gmra.mxu1 %v935_v36 }
 0xa1c   : > { %3612 = vmatmul.f32.vlgmr.msrb.gmra.mxu2 %v936_v56  ;;  %vm3062_vm8 = vweird.f32 %v7707_v61  ;;  %v3317_v44 = vand.u32 2147483647, %v7147_v16  ;;  %v7905_v60 = vmul.f32 %v7795_v24, %v3240_v43  ;;  %v3050_v37 = vsel %vm7900_vm0, %v7458_v53, %v3046_v13  ;;  %v938_v53 = vld [vmem:[#allocation2 + $0x38] sm:$0xff] }
 0xa1d   : > { %3664 = vmatpush.xpose.msrb.mxu1 %v8945_v48  ;;  %vm3300_vm11 = vweird.f32 %v7615_v33  ;;  %v7920_v15 = vmul.f32 %v8951_v31, %v3293_v22  ;;  %vm3080_vm12 = vcmp.eq.f32.partialorder %v3079_v39, 8.507059e+37  ;;  %v3065_v16 = vand.u32 2147483647, %v8880_v41  ;;  %vm7941_vm9 = vmor %vm3061_vm6, %vm3062_vm8  ;;  %3652 = vmatmul.f32.vlgmr.msrb.gmra.mxu0 %v938_v53  ;;  %v8960_v48 = vld [vmem:[#allocation74_spill] sm:$0xff] }
 0xa1e   : > { %3702 = vmatpush.xpose.msra.mxu3 %v3562_v11  ;;  %3722 = vmatpush.xpose.msra.mxu0 %v3563_v42  ;;  %v8944_v11 = vld [vmem:[#allocation77_spill] sm:$0xff]  ;;  %v3316_v17 = vsel %vm7911_vm3, %v7670_v58, %v3312_v6  ;;  %v3298_v30 = vadd.f32 %v7615_v33, %v7758_v8  ;;  %vm3019_vm2 = vweird.f32 %v7511_v5  ;;  %v3083_v28 = vsel %vm3080_vm12, %v7832_v35, %v3078_v26  ;;  %vm7965_vm1 = vmor %vm3299_vm14, %vm3300_vm11  ;;  %v8961_v26 = vld [vmem:[#allocation34_spill] sm:$0xff] }
 0xa1f   : > { %v7884_v42 = vmul.f32 %v8944_v11, %v3293_v22  ;;  %3684 = vmatpush.xpose.msra.mxu2 %v8946_v23  ;;  %v7931_v22 = vor.u32 1.1754944e-38, %v3277_v0  ;;  %v3269_v8 = vmul.f32 %v7803_v3, %v3268_v27  ;;  %vm3271_vm7 = vweird.f32 %v7389_v57  ;;  %v8957_v6 = vld [vmem:[#allocation37_spill] sm:$0xff]  ;;  %v8958_v27 = vld [vmem:[#allocation39_spill] sm:$0xff] }
 0xa20   : > { %v3064_v35 = vsel %vm7941_vm9, %v7707_v61, %v3060_v38  ;;  %vm3318_vm13 = vcmp.eq.f32.partialorder %v3317_v44, 8.507059e+37  ;;  %v3303_v41 = vand.u32 2147483647, %v7080_v10  ;;  %vm3033_vm6 = vweird.f32 %v7725_v55  ;;  %v8973_v61 = vld [vmem:[#allocation109_spill] sm:$0xff] }
 0xa21   : > { %3665 = vmatpush.xpose.msrb.mxu1 %v7842_v62  ;;  %v7953_v43 = vpop.eup %4572  ;;  %v3039_v0 = vand.u32 2147483648, %v7725_v55  ;;  %v3321_v13 = vsel %vm3318_vm13, %v7764_v12, %v3316_v17  ;;  %v3055_v62 = vsel %vm7859_vm10, %v7472_v14, %v3050_v37  ;;  %v3523_v56 = vmul.f32 %v8957_v6, %v3083_v28  ;;  %v3738_v6 = vld [vmem:[%s8181_s7 + $0x10] sm:$0xff] }
 0xa22   : > { %3703 = vmatpush.xpose.msra.mxu3 %v7668_v40  ;;  %3723 = vmatpush.xpose.msra.mxu0 %v7679_v54  ;;  %v3001_v40 = vmul.f32 %v7886_v50, %v7807_v59  ;;  %v3031_v54 = vmul.f32 %v7814_v21, %v3030_v34  ;;  %vm3066_vm4 = vcmp.eq.f32.partialorder %v3065_v16, 8.507059e+37  ;;  %v3302_v14 = vsel %vm7965_vm1, %v7615_v33, %v3298_v30  ;;  %v8959_v34 = vld [vmem:[#allocation42_spill] sm:$0xff] }
 0xa23   : > { %3685 = vmatpush.xpose.msra.mxu2 %v7845_v29  ;;  %v8956_v29 = vld [vmem:[#allocation115_spill] sm:$0xff]  ;;  %v3069_v10 = vsel %vm3066_vm4, %v7798_v45, %v3064_v35  ;;  %vm3034_vm14 = vweird.f32 %v7814_v21  ;;  %vm3257_vm10 = vweird.f32 %v7587_v49  ;;  %vm3304_vm5 = vcmp.eq.f32.partialorder %v3303_v41, 8.507059e+37  ;;  %v8966_v30 = vld [vmem:[#allocation38_spill] sm:$0xff] }
 0xa24   : > { %v3522_v39 = vmul.f32 %v8956_v29, %v3083_v28  ;;  %v3002_v12 = vsub.f32 1.0, %v3001_v40  ;;  %v3032_v7 = vadd.f32 %v7814_v21, %v3031_v54  ;;  %vm3020_vm8 = vweird.f32 %v7594_v20  ;;  %vm7995_vm0 = vmor %vm3033_vm6, %vm3034_vm14  ;;  %v8969_v54 = vld [vmem:[#allocation30_spill] sm:$0xff] }
 0xa25   : > { %v3225_v33 = vmul.f32 %v7953_v43, %v7853_v18  ;;  %v3307_v45 = vsel %vm3304_vm5, %v7693_v52, %v3302_v14  ;;  %v3037_v25 = vand.u32 2147483647, %v7725_v55  ;;  %v3018_v11 = vadd.f32 %v7594_v20, %v7751_v1  ;;  %v8965_v55 = vld [vmem:[#allocation119_spill] sm:$0xff]  ;;  %vm8013_vm11 = vmor %vm3019_vm2, %vm3020_vm8 }
 0xa26   : > { %3704 = vmatpush.xpose.msra.mxu3 %v7494_v51  ;;  %3724 = vmatpush.xpose.msra.mxu0 %v7613_v63  ;;  %v3556_v51 = vmul.f32 %v8958_v27, %v3321_v13  ;;  %v3557_v63 = vmul.f32 %v8959_v34, %v3321_v13  ;;  %v3520_v23 = vmul.f32 %v8960_v48, %v3069_v10  ;;  %vm3272_vm3 = vweird.f32 %v7803_v3  ;;  %v8972_v13 = vld [vmem:[#allocation88_spill] sm:$0xff]  ;;  %v8984_v48 = vld [vmem:[#allocation125_spill] sm:$0xff] }
 0xa27   : > { %3666 = vmatpush.xpose.msrb.mxu1 %v3522_v39  ;;  %3686 = vmatpush.xpose.msra.mxu2 %v3523_v56  ;;  %v3521_v38 = vmul.f32 %v8961_v26, %v3069_v10  ;;  %v3270_v52 = vadd.f32 %v7803_v3, %v3269_v8  ;;  %v3003_v1 = vmul.f32 %v7886_v50, %v3002_v12  ;;  %v3023_v31 = vand.u32 2147483647, %v7511_v5  ;;  %vm8026_vm9 = vmor %vm3271_vm7, %vm3272_vm3  ;;  %v8978_v12 = vld [vmem:[#allocation86_spill] sm:$0xff]  ;;  %v8979_v10 = vld [vmem:[#allocation85_spill] sm:$0xff] }
 0xa28   : > { %v3518_v9 = vmul.f32 %v8964_v46, %v3055_v62  ;;  %v3036_v37 = vsel %vm7995_vm0, %v7814_v21, %v3032_v7  ;;  %v3040_v16 = vor.u32 1.1754944e-38, %v3039_v0  ;;  %v3554_v17 = vmul.f32 %v8965_v55, %v3307_v45  ;;  %v8985_v26 = vld [vmem:[#allocation128_spill] sm:$0xff]  ;;  %v8987_v46 = vld [vmem:[#allocation89_spill] sm:$0xff] }
 0xa29   : > { %v3555_v53 = vmul.f32 %v8966_v30, %v3307_v45  ;;  %v3275_v40 = vand.u32 2147483647, %v7389_v57  ;;  %v3226_v21 = vsub.f32 1.0, %v3225_v33  ;;  %v3519_v28 = vmul.f32 %v8969_v54, %v3055_v62  ;;  %v8991_v54 = vld [vmem:[#allocation123_spill] sm:$0xff] }
 0xa2a   : > { %3705 = vmatpush.xpose.msra.mxu3 %v3556_v51  ;;  %3725 = vmatpush.xpose.msra.mxu0 %v3557_v63  ;;  %vm3038_vm12 = vcmp.eq.f32.partialorder %v3037_v25, 8.507059e+37  ;;  %v3022_v58 = vsel %vm8013_vm11, %v7594_v20, %v3018_v11  ;;  %v3274_v35 = vsel %vm8026_vm9, %v7803_v3, %v3270_v52  ;;  %v3256_v41 = vadd.f32 %v7762_v4, %v7869_v2  ;;  %v8981_v51 = vld [vmem:[#allocation20_spill] sm:$0xff]  ;;  %v8986_v52 = vld [vmem:[#allocation45_spill] sm:$0xff] }
 0xa2b   : > { %3667 = vmatpush.xpose.msrb.mxu1 %v3520_v23  ;;  %3687 = vmatpush.xpose.msra.mxu2 %v3521_v38  ;;  %v3041_v8 = vsel %vm3038_vm12, %v3040_v16, %v3036_v37  ;;  %vm3258_vm2 = vweird.f32 %v7762_v4  ;;  %vm3005_vm13 = vweird.f32 %v7807_v59  ;;  %vm3024_vm6 = vcmp.eq.f32.partialorder %v3023_v31, 8.507059e+37  ;;  %v8988_v16 = vld [vmem:[#allocation82_spill] sm:$0xff] }
 0xa2c   : > { %v3004_v57 = vadd.f32 %v7886_v50, %v3003_v1  ;;  %vm3006_vm7 = vweird.f32 %v7886_v50  ;;  %v3011_v20 = vand.u32 2147483648, %v7807_v59  ;;  %v3027_v0 = vsel %vm3024_vm6, %v7633_v47, %v3022_v58  ;;  %vm8050_vm4 = vmor %vm3257_vm10, %vm3258_vm2  ;;  %v942_v58 = vld [vmem:[#allocation2 + $0x28] sm:$0xff]  ;;  %v3739_v47 = vld [vmem:[%s8181_s7 + $0x18] sm:$0xff] }
 0xa2d   : > { %vm3276_vm1 = vcmp.eq.f32.partialorder %v3275_v40, 8.507059e+37  ;;  %v3261_v3 = vand.u32 2147483647, %v7587_v49  ;;  %v3227_v2 = vmul.f32 %v7953_v43, %v3226_v21  ;;  %v3516_v62 = vmul.f32 %v8972_v13, %v3041_v8  ;;  %vm8058_vm14 = vmor %vm3005_vm13, %vm3006_vm7  ;;  %v8980_v49 = vld [vmem:[#allocation19_spill] sm:$0xff]  ;;  %v8990_v40 = vld [vmem:[#allocation114_spill] sm:$0xff] }
 0xa2e   : > { %3706 = vmatpush.xpose.msra.mxu3 %v3554_v17  ;;  %3726 = vmatpush.xpose.msra.mxu0 %v3555_v53  ;;  %v3517_v29 = vmul.f32 %v8973_v61, %v3041_v8  ;;  %v3279_v39 = vsel %vm3276_vm1, %v7931_v22, %v3274_v35  ;;  %v3009_v22 = vand.u32 2147483647, %v7807_v59  ;;  %v3260_v56 = vsel %vm8050_vm4, %v7762_v4, %v3256_v41  ;;  %v8989_v17 = vld [vmem:[#allocation43_spill] sm:$0xff]  ;;  %v940_v53 = vld [vmem:[#allocation2 + $0x70] sm:$0xff] }
 0xa2f   : > { %3668 = vmatpush.xpose.msrb.mxu1 %v3518_v9  ;;  %3688 = vmatpush.xpose.msra.mxu2 %v3519_v28  ;;  %v3242_v14 = vadd.f32 %v7795_v24, %v7905_v60  ;;  %vm3244_vm10 = vweird.f32 %v7795_v24  ;;  %vm3243_vm5 = vweird.f32 %v7696_v32  ;;  %v3008_v59 = vsel %vm8058_vm14, %v7886_v50, %v3004_v57 }
 0xa30   : > { %v3550_v4 = vmul.f32 %v8978_v12, %v3279_v39  ;;  %v3551_v7 = vmul.f32 %v8979_v10, %v3279_v39  ;;  %vm3262_vm8 = vcmp.eq.f32.partialorder %v3261_v3, 8.507059e+37  ;;  %v3247_v60 = vand.u32 2147483647, %v7696_v32  ;;  %vm8083_vm0 = vmor %vm3243_vm5, %vm3244_vm10  ;;  %v3737_v39 = vld [vmem:[%s8181_s7 + $0x8] sm:$0xff]  ;;  %v4575_v10 = vld [vmem:[%s5000_s0 + $0x10] sm:$0xff] }
 0xa31   : > { %v3012_v27 = vor.u32 1.1754944e-38, %v3011_v20  ;;  %v3515_v34 = vmul.f32 %v8981_v51, %v3027_v0  ;;  %vm3010_vm3 = vcmp.eq.f32.partialorder %v3009_v22, 8.507059e+37  ;;  %v3246_v50 = vsel %vm8083_vm0, %v7795_v24, %v3242_v14  ;;  %v3747_v22 = vpop.permute.xlu0 %3746 }
 0xa32   : > { %3707 = vmatpush.xpose.msra.mxu3 %v7884_v42  ;;  %3727 = vmatpush.xpose.msra.mxu0 %v7920_v15  ;;  %v3264_v42 = vor.u32 1.1754944e-38, %v3263_v19  ;;  %v3249_v15 = vand.u32 2147483648, %v7696_v32  ;;  %v3514_v19 = vmul.f32 %v8980_v49, %v3027_v0  ;;  %v3228_v32 = vadd.f32 %v7953_v43, %v3227_v2 }
 0xa33   : > { %3669 = vmatpush.xpose.msrb.mxu1 %v3516_v62  ;;  %3689 = vmatpush.xpose.msra.mxu2 %v3517_v29  ;;  %vm3230_vm11 = vweird.f32 %v7953_v43  ;;  %vm3229_vm12 = vweird.f32 %v7853_v18  ;;  %v3235_v25 = vand.u32 2147483648, %v7853_v18  ;;  %v3013_v11 = vsel %vm3010_vm3, %v3012_v27, %v3008_v59  ;;  %v3736_v29 = vld [vmem:[%s8181_s7] sm:$0xff]  ;;  %v3752_v59 = vpop.permute.xlu1 %3751 }
 0xa34   : > { %v3265_v63 = vsel %vm3262_vm8, %v3264_v42, %v3260_v56  ;;  %v3250_v45 = vor.u32 1.1754944e-38, %v3249_v15  ;;  %vm3248_vm9 = vcmp.eq.f32.partialorder %v3247_v60, 8.507059e+37  ;;  %v3233_v44 = vand.u32 2147483647, %v7853_v18  ;;  %vm3231_vm2 = vmor %vm3229_vm12, %vm3230_vm11  ;;  %v939_v18 = vld [vmem:[#allocation2 + $0x60] sm:$0xff]  ;;  %v3757_v60 = vpop.permute.xlu2 %3756 }
 0xa35   : > { %v3548_v23 = vmul.f32 %v8984_v48, %v3265_v63  ;;  %v3549_v38 = vmul.f32 %v8985_v26, %v3265_v63  ;;  %v3512_v1 = vmul.f32 %v8986_v52, %v3013_v11  ;;  %v3513_v9 = vmul.f32 %v8987_v46, %v3013_v11  ;;  %v4574_v42 = vld [vmem:[%s5000_s0] sm:$0xff] }
 0xa36   : > { %3708 = vmatpush.xpose.msra.mxu3 %v3550_v4  ;;  %3728 = vmatpush.xpose.msra.mxu0 %v3551_v7  ;;  %v3251_v24 = vsel %vm3248_vm9, %v3250_v45, %v3246_v50  ;;  %v3232_v37 = vsel %vm3231_vm2, %v7953_v43, %v3228_v32  ;;  %v3236_v31 = vor.u32 1.1754944e-38, %v3235_v25  ;;  %vm3234_vm13 = vcmp.eq.f32.partialorder %v3233_v44, 8.507059e+37  ;;  %v941_v43 = vld [vmem:[#allocation2 + $0x78] sm:$0xff]  ;;  %v4577_v50 = vld [vmem:[%s5000_s0 + $0x30] sm:$0xff] }
 0xa37   : > { %3670 = vmatpush.xpose.msrb.mxu1 %v3514_v19  ;;  %3690 = vmatpush.xpose.msra.mxu2 %v3515_v34  ;;  %v3546_v55 = vmul.f32 %v8988_v16, %v3251_v24  ;;  %v3547_v30 = vmul.f32 %v8989_v17, %v3251_v24  ;;  %v4576_v19 = vld [vmem:[%s5000_s0 + $0x20] sm:$0xff] }
 0xa38   : > { %v3237_v36 = vsel %vm3234_vm13, %v3236_v31, %v3232_v37 }
 0xa39   : > { %v3544_v21 = vmul.f32 %v8990_v40, %v3237_v36  ;;  %v3545_v28 = vmul.f32 %v8991_v54, %v3237_v36  ;;  %v3762_v34 = vpop.permute.xlu0 %3761 }
 0xa3a   : > { %3709 = vmatpush.xpose.msra.mxu3 %v3548_v23  ;;  %3729 = vmatpush.xpose.msra.mxu0 %v3549_v38 }
 0xa3b   : > { %3671 = vmatpush.xpose.msrb.mxu1 %v3512_v1  ;;  %3691 = vmatpush.xpose.msra.mxu2 %v3513_v9 }
 0xa3e   : > { %3710 = vmatpush.xpose.msra.mxu3 %v3546_v55  ;;  %3730 = vmatpush.xpose.msra.mxu0 %v3547_v30 }
 0xa3f   : > { %3692 = vmatmul.f32.vlgmr.msra.gmra.mxu2 %v940_v53  ;;  %3672 = vmatmul.f32.vlgmr.msrb.gmra.mxu1 %v939_v18 }
 0xa42   : > { %3711 = vmatpush.xpose.msra.mxu3 %v3544_v21  ;;  %3731 = vmatpush.xpose.msra.mxu0 %v3545_v28 }
 0xa45   : > { %3712 = vmatmul.f32.vlgmr.msra.gmra.mxu3 %v941_v43  ;;  %3732 = vmatmul.f32.vlgmr.msra.gmra.mxu0 %v942_v58 }
 0xa98   : > { %v3593_v5 = vpop.f32.mrf.mxu1 }
 0xa9a   : > { %v3653_v8 = vpop.f32.mrf.mxu0 }
 0xa9c   : > { %v3633_v41 = vpop.f32.mrf.mxu3 }
 0xa9d   : > { %v3654_v62 = vadd.f32 %v3653_v8, %v3633_v41 }
 0xa9f   : > { %v3613_v35 = vpop.f32.mrf.mxu2 }
 0xaa0   : > { %v3614_v61 = vadd.f32 %v3613_v35, %v3593_v5 }
 0xabc   : > { %v3673_v57 = vpop.f32.mrf.mxu1 }
 0xac2   : > { %v3733_v20 = vpop.f32.mrf.mxu0  ;;  %v3693_v0 = vpop.f32.mrf.mxu2 }
 0xac3   : > { %v3694_v13 = vadd.f32 %v3693_v0, %v3673_v57 }
 0xac8   : > { %v3713_v3 = vpop.f32.mrf.mxu3 }
 0xac9   : > { %v3734_v2 = vadd.f32 %v3733_v20, %v3713_v3 }
 0xacb   : > { %3788 = vmatpush.msra.mxu1 %v3734_v2 }
 0xacd   : > { %3789 = vmatpush.msra.mxu1 %v3694_v13 }
 0xacf   : > { %3790 = vmatpush.msra.mxu1 %v3654_v62 }
 0xad1   : > { %3791 = vmatpush.msra.mxu1 %v3614_v61 }
 0xad2   : > { %4076 = vmatmul.msk.f32.vlgmr.msra.gmra.mxu1 %vm885_vm15, %v3736_v29 }
 0xada   : > { %4077 = vmatmul.msk.f32.gmra.mxu1 %vm885_vm15, %v3737_v39 }
 0xae2   : > { %4078 = vmatmul.msk.f32.gmra.mxu1 %vm885_vm15, %v3738_v6 }
 0xaea   : > { %4079 = vmatmul.msk.f32.gmra.mxu1 %vm885_vm15, %v3739_v47 }
 0xb4f   : > { %v3793_v56 = vpop.f32.mrf.mxu1 }
 0xb50   : > { %v3794_v14 = vadd.f32 %v3793_v56, %v3747_v22 }
 0xb52   : > { %v3805_v15 = vadd.f32 %v4574_v42, %v3794_v14 }
 0xb54   : > { %3809 = vst [vmem:[%s4810_s21] sm:$0xff] %v3805_v15 }
 0xb57   : > { %v3796_v12 = vpop.f32.mrf.mxu1 }
 0xb58   : > { %v3797_v4 = vadd.f32 %v3796_v12, %v3752_v59 }
 0xb5a   : > { %v3806_v7 = vadd.f32 %v4575_v10, %v3797_v4 }
 0xb5c   : > { %3810 = vst [vmem:[%s4810_s21 + $0x8] sm:$0xff] %v3806_v7 }
 0xb5f   : > { %v3799_v27 = vpop.f32.mrf.mxu1 }
 0xb60   : > { %v3800_v49 = vadd.f32 %v3799_v27, %v3757_v60 }
 0xb62   : > { %v3807_v51 = vadd.f32 %v4576_v19, %v3800_v49 }
 0xb64   : > { %3811 = vst [vmem:[%s4810_s21 + $0x10] sm:$0xff] %v3807_v51 }
 0xb67   : > { %v3802_v63 = vpop.f32.mrf.mxu1 }
 0xb68   : > { %v3803_v33 = vadd.f32 %v3802_v63, %v3762_v34 }
 0xb6a   : > { %v3808_v32 = vadd.f32 %v4577_v50, %v3803_v33 }
 0xb6c   : > { %3812 = vst [vmem:[%s4810_s21 + $0x18] sm:$0xff] %v3808_v32 }
 0xb6d   : > { %4605 = shalt.err (!%p4602_p7)
}
 0xb6e   : > { %s4676_s0 = smov 128   ;;  %s4677_s21 = smov 256  }
 0xb6f   : > { %s4678_s14 = smov 8  }
 0xb70   : > { %4099 = dma.vmem_to_hbm [thread:$0]  (%p4780_p3), %s3828_s20, 512, %s3830_s13, %s3814_s28, %s4676_s0, %s4677_s21, %s4678_s14  }
 0xb71 PF: > { %p4105_p9 = scmp.ge.s32.totalorder %s4672_s16, 2  ;;  %s3844_s12 = sand.u32 1, %s4644_s30  }
 0xb72   : > { %s3845_s19 = scalar_lea.sflag [#allocation6], %s3844_s12 }
 0xb73   : > { %p4102_p10 = pnand %p4105_p9, %p4789_p8 }
 0xb75   : > { %p4103_p11 = pneg %p4102_p10 }
 0xb77   : > { %4639 = dma.done.wait (%p4103_p11), %s3845_s19, 512  }
 0xb78   : > { %4641 = vsyncadd (%p4103_p11), %s3845_s19, 4294966784  ;;  %s22_s16 = sadd.s32 1, %s4672_s16   ;;  %s8993_s12 = sld [smem:[#allocation8_spill]] }
 0xb79   : > { %p19_p12 = scmp.ge.s32.totalorder %s22_s16, 6   ;;  %s8994_s14 = sld [smem:[#allocation9_spill]] }
 0xb7a   : > { %s8995_s22 = sld [smem:[#allocation10_spill]]  ;;  %s8996_s30 = smov %s4648_s10 }
 0xb7b   : > { %s8997_s10 = smov %s4652_s11  ;;  %s8998_s11 = smov %s4798_s27 }
 0xb7c   : > { %s8999_s13 = smov %s4668_s15  ;;  %21 = sbr.rel (!%p19_p12) target bundleno = 7 (0x7), region = 96 }
 0xb80   : > { %s9000_s15 = smov %s8995_s22 }
 0xb81   :  { %3851 = vsyncpa [#allocation6], 1 }
 0xb82   :  { %3853 = vsyncpa [#allocation6 + $0x1], 1 }

</bundles_post_ra>
